<compile_context>
chip_gen: v5e
topology: v5e:2x2
jax: 0.10.0
libtpu: 0.0.40
codegen_flags: <defaults>
</compile_context>

<pallas_src>
import functools

import jax
import jax.numpy as jnp
from jax import lax
from jax.experimental import pallas as pl
from jax.experimental.pallas import tpu as pltpu

EPS = 1e-5
_HI = lax.Precision.HIGHEST


# ----------------------------------------------------------------------------
# Fused Block kernel
# ----------------------------------------------------------------------------
def _block_kernel(xg_ref, wslab_ref, vec_ref, wlT_ref, tT_ref, m_ref,
                  o_ref, h1s_ref, h2s_ref, im_ref,
                  *, guard, cw, nw, wtot, csp, n_imgs, n_valid, k1, k2, kblk):
    f32 = jnp.float32
    C = o_ref.shape[0]

    # Packed per-channel vectors: columns [b1, g1, be1, bl, b2, g2, be2, bt].
    v = vec_ref[...]
    b1, g1, be1, bl = v[:, 0:1], v[:, 1:2], v[:, 2:3], v[:, 3:4]
    b2, g2, be2, b3 = v[:, 4:5], v[:, 5:6], v[:, 6:7], v[:, 7:8]

    mC = jnp.broadcast_to(m_ref[...], (C, nw))       # hoisted mask broadcast
    inv_cnt = 1.0 / float(n_valid)

    def build_im2col(src_ref, k):
        """im[tap*C + c, :] = src[c, canvas shifted by tap] (aligned stores)."""
        for tap in range(k * k):
            kh, kw = tap // k, tap % k
            off = guard + (kh - 1) * cw + (kw - 1)   # uniform lane shift
            im_ref[tap * C:(tap + 1) * C, :] = src_ref[:, off:off + nw]

    def conv(lane0):
        """One K-stacked MXU matmul per conv (exact f32 via HIGHEST)."""
        return jnp.dot(wslab_ref[:, lane0:lane0 + kblk], im_ref[...],
                       preferred_element_type=f32, precision=_HI)

    def bn_train(a):
        """Training-mode BN over valid (masked) columns, biased variance."""
        mean = jnp.sum(a * mC, axis=1, keepdims=True) * inv_cnt
        d = (a - mean) * mC
        var = jnp.sum(d * d, axis=1, keepdims=True) * inv_cnt
        return (a - mean) * lax.rsqrt(var + EPS)

    def store_guarded(dst_ref, val):
        """Store the canvas slab once; guard strips stay exactly zero."""
        dst_ref[:, 0:guard] = jnp.zeros((C, guard), f32)
        dst_ref[:, guard + nw:wtot] = jnp.zeros((C, wtot - guard - nw), f32)
        dst_ref[:, guard:guard + nw] = val

    # ---- conv1 (k=4) + bias + ReLU -> BN1 -> + time embedding ---------------
    build_im2col(xg_ref, k1)
    a1 = jnp.maximum(conv(0) + b1, 0.0)

    te = jnp.maximum(jnp.dot(wlT_ref[...], tT_ref[...],
                             preferred_element_type=f32, precision=_HI) + bl,
                     0.0)                            # [C, NP]
    lane = lax.broadcasted_iota(jnp.int32, (1, nw), 1)
    te_cols = jnp.zeros((C, nw), f32)
    for n in range(n_imgs):                          # O(N) range selects, no sel
        ind = jnp.where((lane >= n * csp) & (lane < (n + 1) * csp), 1.0, 0.0)
        te_cols = te_cols + te[:, n:n + 1] * ind

    h1 = (bn_train(a1) * g1 + be1 + te_cols) * mC
    store_guarded(h1s_ref, h1)

    # Rows beyond k2*k2*C are never rewritten; zero them once so the padded
    # K=kblk contraction for conv2/transform is trivially exact (their weight
    # lanes beyond k2*k2*C are zero as well).
    im_ref[k2 * k2 * C:kblk, :] = jnp.zeros((kblk - k2 * k2 * C, nw), f32)

    # ---- conv2 (k=3) + bias + ReLU -> BN2 -----------------------------------
    build_im2col(h1s_ref, k2)
    a2 = jnp.maximum(conv(kblk) + b2, 0.0)
    h2 = (bn_train(a2) * g2 + be2) * mC
    store_guarded(h2s_ref, h2)

    # ---- transform conv: dense stride-1 on the canvas; wrapper decimates ----
    build_im2col(h2s_ref, k2)
    o_ref[...] = conv(2 * kblk) + b3


def _full_spec(shape):
    nd = len(shape)
    return pl.BlockSpec(shape, lambda i, _nd=nd: (0,) * _nd)


# ----------------------------------------------------------------------------
# Block forward (wrapper).  Params use HWIO conv weights (k, k, Cin, Cout).
# ----------------------------------------------------------------------------
def block_forward(x_nchw, t, p):
    x = x_nchw.astype(jnp.float32)
    N, Cin, H, W = x.shape
    k1 = p["w1"].shape[0]                      # 4
    k2 = p["w2"].shape[0]                      # 3
    Cout = p["w1"].shape[-1]

    # Canvas geometry: zero ring of width 1 == the conv padding.
    CH, CW = H + 2, W + 2                      # 18 x 18
    H1, W1 = H + 2 - k1 + 1, W + 2 - k1 + 1    # 15 x 15 (conv1/conv2 output)
    CS = CH * CW                               # 324 real lanes per image
    CSP = ((CS + 127) // 128) * 128            # 384: per-image lanes, 128-mult
    NW = N * CSP                               # 768 lanes (multiple of 128)
    GUARD = 128                                # >= max tap shift (k1-1)*(CW+1)
    assert GUARD >= (k1 - 1) * (CW + 1)
    WTOT = GUARD + NW + GUARD                  # 1024
    CINP = max(Cin, 8)                         # pad channels to a sublane group
    assert CINP == Cout, "kernel assumes padded in-channels == out-channels"
    NP = max(N, 8)                             # pad batch for the tiny te dot
    KBLK = 128                                 # stacked contraction depth
    assert k1 * k1 * CINP == KBLK and k2 * k2 * Cout <= KBLK

    # Input canvas: [Cin,N,CH,CW] -> per-image lane-padded -> guarded slab.
    xc = jnp.transpose(x, (1, 0, 2, 3))
    xc = jnp.pad(xc, ((0, CINP - Cin), (0, 0), (1, 1), (1, 1)))
    xc = jnp.pad(xc.reshape(CINP, N, CS), ((0, 0), (0, 0), (0, CSP - CS)))
    xg = jnp.pad(xc.reshape(CINP, NW), ((0, 0), (GUARD, GUARD)))

    # Validity mask: 15x15 content inside the 18x18 canvas; pad lanes are 0.
    m2 = jnp.zeros((CH, CW), jnp.float32).at[1:1 + H1, 1:1 + W1].set(1.0)
    mask = jnp.tile(jnp.pad(m2.reshape(CS), (0, CSP - CS)), (N,)).reshape(1, NW)

    # K-stacked conv weights, one [Cout, 3*KBLK] slab (single DMA for 3 convs).
    def stacked(w, cin_pad):
        k, _, ci, co = w.shape
        wt = jnp.transpose(w, (3, 0, 1, 2))            # [co, kh, kw, ci]
        wt = jnp.pad(wt, ((0, 0), (0, 0), (0, 0), (0, cin_pad - ci)))
        wt = wt.reshape(co, k * k * cin_pad).astype(jnp.float32)
        return jnp.pad(wt, ((0, 0), (0, KBLK - k * k * cin_pad)))

    wslab = jnp.concatenate(
        [stacked(p["w1"], CINP), stacked(p["w2"], Cout), stacked(p["wt"], Cout)],
        axis=1)                                        # [Cout, 3*KBLK]

    # All per-channel vectors packed into a single [Cout, 8] slab (single DMA).
    vecs = jnp.stack([p["b1"], p["g1"], p["be1"], p["bl"],
                      p["b2"], p["g2"], p["be2"], p["bt"]],
                     axis=1).astype(jnp.float32)       # [Cout, 8]

    wlT = p["wl"].T.astype(jnp.float32)                # [Cout, Tdim]
    tT = jnp.pad(t.astype(jnp.float32).T, ((0, 0), (0, NP - N)))   # [Tdim, NP]

    args = (xg, wslab, vecs, wlT, tT, mask)

    kernel = functools.partial(
        _block_kernel, guard=GUARD, cw=CW, nw=NW, wtot=WTOT, csp=CSP,
        n_imgs=N, n_valid=N * H1 * W1, k1=k1, k2=k2, kblk=KBLK)

    flops = 2 * NW * Cout * 3 * KBLK + 12 * Cout * NW
    bytes_accessed = int(sum(a.size for a in args) * 4 + Cout * NW * 4)

    out_dense = pl.pallas_call(
        kernel,
        out_shape=jax.ShapeDtypeStruct((Cout, NW), jnp.float32),
        grid_spec=pltpu.PrefetchScalarGridSpec(
            num_scalar_prefetch=0,
            grid=(1,),
            in_specs=[_full_spec(a.shape) for a in args],
            out_specs=_full_spec((Cout, NW)),
            scratch_shapes=[pltpu.VMEM((Cout, WTOT), jnp.float32),   # h1 canvas
                            pltpu.VMEM((Cout, WTOT), jnp.float32),   # h2 canvas
                            pltpu.VMEM((KBLK, NW), jnp.float32)]),   # im2col
        compiler_params=pltpu.CompilerParams(
            dimension_semantics=("arbitrary",)),
        cost_estimate=pl.CostEstimate(flops=flops, transcendentals=2 * Cout,
                                      bytes_accessed=bytes_accessed),
    )(*args)

    # Cheap stride-2 decimation of the dense transform output + NCHW layout.
    Ho = (H1 + 2 - 3) // 2 + 1
    Wo = (W1 + 2 - 3) // 2 + 1
    od = out_dense.reshape(Cout, N, CSP)[:, :, :CS].reshape(Cout, N, CH, CW)
    out = od[:, :, 1:1 + 2 * Ho:2, 1:1 + 2 * Wo:2]
    return jnp.transpose(out, (1, 0, 2, 3))


# ----------------------------------------------------------------------------
# Pure-JAX float32 reference (for in-script validation)
# ----------------------------------------------------------------------------
def _ref_forward(x_nchw, t, p):
    x = jnp.transpose(x_nchw, (0, 2, 3, 1)).astype(jnp.float32)

    def conv(h, w, b, stride):
        y = lax.conv_general_dilated(h, w, (stride, stride), [(1, 1), (1, 1)],
                                     dimension_numbers=("NHWC", "HWIO", "NHWC"),
                                     precision=_HI)
        return y + b

    def bn(h, g, be):
        mean = h.mean(axis=(0, 1, 2), keepdims=True)
        var = h.var(axis=(0, 1, 2), keepdims=True)
        return (h - mean) / jnp.sqrt(var + EPS) * g + be

    h = bn(jax.nn.relu(conv(x, p["w1"], p["b1"], 1)), p["g1"], p["be1"])
    te = jax.nn.relu(jnp.dot(t.astype(jnp.float32), p["wl"], precision=_HI)
                     + p["bl"])
    h = h + te[:, None, None, :]
    h = bn(jax.nn.relu(conv(h, p["w2"], p["b2"], 1)), p["g2"], p["be2"])
    out = conv(h, p["wt"], p["bt"], 2)
    return jnp.transpose(out, (0, 3, 1, 2))


# ----------------------------------------------------------------------------
if __name__ == "__main__":
    # Block(in_ch=4, out_ch=8, time_emb_dim=32, up=False); x: [2,4,16,16].
    N, Cin, Cout, Tdim, H, W = 2, 4, 8, 32, 16, 16

    key = jax.random.PRNGKey(0)
    ks = jax.random.split(key, 14)
    params = {
        "w1": jax.random.normal(ks[0], (4, 4, Cin, Cout), jnp.float32) * 0.1,
        "b1": jax.random.normal(ks[1], (Cout,), jnp.float32) * 0.1,
        "w2": jax.random.normal(ks[2], (3, 3, Cout, Cout), jnp.float32) * 0.1,
        "b2": jax.random.normal(ks[3], (Cout,), jnp.float32) * 0.1,
        "wt": jax.random.normal(ks[4], (3, 3, Cout, Cout), jnp.float32) * 0.1,
        "bt": jax.random.normal(ks[5], (Cout,), jnp.float32) * 0.1,
        "wl": jax.random.normal(ks[6], (Tdim, Cout), jnp.float32) * 0.1,
        "bl": jax.random.normal(ks[7], (Cout,), jnp.float32) * 0.1,
        "g1": 1.0 + jax.random.normal(ks[8], (Cout,), jnp.float32) * 0.1,
        "be1": jax.random.normal(ks[9], (Cout,), jnp.float32) * 0.1,
        "g2": 1.0 + jax.random.normal(ks[10], (Cout,), jnp.float32) * 0.1,
        "be2": jax.random.normal(ks[11], (Cout,), jnp.float32) * 0.1,
    }
    x = jax.random.normal(ks[12], (N, Cin, H, W), jnp.float32)
    t = jax.random.normal(ks[13], (N, Tdim), jnp.float32)

    out = jax.block_until_ready(jax.jit(block_forward)(x, t, params))
    ref = jax.block_until_ready(_ref_forward(x, t, params))

    assert out.shape == (N, Cout, 8, 8), out.shape
    max_err = float(jnp.max(jnp.abs(out - ref)))
    # All kernel matmuls run at HIGHEST (multi-pass f32) precision, so the
    # only deviations vs the f32 reference are reduction-order / rsqrt-level
    # (~1e-5); 5e-3 is a tight-but-safe bound.
    if max_err < 5e-3:
        print("KERNEL_OK")
    else:
        print(f"MISMATCH max_err={max_err}")
</pallas_src>

<mosaic_0001>
module attributes {stable_mosaic.version = 11 : i64} {
  func.func @_block_kernel(%arg0: i32, %arg1: memref<8x1024xf32, #tpu.memory_space<vmem>>, %arg2: memref<8x384xf32, #tpu.memory_space<vmem>>, %arg3: memref<8x8xf32, #tpu.memory_space<vmem>>, %arg4: memref<8x32xf32, #tpu.memory_space<vmem>>, %arg5: memref<32x8xf32, #tpu.memory_space<vmem>>, %arg6: memref<1x768xf32, #tpu.memory_space<vmem>>, %arg7: memref<8x768xf32, #tpu.memory_space<vmem>>, %arg8: memref<8x1024xf32, #tpu.memory_space<vmem>>, %arg9: memref<8x1024xf32, #tpu.memory_space<vmem>>, %arg10: memref<128x768xf32, #tpu.memory_space<vmem>>) attributes {dimension_semantics = [#tpu.dimension_semantics<arbitrary>], iteration_bounds = array<i64: 1>, scalar_prefetch = 0 : i64, scratch_operands = 3 : i64, tpu.core_type = #tpu.core_type<tc>, window_params = [{pipeline_mode = #tpu.pipeline_mode<synchronous>, transform_indices = @transform_0, window_bounds = array<i64: 8, 1024>}, {pipeline_mode = #tpu.pipeline_mode<synchronous>, transform_indices = @transform_1, window_bounds = array<i64: 8, 384>}, {pipeline_mode = #tpu.pipeline_mode<synchronous>, transform_indices = @transform_2, window_bounds = array<i64: 8, 8>}, {pipeline_mode = #tpu.pipeline_mode<synchronous>, transform_indices = @transform_3, window_bounds = array<i64: 8, 32>}, {pipeline_mode = #tpu.pipeline_mode<synchronous>, transform_indices = @transform_4, window_bounds = array<i64: 32, 8>}, {pipeline_mode = #tpu.pipeline_mode<synchronous>, transform_indices = @transform_5, window_bounds = array<i64: 1, 768>}, {pipeline_mode = #tpu.pipeline_mode<synchronous>, transform_indices = @transform_6, window_bounds = array<i64: 8, 768>}]} {
    %c0 = arith.constant 0 : index
    %c0_0 = arith.constant 0 : index
    %0 = vector.load %arg3[%c0, %c0_0] : memref<8x8xf32, #tpu.memory_space<vmem>>, vector<8x8xf32>
    %1 = vector.extract_strided_slice %0 {offsets = [0, 0], sizes = [8, 1], strides = [1, 1]} : vector<8x8xf32> to vector<8x1xf32>
    %2 = vector.extract_strided_slice %0 {offsets = [0, 1], sizes = [8, 1], strides = [1, 1]} : vector<8x8xf32> to vector<8x1xf32>
    %3 = vector.extract_strided_slice %0 {offsets = [0, 2], sizes = [8, 1], strides = [1, 1]} : vector<8x8xf32> to vector<8x1xf32>
    %4 = vector.extract_strided_slice %0 {offsets = [0, 3], sizes = [8, 1], strides = [1, 1]} : vector<8x8xf32> to vector<8x1xf32>
    %5 = vector.extract_strided_slice %0 {offsets = [0, 4], sizes = [8, 1], strides = [1, 1]} : vector<8x8xf32> to vector<8x1xf32>
    %6 = vector.extract_strided_slice %0 {offsets = [0, 5], sizes = [8, 1], strides = [1, 1]} : vector<8x8xf32> to vector<8x1xf32>
    %7 = vector.extract_strided_slice %0 {offsets = [0, 6], sizes = [8, 1], strides = [1, 1]} : vector<8x8xf32> to vector<8x1xf32>
    %8 = vector.extract_strided_slice %0 {offsets = [0, 7], sizes = [8, 1], strides = [1, 1]} : vector<8x8xf32> to vector<8x1xf32>
    %c0_1 = arith.constant 0 : index
    %c0_2 = arith.constant 0 : index
    %9 = vector.load %arg6[%c0_1, %c0_2] : memref<1x768xf32, #tpu.memory_space<vmem>>, vector<1x768xf32>
    %10 = vector.shape_cast %9 : vector<1x768xf32> to vector<1x768xf32>
    %11 = vector.broadcast %10 : vector<1x768xf32> to vector<8x768xf32>
    %c0_3 = arith.constant 0 : index
    %c109 = arith.constant 109 : index
    %12 = vector.load %arg1[%c0_3, %c109] : memref<8x1024xf32, #tpu.memory_space<vmem>>, vector<8x768xf32>
    %c0_4 = arith.constant 0 : index
    %c0_5 = arith.constant 0 : index
    %13 = vector.load %arg10[%c0_4, %c0_5] : memref<128x768xf32, #tpu.memory_space<vmem>>, vector<8x768xf32>
    tpu.vector_store %arg10[%c0_4, %c0_5], %12 {strides = array<i32>} : memref<128x768xf32, #tpu.memory_space<vmem>>, vector<8x768xf32>,
    %c0_6 = arith.constant 0 : index
    %c110 = arith.constant 110 : index
    %14 = vector.load %arg1[%c0_6, %c110] : memref<8x1024xf32, #tpu.memory_space<vmem>>, vector<8x768xf32>
    %c8 = arith.constant 8 : index
    %c0_7 = arith.constant 0 : index
    %15 = vector.load %arg10[%c8, %c0_7] : memref<128x768xf32, #tpu.memory_space<vmem>>, vector<8x768xf32>
    tpu.vector_store %arg10[%c8, %c0_7], %14 {strides = array<i32>} : memref<128x768xf32, #tpu.memory_space<vmem>>, vector<8x768xf32>,
    %c0_8 = arith.constant 0 : index
    %c111 = arith.constant 111 : index
    %16 = vector.load %arg1[%c0_8, %c111] : memref<8x1024xf32, #tpu.memory_space<vmem>>, vector<8x768xf32>
    %c16 = arith.constant 16 : index
    %c0_9 = arith.constant 0 : index
    %17 = vector.load %arg10[%c16, %c0_9] : memref<128x768xf32, #tpu.memory_space<vmem>>, vector<8x768xf32>
    tpu.vector_store %arg10[%c16, %c0_9], %16 {strides = array<i32>} : memref<128x768xf32, #tpu.memory_space<vmem>>, vector<8x768xf32>,
    %c0_10 = arith.constant 0 : index
    %c112 = arith.constant 112 : index
    %18 = vector.load %arg1[%c0_10, %c112] : memref<8x1024xf32, #tpu.memory_space<vmem>>, vector<8x768xf32>
    %c24 = arith.constant 24 : index
    %c0_11 = arith.constant 0 : index
    %19 = vector.load %arg10[%c24, %c0_11] : memref<128x768xf32, #tpu.memory_space<vmem>>, vector<8x768xf32>
    tpu.vector_store %arg10[%c24, %c0_11], %18 {strides = array<i32>} : memref<128x768xf32, #tpu.memory_space<vmem>>, vector<8x768xf32>,
    %c0_12 = arith.constant 0 : index
    %c127 = arith.constant 127 : index
    %20 = vector.load %arg1[%c0_12, %c127] : memref<8x1024xf32, #tpu.memory_space<vmem>>, vector<8x768xf32>
    %c32 = arith.constant 32 : index
    %c0_13 = arith.constant 0 : index
    %21 = vector.load %arg10[%c32, %c0_13] : memref<128x768xf32, #tpu.memory_space<vmem>>, vector<8x768xf32>
    tpu.vector_store %arg10[%c32, %c0_13], %20 {strides = array<i32>} : memref<128x768xf32, #tpu.memory_space<vmem>>, vector<8x768xf32>,
    %c0_14 = arith.constant 0 : index
    %c128 = arith.constant 128 : index
    %22 = vector.load %arg1[%c0_14, %c128] : memref<8x1024xf32, #tpu.memory_space<vmem>>, vector<8x768xf32>
    %c40 = arith.constant 40 : index
    %c0_15 = arith.constant 0 : index
    %23 = vector.load %arg10[%c40, %c0_15] : memref<128x768xf32, #tpu.memory_space<vmem>>, vector<8x768xf32>
    tpu.vector_store %arg10[%c40, %c0_15], %22 {strides = array<i32>} : memref<128x768xf32, #tpu.memory_space<vmem>>, vector<8x768xf32>,
    %c0_16 = arith.constant 0 : index
    %c129 = arith.constant 129 : index
    %24 = vector.load %arg1[%c0_16, %c129] : memref<8x1024xf32, #tpu.memory_space<vmem>>, vector<8x768xf32>
    %c48 = arith.constant 48 : index
    %c0_17 = arith.constant 0 : index
    %25 = vector.load %arg10[%c48, %c0_17] : memref<128x768xf32, #tpu.memory_space<vmem>>, vector<8x768xf32>
    tpu.vector_store %arg10[%c48, %c0_17], %24 {strides = array<i32>} : memref<128x768xf32, #tpu.memory_space<vmem>>, vector<8x768xf32>,
    %c0_18 = arith.constant 0 : index
    %c130 = arith.constant 130 : index
    %26 = vector.load %arg1[%c0_18, %c130] : memref<8x1024xf32, #tpu.memory_space<vmem>>, vector<8x768xf32>
    %c56 = arith.constant 56 : index
    %c0_19 = arith.constant 0 : index
    %27 = vector.load %arg10[%c56, %c0_19] : memref<128x768xf32, #tpu.memory_space<vmem>>, vector<8x768xf32>
    tpu.vector_store %arg10[%c56, %c0_19], %26 {strides = array<i32>} : memref<128x768xf32, #tpu.memory_space<vmem>>, vector<8x768xf32>,
    %c0_20 = arith.constant 0 : index
    %c145 = arith.constant 145 : index
    %28 = vector.load %arg1[%c0_20, %c145] : memref<8x1024xf32, #tpu.memory_space<vmem>>, vector<8x768xf32>
    %c64 = arith.constant 64 : index
    %c0_21 = arith.constant 0 : index
    %29 = vector.load %arg10[%c64, %c0_21] : memref<128x768xf32, #tpu.memory_space<vmem>>, vector<8x768xf32>
    tpu.vector_store %arg10[%c64, %c0_21], %28 {strides = array<i32>} : memref<128x768xf32, #tpu.memory_space<vmem>>, vector<8x768xf32>,
    %c0_22 = arith.constant 0 : index
    %c146 = arith.constant 146 : index
    %30 = vector.load %arg1[%c0_22, %c146] : memref<8x1024xf32, #tpu.memory_space<vmem>>, vector<8x768xf32>
    %c72 = arith.constant 72 : index
    %c0_23 = arith.constant 0 : index
    %31 = vector.load %arg10[%c72, %c0_23] : memref<128x768xf32, #tpu.memory_space<vmem>>, vector<8x768xf32>
    tpu.vector_store %arg10[%c72, %c0_23], %30 {strides = array<i32>} : memref<128x768xf32, #tpu.memory_space<vmem>>, vector<8x768xf32>,
    %c0_24 = arith.constant 0 : index
    %c147 = arith.constant 147 : index
    %32 = vector.load %arg1[%c0_24, %c147] : memref<8x1024xf32, #tpu.memory_space<vmem>>, vector<8x768xf32>
    %c80 = arith.constant 80 : index
    %c0_25 = arith.constant 0 : index
    %33 = vector.load %arg10[%c80, %c0_25] : memref<128x768xf32, #tpu.memory_space<vmem>>, vector<8x768xf32>
    tpu.vector_store %arg10[%c80, %c0_25], %32 {strides = array<i32>} : memref<128x768xf32, #tpu.memory_space<vmem>>, vector<8x768xf32>,
    %c0_26 = arith.constant 0 : index
    %c148 = arith.constant 148 : index
    %34 = vector.load %arg1[%c0_26, %c148] : memref<8x1024xf32, #tpu.memory_space<vmem>>, vector<8x768xf32>
    %c88 = arith.constant 88 : index
    %c0_27 = arith.constant 0 : index
    %35 = vector.load %arg10[%c88, %c0_27] : memref<128x768xf32, #tpu.memory_space<vmem>>, vector<8x768xf32>
    tpu.vector_store %arg10[%c88, %c0_27], %34 {strides = array<i32>} : memref<128x768xf32, #tpu.memory_space<vmem>>, vector<8x768xf32>,
    %c0_28 = arith.constant 0 : index
    %c163 = arith.constant 163 : index
    %36 = vector.load %arg1[%c0_28, %c163] : memref<8x1024xf32, #tpu.memory_space<vmem>>, vector<8x768xf32>
    %c96 = arith.constant 96 : index
    %c0_29 = arith.constant 0 : index
    %37 = vector.load %arg10[%c96, %c0_29] : memref<128x768xf32, #tpu.memory_space<vmem>>, vector<8x768xf32>
    tpu.vector_store %arg10[%c96, %c0_29], %36 {strides = array<i32>} : memref<128x768xf32, #tpu.memory_space<vmem>>, vector<8x768xf32>,
    %c0_30 = arith.constant 0 : index
    %c164 = arith.constant 164 : index
    %38 = vector.load %arg1[%c0_30, %c164] : memref<8x1024xf32, #tpu.memory_space<vmem>>, vector<8x768xf32>
    %c104 = arith.constant 104 : index
    %c0_31 = arith.constant 0 : index
    %39 = vector.load %arg10[%c104, %c0_31] : memref<128x768xf32, #tpu.memory_space<vmem>>, vector<8x768xf32>
    tpu.vector_store %arg10[%c104, %c0_31], %38 {strides = array<i32>} : memref<128x768xf32, #tpu.memory_space<vmem>>, vector<8x768xf32>,
    %c0_32 = arith.constant 0 : index
    %c165 = arith.constant 165 : index
    %40 = vector.load %arg1[%c0_32, %c165] : memref<8x1024xf32, #tpu.memory_space<vmem>>, vector<8x768xf32>
    %c112_33 = arith.constant 112 : index
    %c0_34 = arith.constant 0 : index
    %41 = vector.load %arg10[%c112_33, %c0_34] : memref<128x768xf32, #tpu.memory_space<vmem>>, vector<8x768xf32>
    tpu.vector_store %arg10[%c112_33, %c0_34], %40 {strides = array<i32>} : memref<128x768xf32, #tpu.memory_space<vmem>>, vector<8x768xf32>,
    %c0_35 = arith.constant 0 : index
    %c166 = arith.constant 166 : index
    %42 = vector.load %arg1[%c0_35, %c166] : memref<8x1024xf32, #tpu.memory_space<vmem>>, vector<8x768xf32>
    %c120 = arith.constant 120 : index
    %c0_36 = arith.constant 0 : index
    %43 = vector.load %arg10[%c120, %c0_36] : memref<128x768xf32, #tpu.memory_space<vmem>>, vector<8x768xf32>
    tpu.vector_store %arg10[%c120, %c0_36], %42 {strides = array<i32>} : memref<128x768xf32, #tpu.memory_space<vmem>>, vector<8x768xf32>,
    %c0_37 = arith.constant 0 : index
    %c0_38 = arith.constant 0 : index
    %44 = vector.load %arg2[%c0_37, %c0_38] : memref<8x384xf32, #tpu.memory_space<vmem>>, vector<8x128xf32>
    %c0_39 = arith.constant 0 : index
    %c0_40 = arith.constant 0 : index
    %45 = vector.load %arg10[%c0_39, %c0_40] : memref<128x768xf32, #tpu.memory_space<vmem>>, vector<128x768xf32>
    %cst = arith.constant dense<0.000000e+00> : vector<8x768xf32>
    %46 = tpu.matmul %44, %45, %cst {dimension_numbers = #tpu.dot_dimension_numbers<[1], [0], [0], [1], [0, 0, 1, 1], [], []>, precision = #tpu.contract_precision<fp32>} : vector<8x128xf32>, vector<128x768xf32>, vector<8x768xf32> -> vector<8x768xf32>
    %47 = vector.broadcast %1 : vector<8x1xf32> to vector<8x768xf32>
    %48 = arith.addf %46, %47 : vector<8x768xf32>
    %cst_41 = arith.constant 0.000000e+00 : f32
    %49 = vector.broadcast %cst_41 : f32 to vector<8x768xf32>
    %50 = arith.maximumf %48, %49 : vector<8x768xf32>
    %c0_42 = arith.constant 0 : index
    %c0_43 = arith.constant 0 : index
    %51 = vector.load %arg4[%c0_42, %c0_43] : memref<8x32xf32, #tpu.memory_space<vmem>>, vector<8x32xf32>
    %c0_44 = arith.constant 0 : index
    %c0_45 = arith.constant 0 : index
    %52 = vector.load %arg5[%c0_44, %c0_45] : memref<32x8xf32, #tpu.memory_space<vmem>>, vector<32x8xf32>
    %cst_46 = arith.constant dense<0.000000e+00> : vector<8x8xf32>
    %53 = tpu.matmul %51, %52, %cst_46 {dimension_numbers = #tpu.dot_dimension_numbers<[1], [0], [0], [1], [0, 0, 1, 1], [], []>, precision = #tpu.contract_precision<fp32>} : vector<8x32xf32>, vector<32x8xf32>, vector<8x8xf32> -> vector<8x8xf32>
    %54 = vector.broadcast %4 : vector<8x1xf32> to vector<8x8xf32>
    %55 = arith.addf %53, %54 : vector<8x8xf32>
    %cst_47 = arith.constant 0.000000e+00 : f32
    %56 = vector.broadcast %cst_47 : f32 to vector<8x8xf32>
    %57 = arith.maximumf %55, %56 : vector<8x8xf32>
    %58 = tpu.iota {dimensions = array<i32: 1>} : vector<1x768xi32>
    %cst_48 = arith.constant 0.000000e+00 : f32
    %59 = vector.broadcast %cst_48 : f32 to vector<8x768xf32>
    %c0_i32 = arith.constant 0 : i32
    %60 = vector.broadcast %c0_i32 : i32 to vector<1x768xi32>
    %61 = arith.cmpi sge, %58, %60 : vector<1x768xi32>
    %c384_i32 = arith.constant 384 : i32
    %62 = vector.broadcast %c384_i32 : i32 to vector<1x768xi32>
    %63 = arith.cmpi slt, %58, %62 : vector<1x768xi32>
    %64 = arith.andi %61, %63 : vector<1x768xi1>
    %cst_49 = arith.constant 1.000000e+00 : f32
    %cst_50 = arith.constant 0.000000e+00 : f32
    %65 = vector.broadcast %cst_49 : f32 to vector<1x768xf32>
    %66 = vector.broadcast %cst_50 : f32 to vector<1x768xf32>
    %67 = arith.select %64, %65, %66 : vector<1x768xi1>, vector<1x768xf32>
    %68 = vector.extract_strided_slice %57 {offsets = [0, 0], sizes = [8, 1], strides = [1, 1]} : vector<8x8xf32> to vector<8x1xf32>
    %69 = vector.broadcast %68 : vector<8x1xf32> to vector<8x768xf32>
    %70 = vector.broadcast %67 : vector<1x768xf32> to vector<8x768xf32>
    %71 = arith.mulf %69, %70 : vector<8x768xf32>
    %72 = arith.addf %59, %71 : vector<8x768xf32>
    %c384_i32_51 = arith.constant 384 : i32
    %73 = vector.broadcast %c384_i32_51 : i32 to vector<1x768xi32>
    %74 = arith.cmpi sge, %58, %73 : vector<1x768xi32>
    %c768_i32 = arith.constant 768 : i32
    %75 = vector.broadcast %c768_i32 : i32 to vector<1x768xi32>
    %76 = arith.cmpi slt, %58, %75 : vector<1x768xi32>
    %77 = arith.andi %74, %76 : vector<1x768xi1>
    %cst_52 = arith.constant 1.000000e+00 : f32
    %cst_53 = arith.constant 0.000000e+00 : f32
    %78 = vector.broadcast %cst_52 : f32 to vector<1x768xf32>
    %79 = vector.broadcast %cst_53 : f32 to vector<1x768xf32>
    %80 = arith.select %77, %78, %79 : vector<1x768xi1>, vector<1x768xf32>
    %81 = vector.extract_strided_slice %57 {offsets = [0, 1], sizes = [8, 1], strides = [1, 1]} : vector<8x8xf32> to vector<8x1xf32>
    %82 = vector.broadcast %81 : vector<8x1xf32> to vector<8x768xf32>
    %83 = vector.broadcast %80 : vector<1x768xf32> to vector<8x768xf32>
    %84 = arith.mulf %82, %83 : vector<8x768xf32>
    %85 = arith.addf %72, %84 : vector<8x768xf32>
    %86 = arith.mulf %50, %11 : vector<8x768xf32>
    %cst_54 = arith.constant dense<0.000000e+00> : vector<8xf32>
    %87 = vector.multi_reduction <add>, %86, %cst_54 [1] : vector<8x768xf32> to vector<8xf32>
    %88 = vector.shape_cast %87 : vector<8xf32> to vector<8x1xf32>
    %cst_55 = arith.constant 0.00222222228 : f32
    %89 = vector.broadcast %cst_55 : f32 to vector<8x1xf32>
    %90 = arith.mulf %88, %89 : vector<8x1xf32>
    %91 = vector.broadcast %90 : vector<8x1xf32> to vector<8x768xf32>
    %92 = arith.subf %50, %91 : vector<8x768xf32>
    %93 = arith.mulf %92, %11 : vector<8x768xf32>
    %94 = arith.mulf %93, %93 : vector<8x768xf32>
    %cst_56 = arith.constant dense<0.000000e+00> : vector<8xf32>
    %95 = vector.multi_reduction <add>, %94, %cst_56 [1] : vector<8x768xf32> to vector<8xf32>
    %96 = vector.shape_cast %95 : vector<8xf32> to vector<8x1xf32>
    %cst_57 = arith.constant 0.00222222228 : f32
    %97 = vector.broadcast %cst_57 : f32 to vector<8x1xf32>
    %98 = arith.mulf %96, %97 : vector<8x1xf32>
    %99 = vector.broadcast %90 : vector<8x1xf32> to vector<8x768xf32>
    %100 = arith.subf %50, %99 : vector<8x768xf32>
    %cst_58 = arith.constant 9.99999974E-6 : f32
    %101 = vector.broadcast %cst_58 : f32 to vector<8x1xf32>
    %102 = arith.addf %98, %101 : vector<8x1xf32>
    %103 = math.rsqrt %102 : vector<8x1xf32>
    %104 = vector.broadcast %103 : vector<8x1xf32> to vector<8x768xf32>
    %105 = arith.mulf %100, %104 : vector<8x768xf32>
    %106 = vector.broadcast %2 : vector<8x1xf32> to vector<8x768xf32>
    %107 = arith.mulf %105, %106 : vector<8x768xf32>
    %108 = vector.broadcast %3 : vector<8x1xf32> to vector<8x768xf32>
    %109 = arith.addf %107, %108 : vector<8x768xf32>
    %110 = arith.addf %109, %85 : vector<8x768xf32>
    %111 = arith.mulf %110, %11 : vector<8x768xf32>
    %cst_59 = arith.constant 0.000000e+00 : f32
    %112 = vector.broadcast %cst_59 : f32 to vector<8x128xf32>
    %c0_60 = arith.constant 0 : index
    %c0_61 = arith.constant 0 : index
    %113 = vector.load %arg8[%c0_60, %c0_61] : memref<8x1024xf32, #tpu.memory_space<vmem>>, vector<8x128xf32>
    tpu.vector_store %arg8[%c0_60, %c0_61], %112 {strides = array<i32>} : memref<8x1024xf32, #tpu.memory_space<vmem>>, vector<8x128xf32>,
    %cst_62 = arith.constant 0.000000e+00 : f32
    %114 = vector.broadcast %cst_62 : f32 to vector<8x128xf32>
    %c0_63 = arith.constant 0 : index
    %c896 = arith.constant 896 : index
    %115 = vector.load %arg8[%c0_63, %c896] : memref<8x1024xf32, #tpu.memory_space<vmem>>, vector<8x128xf32>
    tpu.vector_store %arg8[%c0_63, %c896], %114 {strides = array<i32>} : memref<8x1024xf32, #tpu.memory_space<vmem>>, vector<8x128xf32>,
    %c0_64 = arith.constant 0 : index
    %c128_65 = arith.constant 128 : index
    %116 = vector.load %arg8[%c0_64, %c128_65] : memref<8x1024xf32, #tpu.memory_space<vmem>>, vector<8x768xf32>
    tpu.vector_store %arg8[%c0_64, %c128_65], %111 {strides = array<i32>} : memref<8x1024xf32, #tpu.memory_space<vmem>>, vector<8x768xf32>,
    %cst_66 = arith.constant 0.000000e+00 : f32
    %117 = vector.broadcast %cst_66 : f32 to vector<56x768xf32>
    %c72_67 = arith.constant 72 : index
    %c0_68 = arith.constant 0 : index
    %118 = vector.load %arg10[%c72_67, %c0_68] : memref<128x768xf32, #tpu.memory_space<vmem>>, vector<56x768xf32>
    tpu.vector_store %arg10[%c72_67, %c0_68], %117 {strides = array<i32>} : memref<128x768xf32, #tpu.memory_space<vmem>>, vector<56x768xf32>,
    %c0_69 = arith.constant 0 : index
    %c109_70 = arith.constant 109 : index
    %119 = vector.load %arg8[%c0_69, %c109_70] : memref<8x1024xf32, #tpu.memory_space<vmem>>, vector<8x768xf32>
    %c0_71 = arith.constant 0 : index
    %c0_72 = arith.constant 0 : index
    %120 = vector.load %arg10[%c0_71, %c0_72] : memref<128x768xf32, #tpu.memory_space<vmem>>, vector<8x768xf32>
    tpu.vector_store %arg10[%c0_71, %c0_72], %119 {strides = array<i32>} : memref<128x768xf32, #tpu.memory_space<vmem>>, vector<8x768xf32>,
    %c0_73 = arith.constant 0 : index
    %c110_74 = arith.constant 110 : index
    %121 = vector.load %arg8[%c0_73, %c110_74] : memref<8x1024xf32, #tpu.memory_space<vmem>>, vector<8x768xf32>
    %c8_75 = arith.constant 8 : index
    %c0_76 = arith.constant 0 : index
    %122 = vector.load %arg10[%c8_75, %c0_76] : memref<128x768xf32, #tpu.memory_space<vmem>>, vector<8x768xf32>
    tpu.vector_store %arg10[%c8_75, %c0_76], %121 {strides = array<i32>} : memref<128x768xf32, #tpu.memory_space<vmem>>, vector<8x768xf32>,
    %c0_77 = arith.constant 0 : index
    %c111_78 = arith.constant 111 : index
    %123 = vector.load %arg8[%c0_77, %c111_78] : memref<8x1024xf32, #tpu.memory_space<vmem>>, vector<8x768xf32>
    %c16_79 = arith.constant 16 : index
    %c0_80 = arith.constant 0 : index
    %124 = vector.load %arg10[%c16_79, %c0_80] : memref<128x768xf32, #tpu.memory_space<vmem>>, vector<8x768xf32>
    tpu.vector_store %arg10[%c16_79, %c0_80], %123 {strides = array<i32>} : memref<128x768xf32, #tpu.memory_space<vmem>>, vector<8x768xf32>,
    %c0_81 = arith.constant 0 : index
    %c127_82 = arith.constant 127 : index
    %125 = vector.load %arg8[%c0_81, %c127_82] : memref<8x1024xf32, #tpu.memory_space<vmem>>, vector<8x768xf32>
    %c24_83 = arith.constant 24 : index
    %c0_84 = arith.constant 0 : index
    %126 = vector.load %arg10[%c24_83, %c0_84] : memref<128x768xf32, #tpu.memory_space<vmem>>, vector<8x768xf32>
    tpu.vector_store %arg10[%c24_83, %c0_84], %125 {strides = array<i32>} : memref<128x768xf32, #tpu.memory_space<vmem>>, vector<8x768xf32>,
    %c0_85 = arith.constant 0 : index
    %c128_86 = arith.constant 128 : index
    %127 = vector.load %arg8[%c0_85, %c128_86] : memref<8x1024xf32, #tpu.memory_space<vmem>>, vector<8x768xf32>
    %c32_87 = arith.constant 32 : index
    %c0_88 = arith.constant 0 : index
    %128 = vector.load %arg10[%c32_87, %c0_88] : memref<128x768xf32, #tpu.memory_space<vmem>>, vector<8x768xf32>
    tpu.vector_store %arg10[%c32_87, %c0_88], %127 {strides = array<i32>} : memref<128x768xf32, #tpu.memory_space<vmem>>, vector<8x768xf32>,
    %c0_89 = arith.constant 0 : index
    %c129_90 = arith.constant 129 : index
    %129 = vector.load %arg8[%c0_89, %c129_90] : memref<8x1024xf32, #tpu.memory_space<vmem>>, vector<8x768xf32>
    %c40_91 = arith.constant 40 : index
    %c0_92 = arith.constant 0 : index
    %130 = vector.load %arg10[%c40_91, %c0_92] : memref<128x768xf32, #tpu.memory_space<vmem>>, vector<8x768xf32>
    tpu.vector_store %arg10[%c40_91, %c0_92], %129 {strides = array<i32>} : memref<128x768xf32, #tpu.memory_space<vmem>>, vector<8x768xf32>,
    %c0_93 = arith.constant 0 : index
    %c145_94 = arith.constant 145 : index
    %131 = vector.load %arg8[%c0_93, %c145_94] : memref<8x1024xf32, #tpu.memory_space<vmem>>, vector<8x768xf32>
    %c48_95 = arith.constant 48 : index
    %c0_96 = arith.constant 0 : index
    %132 = vector.load %arg10[%c48_95, %c0_96] : memref<128x768xf32, #tpu.memory_space<vmem>>, vector<8x768xf32>
    tpu.vector_store %arg10[%c48_95, %c0_96], %131 {strides = array<i32>} : memref<128x768xf32, #tpu.memory_space<vmem>>, vector<8x768xf32>,
    %c0_97 = arith.constant 0 : index
    %c146_98 = arith.constant 146 : index
    %133 = vector.load %arg8[%c0_97, %c146_98] : memref<8x1024xf32, #tpu.memory_space<vmem>>, vector<8x768xf32>
    %c56_99 = arith.constant 56 : index
    %c0_100 = arith.constant 0 : index
    %134 = vector.load %arg10[%c56_99, %c0_100] : memref<128x768xf32, #tpu.memory_space<vmem>>, vector<8x768xf32>
    tpu.vector_store %arg10[%c56_99, %c0_100], %133 {strides = array<i32>} : memref<128x768xf32, #tpu.memory_space<vmem>>, vector<8x768xf32>,
    %c0_101 = arith.constant 0 : index
    %c147_102 = arith.constant 147 : index
    %135 = vector.load %arg8[%c0_101, %c147_102] : memref<8x1024xf32, #tpu.memory_space<vmem>>, vector<8x768xf32>
    %c64_103 = arith.constant 64 : index
    %c0_104 = arith.constant 0 : index
    %136 = vector.load %arg10[%c64_103, %c0_104] : memref<128x768xf32, #tpu.memory_space<vmem>>, vector<8x768xf32>
    tpu.vector_store %arg10[%c64_103, %c0_104], %135 {strides = array<i32>} : memref<128x768xf32, #tpu.memory_space<vmem>>, vector<8x768xf32>,
    %c0_105 = arith.constant 0 : index
    %c128_106 = arith.constant 128 : index
    %137 = vector.load %arg2[%c0_105, %c128_106] : memref<8x384xf32, #tpu.memory_space<vmem>>, vector<8x128xf32>
    %c0_107 = arith.constant 0 : index
    %c0_108 = arith.constant 0 : index
    %138 = vector.load %arg10[%c0_107, %c0_108] : memref<128x768xf32, #tpu.memory_space<vmem>>, vector<128x768xf32>
    %cst_109 = arith.constant dense<0.000000e+00> : vector<8x768xf32>
    %139 = tpu.matmul %137, %138, %cst_109 {dimension_numbers = #tpu.dot_dimension_numbers<[1], [0], [0], [1], [0, 0, 1, 1], [], []>, precision = #tpu.contract_precision<fp32>} : vector<8x128xf32>, vector<128x768xf32>, vector<8x768xf32> -> vector<8x768xf32>
    %140 = vector.broadcast %5 : vector<8x1xf32> to vector<8x768xf32>
    %141 = arith.addf %139, %140 : vector<8x768xf32>
    %cst_110 = arith.constant 0.000000e+00 : f32
    %142 = vector.broadcast %cst_110 : f32 to vector<8x768xf32>
    %143 = arith.maximumf %141, %142 : vector<8x768xf32>
    %144 = arith.mulf %143, %11 : vector<8x768xf32>
    %cst_111 = arith.constant dense<0.000000e+00> : vector<8xf32>
    %145 = vector.multi_reduction <add>, %144, %cst_111 [1] : vector<8x768xf32> to vector<8xf32>
    %146 = vector.shape_cast %145 : vector<8xf32> to vector<8x1xf32>
    %cst_112 = arith.constant 0.00222222228 : f32
    %147 = vector.broadcast %cst_112 : f32 to vector<8x1xf32>
    %148 = arith.mulf %146, %147 : vector<8x1xf32>
    %149 = vector.broadcast %148 : vector<8x1xf32> to vector<8x768xf32>
    %150 = arith.subf %143, %149 : vector<8x768xf32>
    %151 = arith.mulf %150, %11 : vector<8x768xf32>
    %152 = arith.mulf %151, %151 : vector<8x768xf32>
    %cst_113 = arith.constant dense<0.000000e+00> : vector<8xf32>
    %153 = vector.multi_reduction <add>, %152, %cst_113 [1] : vector<8x768xf32> to vector<8xf32>
    %154 = vector.shape_cast %153 : vector<8xf32> to vector<8x1xf32>
    %cst_114 = arith.constant 0.00222222228 : f32
    %155 = vector.broadcast %cst_114 : f32 to vector<8x1xf32>
    %156 = arith.mulf %154, %155 : vector<8x1xf32>
    %157 = vector.broadcast %148 : vector<8x1xf32> to vector<8x768xf32>
    %158 = arith.subf %143, %157 : vector<8x768xf32>
    %cst_115 = arith.constant 9.99999974E-6 : f32
    %159 = vector.broadcast %cst_115 : f32 to vector<8x1xf32>
    %160 = arith.addf %156, %159 : vector<8x1xf32>
    %161 = math.rsqrt %160 : vector<8x1xf32>
    %162 = vector.broadcast %161 : vector<8x1xf32> to vector<8x768xf32>
    %163 = arith.mulf %158, %162 : vector<8x768xf32>
    %164 = vector.broadcast %6 : vector<8x1xf32> to vector<8x768xf32>
    %165 = arith.mulf %163, %164 : vector<8x768xf32>
    %166 = vector.broadcast %7 : vector<8x1xf32> to vector<8x768xf32>
    %167 = arith.addf %165, %166 : vector<8x768xf32>
    %168 = arith.mulf %167, %11 : vector<8x768xf32>
    %cst_116 = arith.constant 0.000000e+00 : f32
    %169 = vector.broadcast %cst_116 : f32 to vector<8x128xf32>
    %c0_117 = arith.constant 0 : index
    %c0_118 = arith.constant 0 : index
    %170 = vector.load %arg9[%c0_117, %c0_118] : memref<8x1024xf32, #tpu.memory_space<vmem>>, vector<8x128xf32>
    tpu.vector_store %arg9[%c0_117, %c0_118], %169 {strides = array<i32>} : memref<8x1024xf32, #tpu.memory_space<vmem>>, vector<8x128xf32>,
    %cst_119 = arith.constant 0.000000e+00 : f32
    %171 = vector.broadcast %cst_119 : f32 to vector<8x128xf32>
    %c0_120 = arith.constant 0 : index
    %c896_121 = arith.constant 896 : index
    %172 = vector.load %arg9[%c0_120, %c896_121] : memref<8x1024xf32, #tpu.memory_space<vmem>>, vector<8x128xf32>
    tpu.vector_store %arg9[%c0_120, %c896_121], %171 {strides = array<i32>} : memref<8x1024xf32, #tpu.memory_space<vmem>>, vector<8x128xf32>,
    %c0_122 = arith.constant 0 : index
    %c128_123 = arith.constant 128 : index
    %173 = vector.load %arg9[%c0_122, %c128_123] : memref<8x1024xf32, #tpu.memory_space<vmem>>, vector<8x768xf32>
    tpu.vector_store %arg9[%c0_122, %c128_123], %168 {strides = array<i32>} : memref<8x1024xf32, #tpu.memory_space<vmem>>, vector<8x768xf32>,
    %c0_124 = arith.constant 0 : index
    %c109_125 = arith.constant 109 : index
    %174 = vector.load %arg9[%c0_124, %c109_125] : memref<8x1024xf32, #tpu.memory_space<vmem>>, vector<8x768xf32>
    %c0_126 = arith.constant 0 : index
    %c0_127 = arith.constant 0 : index
    %175 = vector.load %arg10[%c0_126, %c0_127] : memref<128x768xf32, #tpu.memory_space<vmem>>, vector<8x768xf32>
    tpu.vector_store %arg10[%c0_126, %c0_127], %174 {strides = array<i32>} : memref<128x768xf32, #tpu.memory_space<vmem>>, vector<8x768xf32>,
    %c0_128 = arith.constant 0 : index
    %c110_129 = arith.constant 110 : index
    %176 = vector.load %arg9[%c0_128, %c110_129] : memref<8x1024xf32, #tpu.memory_space<vmem>>, vector<8x768xf32>
    %c8_130 = arith.constant 8 : index
    %c0_131 = arith.constant 0 : index
    %177 = vector.load %arg10[%c8_130, %c0_131] : memref<128x768xf32, #tpu.memory_space<vmem>>, vector<8x768xf32>
    tpu.vector_store %arg10[%c8_130, %c0_131], %176 {strides = array<i32>} : memref<128x768xf32, #tpu.memory_space<vmem>>, vector<8x768xf32>,
    %c0_132 = arith.constant 0 : index
    %c111_133 = arith.constant 111 : index
    %178 = vector.load %arg9[%c0_132, %c111_133] : memref<8x1024xf32, #tpu.memory_space<vmem>>, vector<8x768xf32>
    %c16_134 = arith.constant 16 : index
    %c0_135 = arith.constant 0 : index
    %179 = vector.load %arg10[%c16_134, %c0_135] : memref<128x768xf32, #tpu.memory_space<vmem>>, vector<8x768xf32>
    tpu.vector_store %arg10[%c16_134, %c0_135], %178 {strides = array<i32>} : memref<128x768xf32, #tpu.memory_space<vmem>>, vector<8x768xf32>,
    %c0_136 = arith.constant 0 : index
    %c127_137 = arith.constant 127 : index
    %180 = vector.load %arg9[%c0_136, %c127_137] : memref<8x1024xf32, #tpu.memory_space<vmem>>, vector<8x768xf32>
    %c24_138 = arith.constant 24 : index
    %c0_139 = arith.constant 0 : index
    %181 = vector.load %arg10[%c24_138, %c0_139] : memref<128x768xf32, #tpu.memory_space<vmem>>, vector<8x768xf32>
    tpu.vector_store %arg10[%c24_138, %c0_139], %180 {strides = array<i32>} : memref<128x768xf32, #tpu.memory_space<vmem>>, vector<8x768xf32>,
    %c0_140 = arith.constant 0 : index
    %c128_141 = arith.constant 128 : index
    %182 = vector.load %arg9[%c0_140, %c128_141] : memref<8x1024xf32, #tpu.memory_space<vmem>>, vector<8x768xf32>
    %c32_142 = arith.constant 32 : index
    %c0_143 = arith.constant 0 : index
    %183 = vector.load %arg10[%c32_142, %c0_143] : memref<128x768xf32, #tpu.memory_space<vmem>>, vector<8x768xf32>
    tpu.vector_store %arg10[%c32_142, %c0_143], %182 {strides = array<i32>} : memref<128x768xf32, #tpu.memory_space<vmem>>, vector<8x768xf32>,
    %c0_144 = arith.constant 0 : index
    %c129_145 = arith.constant 129 : index
    %184 = vector.load %arg9[%c0_144, %c129_145] : memref<8x1024xf32, #tpu.memory_space<vmem>>, vector<8x768xf32>
    %c40_146 = arith.constant 40 : index
    %c0_147 = arith.constant 0 : index
    %185 = vector.load %arg10[%c40_146, %c0_147] : memref<128x768xf32, #tpu.memory_space<vmem>>, vector<8x768xf32>
    tpu.vector_store %arg10[%c40_146, %c0_147], %184 {strides = array<i32>} : memref<128x768xf32, #tpu.memory_space<vmem>>, vector<8x768xf32>,
    %c0_148 = arith.constant 0 : index
    %c145_149 = arith.constant 145 : index
    %186 = vector.load %arg9[%c0_148, %c145_149] : memref<8x1024xf32, #tpu.memory_space<vmem>>, vector<8x768xf32>
    %c48_150 = arith.constant 48 : index
    %c0_151 = arith.constant 0 : index
    %187 = vector.load %arg10[%c48_150, %c0_151] : memref<128x768xf32, #tpu.memory_space<vmem>>, vector<8x768xf32>
    tpu.vector_store %arg10[%c48_150, %c0_151], %186 {strides = array<i32>} : memref<128x768xf32, #tpu.memory_space<vmem>>, vector<8x768xf32>,
    %c0_152 = arith.constant 0 : index
    %c146_153 = arith.constant 146 : index
    %188 = vector.load %arg9[%c0_152, %c146_153] : memref<8x1024xf32, #tpu.memory_space<vmem>>, vector<8x768xf32>
    %c56_154 = arith.constant 56 : index
    %c0_155 = arith.constant 0 : index
    %189 = vector.load %arg10[%c56_154, %c0_155] : memref<128x768xf32, #tpu.memory_space<vmem>>, vector<8x768xf32>
    tpu.vector_store %arg10[%c56_154, %c0_155], %188 {strides = array<i32>} : memref<128x768xf32, #tpu.memory_space<vmem>>, vector<8x768xf32>,
    %c0_156 = arith.constant 0 : index
    %c147_157 = arith.constant 147 : index
    %190 = vector.load %arg9[%c0_156, %c147_157] : memref<8x1024xf32, #tpu.memory_space<vmem>>, vector<8x768xf32>
    %c64_158 = arith.constant 64 : index
    %c0_159 = arith.constant 0 : index
    %191 = vector.load %arg10[%c64_158, %c0_159] : memref<128x768xf32, #tpu.memory_space<vmem>>, vector<8x768xf32>
    tpu.vector_store %arg10[%c64_158, %c0_159], %190 {strides = array<i32>} : memref<128x768xf32, #tpu.memory_space<vmem>>, vector<8x768xf32>,
    %c0_160 = arith.constant 0 : index
    %c256 = arith.constant 256 : index
    %192 = vector.load %arg2[%c0_160, %c256] : memref<8x384xf32, #tpu.memory_space<vmem>>, vector<8x128xf32>
    %c0_161 = arith.constant 0 : index
    %c0_162 = arith.constant 0 : index
    %193 = vector.load %arg10[%c0_161, %c0_162] : memref<128x768xf32, #tpu.memory_space<vmem>>, vector<128x768xf32>
    %cst_163 = arith.constant dense<0.000000e+00> : vector<8x768xf32>
    %194 = tpu.matmul %192, %193, %cst_163 {dimension_numbers = #tpu.dot_dimension_numbers<[1], [0], [0], [1], [0, 0, 1, 1], [], []>, precision = #tpu.contract_precision<fp32>} : vector<8x128xf32>, vector<128x768xf32>, vector<8x768xf32> -> vector<8x768xf32>
    %195 = vector.broadcast %8 : vector<8x1xf32> to vector<8x768xf32>
    %196 = arith.addf %194, %195 : vector<8x768xf32>
    %c0_164 = arith.constant 0 : index
    %c0_165 = arith.constant 0 : index
    %197 = vector.load %arg7[%c0_164, %c0_165] : memref<8x768xf32, #tpu.memory_space<vmem>>, vector<8x768xf32>
    tpu.vector_store %arg7[%c0_164, %c0_165], %196 {strides = array<i32>} : memref<8x768xf32, #tpu.memory_space<vmem>>, vector<8x768xf32>,
    return
  }
  func.func @transform_0(%arg0: i32) -> (i32, i32) {
    %c0_i32 = arith.constant 0 : i32
    %c0_i32_0 = arith.constant 0 : i32
    %c0_i32_1 = arith.constant 0 : i32
    return %c0_i32, %c0_i32_0 : i32, i32
  }
  func.func @transform_1(%arg0: i32) -> (i32, i32) {
    %c0_i32 = arith.constant 0 : i32
    %c0_i32_0 = arith.constant 0 : i32
    %c0_i32_1 = arith.constant 0 : i32
    return %c0_i32, %c0_i32_0 : i32, i32
  }
  func.func @transform_2(%arg0: i32) -> (i32, i32) {
    %c0_i32 = arith.constant 0 : i32
    %c0_i32_0 = arith.constant 0 : i32
    %c0_i32_1 = arith.constant 0 : i32
    return %c0_i32, %c0_i32_0 : i32, i32
  }
  func.func @transform_3(%arg0: i32) -> (i32, i32) {
    %c0_i32 = arith.constant 0 : i32
    %c0_i32_0 = arith.constant 0 : i32
    %c0_i32_1 = arith.constant 0 : i32
    return %c0_i32, %c0_i32_0 : i32, i32
  }
  func.func @transform_4(%arg0: i32) -> (i32, i32) {
    %c0_i32 = arith.constant 0 : i32
    %c0_i32_0 = arith.constant 0 : i32
    %c0_i32_1 = arith.constant 0 : i32
    return %c0_i32, %c0_i32_0 : i32, i32
  }
  func.func @transform_5(%arg0: i32) -> (i32, i32) {
    %c0_i32 = arith.constant 0 : i32
    %c0_i32_0 = arith.constant 0 : i32
    %c0_i32_1 = arith.constant 0 : i32
    return %c0_i32, %c0_i32_0 : i32, i32
  }
  func.func @transform_6(%arg0: i32) -> (i32, i32) {
    %c0_i32 = arith.constant 0 : i32
    %c0_i32_0 = arith.constant 0 : i32
    %c0_i32_1 = arith.constant 0 : i32
    return %c0_i32, %c0_i32_0 : i32, i32
  }
}

</mosaic_0001>

<bundles_post_ra>
// kernel: block_forward.1
= control target key start
LH: loop header
LB: loop body
LE: loop exit
PB: predicated region body
PF: predicated region fallthrough
CT: control target
= control target key end

     0   :  { %s8536_s23 = smov 90   ;;  %s8537_s24 = smov 91   ;;  %vm642_vm0 = vcmask 752640   ;;  %vm736_vm1 = vcmask 736256   ;;  %vm689_vm2 = vcmask 744448   ;;  %vm595_vm3 = vcmask 760832   ;;  %s13333_s0 = inlined_call_operand.vmem [shape: f32[8,1024], index: 0, kind: input, shape index: {}]   ;;  %s13334_s1 = inlined_call_operand.vmem [shape: f32[8,384], index: 1, kind: input, shape index: {}]   ;;  %s13335_s2 = inlined_call_operand.vmem [shape: f32[8,8], index: 2, kind: input, shape index: {}]   ;;  %s13336_s4 = inlined_call_operand.vmem [shape: f32[32,8], index: 4, kind: input, shape index: {}]   ;;  %s13337_s3 = inlined_call_operand.vmem [shape: f32[8,32], index: 3, kind: input, shape index: {}]   ;;  %s13338_s5 = inlined_call_operand.vmem [shape: f32[1,768], index: 5, kind: input, shape index: {}]   ;;  %s13339_s6 = inlined_call_operand.vmem [shape: f32[8,768], index: 6, kind: output, shape index: {}]  }
   0x1   :  { %v8598_v0 = vld [vmem:[%s13333_s0 + $0x8] sm:$0xff]  ;;  %s8538_s25 = smov 92   ;;  %v709_v1 = vld [vmem:[%s13333_s0 + $0x10] sm:$0xff]  ;;  %s8539_s28 = smov 93   ;;  %v226_v2 = vld [vmem:[%s13333_s0] sm:$0xff]  ;;  %vm548_vm4 = vcmask 883712  }
   0x2   :  { %722 = vrot.lane.b32.xlu0 %v8598_v0, %s8536_s23  ;;  %675 = vrot.lane.b32.xlu1 %v8598_v0, %s8537_s24  ;;  %s8540_s29 = smov 108   ;;  %s8541_s30 = smov 109   ;;  %v8640_v3 = vld [vmem:[%s13333_s0 + $0x18] sm:$0xff]  ;;  %v8690_v10 = vld [vmem:[%s13333_s0 + $0x20] sm:$0xff]  ;;  %vm501_vm5 = vcmask 891904   ;;  %vm454_vm6 = vcmask 900096  }
   0x3   :  { %628 = vrot.lane.b32.xlu2 %v8598_v0, %s8538_s25  ;;  %s8542_s7 = smov 110   ;;  %s8543_s8 = smov 111   ;;  %v8727_v22 = vld [vmem:[%s13333_s0 + $0x28] sm:$0xff]  ;;  %vm407_vm7 = vcmask 908288   ;;  %vm360_vm8 = vcmask 1031168   ;;  %vm313_vm9 = vcmask 1039360  }
   0x4   :  { %s8544_s9 = smov 126   ;;  %s8545_s12 = smov 127   ;;  %vm254_vm10 = vcmask 7168   ;;  %vm207_vm11 = vcmask 130048   ;;  %vm160_vm12 = vcmask 138240   ;;  %vm113_vm13 = vcmask 146432  }
   0x5   :  { %s8546_s13 = smov 1   ;;  %s8547_s16 = smov 16   ;;  %vm66_vm14 = vcmask 154624   ;;  %vm2918_vm15 = vcmask 261120  }
   0x6   :  { %s8548_s17 = smov 17   ;;  %s8549_s18 = smov 18  }
   0x7   :  { %s8550_s19 = smov 19  }
   0xa   :  { %724 = vrot.lane.b32.xlu0 %v709_v1, %s8536_s23  ;;  %677 = vrot.lane.b32.xlu1 %v709_v1, %s8537_s24 }
   0xb   :  { %630 = vrot.lane.b32.xlu2 %v709_v1, %s8538_s25 }
  0x12   :  { %583 = vrot.lane.b32.xlu1 %v709_v1, %s8539_s28  ;;  %581 = vrot.lane.b32.xlu0 %v8598_v0, %s8539_s28 }
  0x13   :  { %534 = vrot.lane.b32.xlu2 %v8598_v0, %s8540_s29 }
  0x1a   :  { %536 = vrot.lane.b32.xlu0 %v709_v1, %s8540_s29  ;;  %487 = vrot.lane.b32.xlu1 %v8598_v0, %s8541_s30 }
  0x1b   :  { %489 = vrot.lane.b32.xlu2 %v709_v1, %s8541_s30 }
  0x22   :  { %442 = vrot.lane.b32.xlu1 %v709_v1, %s8542_s7  ;;  %440 = vrot.lane.b32.xlu0 %v8598_v0, %s8542_s7 }
  0x23   :  { %393 = vrot.lane.b32.xlu2 %v8598_v0, %s8543_s8 }
  0x2a   :  { %395 = vrot.lane.b32.xlu0 %v709_v1, %s8543_s8  ;;  %346 = vrot.lane.b32.xlu1 %v8598_v0, %s8544_s9 }
  0x2b   :  { %348 = vrot.lane.b32.xlu2 %v709_v1, %s8544_s9 }
  0x32   :  { %301 = vrot.lane.b32.xlu1 %v709_v1, %s8545_s12  ;;  %299 = vrot.lane.b32.xlu0 %v8598_v0, %s8545_s12 }
  0x33   :  { %240 = vrot.lane.b32.xlu2 %v226_v2, %s8546_s13 }
  0x3a   :  { %726 = vrot.lane.b32.xlu1 %v8640_v3, %s8536_s23  ;;  %242 = vrot.lane.b32.xlu0 %v8598_v0, %s8546_s13 }
  0x3b   :  { %193 = vrot.lane.b32.xlu2 %v226_v2, %s8547_s16 }
  0x42   :  { %679 = vrot.lane.b32.xlu1 %v8640_v3, %s8537_s24  ;;  %195 = vrot.lane.b32.xlu0 %v8598_v0, %s8547_s16 }
  0x43   :  { %146 = vrot.lane.b32.xlu2 %v226_v2, %s8548_s17 }
  0x4a   :  { %632 = vrot.lane.b32.xlu1 %v8640_v3, %s8538_s25  ;;  %148 = vrot.lane.b32.xlu0 %v8598_v0, %s8548_s17 }
  0x4b   :  { %99 = vrot.lane.b32.xlu2 %v226_v2, %s8549_s18 }
  0x52   :  { %585 = vrot.lane.b32.xlu1 %v8640_v3, %s8539_s28  ;;  %101 = vrot.lane.b32.xlu0 %v8598_v0, %s8549_s18 }
  0x53   :  { %52 = vrot.lane.b32.xlu2 %v226_v2, %s8550_s19 }
  0x5a   :  { %538 = vrot.lane.b32.xlu1 %v8640_v3, %s8540_s29  ;;  %54 = vrot.lane.b32.xlu0 %v8598_v0, %s8550_s19 }
  0x5b   :  { %491 = vrot.lane.b32.xlu2 %v8640_v3, %s8541_s30 }
  0x5d   :  { %v629_v4 = vpop.permute.xlu2 %628 }
  0x62   :  { %397 = vrot.lane.b32.xlu1 %v8640_v3, %s8543_s8  ;;  %444 = vrot.lane.b32.xlu0 %v8640_v3, %s8542_s7 }
  0x63   :  { %350 = vrot.lane.b32.xlu2 %v8640_v3, %s8544_s9 }
  0x65   :  { %v8674_v5 = vpop.permute.xlu2 %630 }
  0x66   :  { %v643_v11 = vsel %vm642_vm0, %v629_v4, %v8674_v5 }
  0x67   :  { %v8698_v12 = vand.u32 4294901760, %v643_v11 }
  0x69   :  { %v8717_v20 = vsub.f32 %v643_v11, %v8698_v12 }
  0x6a   :  { %244 = vrot.lane.b32.xlu1 %v709_v1, %s8546_s13  ;;  %303 = vrot.lane.b32.xlu0 %v8640_v3, %s8545_s12 }
  0x6b   :  { %197 = vrot.lane.b32.xlu2 %v709_v1, %s8547_s16  ;;  %v13351_v26 = vand.u32 4294901760, %v8717_v20 }
  0x6d   :  { %v8680_v6 = vpop.permute.xlu2 %534  ;;  %v913_v35 = vsub.f32 %v8717_v20, %v13351_v26 }
  0x6f   :  { %v914_v39 = vand.u32 4294901760, %v913_v35 }
  0x72   :  { %103 = vrot.lane.b32.xlu1 %v709_v1, %s8549_s18  ;;  %150 = vrot.lane.b32.xlu0 %v709_v1, %s8548_s17 }
  0x73   :  { %56 = vrot.lane.b32.xlu2 %v709_v1, %s8550_s19 }
  0x74   :  { %v723_v7 = vpop.permute.xlu0 %722  ;;  %v676_v8 = vpop.permute.xlu1 %675 }
  0x75   :  { %v8685_v9 = vpop.permute.xlu2 %489 }
  0x7a   :  { %681 = vrot.lane.b32.xlu1 %v8690_v10, %s8537_s24  ;;  %728 = vrot.lane.b32.xlu0 %v8690_v10, %s8536_s23 }
  0x7b   :  { %634 = vrot.lane.b32.xlu2 %v8690_v10, %s8538_s25 }
  0x7c   :  { %v8702_v13 = vpop.permute.xlu0 %724  ;;  %v8704_v14 = vpop.permute.xlu1 %677 }
  0x7d   :  { %v737_v15 = vsel %vm736_vm1, %v723_v7, %v8702_v13  ;;  %v690_v16 = vsel %vm689_vm2, %v676_v8, %v8704_v14  ;;  %v8710_v17 = vpop.permute.xlu2 %393 }
  0x7e   :  { %v8712_v18 = vand.u32 4294901760, %v737_v15  ;;  %v8714_v19 = vand.u32 4294901760, %v690_v16 }
  0x80   :  { %858 = vmatpush.msra.mxu0 %v8712_v18  ;;  %1054 = vmatpush.msra.mxu3 %v8712_v18  ;;  %v8722_v21 = vsub.f32 %v737_v15, %v8712_v18  ;;  %v8730_v23 = vsub.f32 %v690_v16, %v8714_v19  ;;  %v8856_v16 = vand.u32 4294901760, %v8598_v0 }
  0x82   :  { %860 = vmatpush.msra.mxu0 %v8714_v19  ;;  %1001 = vmatpush.msra.mxu2 %v8722_v21  ;;  %v13353_v24 = vand.u32 4294901760, %v8722_v21  ;;  %v13352_v25 = vand.u32 4294901760, %v8730_v23 }
  0x83   :  { %1056 = vmatpush.msra.mxu3 %v8714_v19  ;;  %730 = vrot.lane.b32.xlu1 %v8727_v22, %s8536_s23 }
  0x84   :  { %587 = vrot.lane.b32.xlu0 %v8690_v10, %s8539_s28  ;;  %540 = vrot.lane.b32.xlu2 %v8690_v10, %s8540_s29  ;;  %v8744_v27 = vpop.permute.xlu1 %583  ;;  %v582_v28 = vpop.permute.xlu0 %581  ;;  %v901_v29 = vsub.f32 %v8722_v21, %v13353_v24  ;;  %v907_v30 = vsub.f32 %v8730_v23, %v13352_v25 }
  0x85   :  { %862 = vmatpush.msra.mxu0 %v8698_v12  ;;  %1004 = vmatpush.msra.mxu2 %v8730_v23  ;;  %v596_v31 = vsel %vm595_vm3, %v582_v28, %v8744_v27  ;;  %v8756_v32 = vpop.permute.xlu2 %348 }
  0x86   :  { %1058 = vmatpush.msra.mxu3 %v8698_v12  ;;  %v8759_v33 = vand.u32 4294901760, %v596_v31  ;;  %v902_v34 = vand.u32 4294901760, %v901_v29  ;;  %v908_v37 = vand.u32 4294901760, %v907_v30 }
  0x87   :  { %1007 = vmatpush.msra.mxu2 %v8717_v20 }
  0x88   :  { %v8766_v36 = vsub.f32 %v596_v31, %v8759_v33  ;;  %864 = vmatpush.msra.mxu0 %v8759_v33  ;;  %903 = vmatpush.msra.mxu1 %v902_v34  ;;  %v8872_v31 = vsub.f32 %v8598_v0, %v8856_v16 }
  0x89   :  { %1060 = vmatpush.msra.mxu3 %v8759_v33 }
  0x8a   :  { %909 = vmatpush.msra.mxu1 %v908_v37  ;;  %1010 = vmatpush.msra.mxu2 %v8766_v36  ;;  %v13349_v38 = vand.u32 4294901760, %v8766_v36 }
  0x8b   :  { %493 = vrot.lane.b32.xlu1 %v8690_v10, %s8541_s30 }
  0x8c   :  { %683 = vrot.lane.b32.xlu0 %v8727_v22, %s8537_s24  ;;  %636 = vrot.lane.b32.xlu2 %v8727_v22, %s8538_s25  ;;  %v8778_v40 = vpop.permute.xlu0 %536  ;;  %v488_v41 = vpop.permute.xlu1 %487  ;;  %v919_v42 = vsub.f32 %v8766_v36, %v13349_v38 }
  0x8d   :  { %915 = vmatpush.msra.mxu1 %v914_v39  ;;  %v549_v43 = vsel %vm548_vm4, %v8680_v6, %v8778_v40  ;;  %v502_v44 = vsel %vm501_vm5, %v488_v41, %v8685_v9  ;;  %v8792_v48 = vpop.permute.xlu2 %240 }
  0x8e   :  { %v8788_v45 = vand.u32 4294901760, %v549_v43  ;;  %v8790_v46 = vand.u32 4294901760, %v502_v44  ;;  %v920_v47 = vand.u32 4294901760, %v919_v42 }
  0x90   :  { %v8795_v49 = vsub.f32 %v502_v44, %v8790_v46  ;;  %866 = vmatpush.msra.mxu0 %v8788_v45  ;;  %921 = vmatpush.msra.mxu1 %v920_v47  ;;  %v8799_v50 = vsub.f32 %v549_v43, %v8788_v45  ;;  %v13341_v44 = vand.u32 4294901760, %v8872_v31 }
  0x91   :  { %1062 = vmatpush.msra.mxu3 %v8788_v45 }
  0x92   :  { %868 = vmatpush.msra.mxu0 %v8790_v46  ;;  %1013 = vmatpush.msra.mxu2 %v8799_v50  ;;  %v13348_v51 = vand.u32 4294901760, %v8799_v50  ;;  %v13347_v52 = vand.u32 4294901760, %v8795_v49 }
  0x93   :  { %1064 = vmatpush.msra.mxu3 %v8790_v46  ;;  %589 = vrot.lane.b32.xlu1 %v8727_v22, %s8539_s28 }
  0x94   :  { %446 = vrot.lane.b32.xlu0 %v8690_v10, %s8542_s7  ;;  %399 = vrot.lane.b32.xlu2 %v8690_v10, %s8543_s8  ;;  %v8813_v53 = vpop.permute.xlu1 %442  ;;  %v441_v54 = vpop.permute.xlu0 %440  ;;  %v925_v55 = vsub.f32 %v8799_v50, %v13348_v51  ;;  %v931_v56 = vsub.f32 %v8795_v49, %v13347_v52 }
  0x95   :  { %1016 = vmatpush.msra.mxu2 %v8795_v49  ;;  %v455_v57 = vsel %vm454_vm6, %v441_v54, %v8813_v53  ;;  %v8830_v62 = vpop.permute.xlu2 %193 }
  0x96   :  { %v8824_v58 = vand.u32 4294901760, %v455_v57  ;;  %v926_v59 = vand.u32 4294901760, %v925_v55  ;;  %v932_v61 = vand.u32 4294901760, %v931_v56  ;;  %v961_v56 = vsub.f32 %v8872_v31, %v13341_v44 }
  0x98   :  { %v8827_v60 = vsub.f32 %v455_v57, %v8824_v58  ;;  %870 = vmatpush.msra.mxu0 %v8824_v58  ;;  %927 = vmatpush.msra.mxu1 %v926_v59 }
  0x99   :  { %1066 = vmatpush.msra.mxu3 %v8824_v58 }
  0x9a   :  { %933 = vmatpush.msra.mxu1 %v932_v61  ;;  %1019 = vmatpush.msra.mxu2 %v8827_v60  ;;  %v13346_v63 = vand.u32 4294901760, %v8827_v60 }
  0x9b   :  { %352 = vrot.lane.b32.xlu1 %v8690_v10, %s8544_s9 }
  0x9c   :  { %542 = vrot.lane.b32.xlu0 %v8727_v22, %s8540_s29  ;;  %495 = vrot.lane.b32.xlu2 %v8727_v22, %s8541_s30  ;;  %v8841_v1 = vpop.permute.xlu0 %395  ;;  %v347_v2 = vpop.permute.xlu1 %346  ;;  %v937_v4 = vsub.f32 %v8827_v60, %v13346_v63 }
  0x9d   :  { %v408_v6 = vsel %vm407_vm7, %v8710_v17, %v8841_v1  ;;  %v361_v7 = vsel %vm360_vm8, %v347_v2, %v8756_v32  ;;  %v8874_v34 = vpop.permute.xlu2 %146 }
  0x9e   :  { %v8851_v8 = vand.u32 4294901760, %v408_v6  ;;  %v8853_v11 = vand.u32 4294901760, %v361_v7  ;;  %v938_v15 = vand.u32 4294901760, %v937_v4 }
  0xa0   :  { %v8859_v28 = vsub.f32 %v361_v7, %v8853_v11  ;;  %872 = vmatpush.msra.mxu0 %v8851_v8  ;;  %939 = vmatpush.msra.mxu1 %v938_v15  ;;  %v8863_v29 = vsub.f32 %v408_v6, %v8851_v8  ;;  %v962_v15 = vand.u32 4294901760, %v961_v56 }
  0xa1   :  { %1068 = vmatpush.msra.mxu3 %v8851_v8 }
  0xa2   :  { %874 = vmatpush.msra.mxu0 %v8853_v11  ;;  %1022 = vmatpush.msra.mxu2 %v8863_v29  ;;  %v13345_v17 = vand.u32 4294901760, %v8863_v29  ;;  %v13344_v30 = vand.u32 4294901760, %v8859_v28 }
  0xa3   :  { %1070 = vmatpush.msra.mxu3 %v8853_v11  ;;  %448 = vrot.lane.b32.xlu1 %v8727_v22, %s8542_s7 }
  0xa4   :  { %305 = vrot.lane.b32.xlu0 %v8690_v10, %s8545_s12  ;;  %401 = vrot.lane.b32.xlu2 %v8727_v22, %s8543_s8  ;;  %v8883_v35 = vpop.permute.xlu1 %301  ;;  %v300_v37 = vpop.permute.xlu0 %299  ;;  %v943_v0 = vsub.f32 %v8863_v29, %v13345_v17  ;;  %v949_v39 = vsub.f32 %v8859_v28, %v13344_v30 }
  0xa5   :  { %1025 = vmatpush.msra.mxu2 %v8859_v28  ;;  %v314_v41 = vsel %vm313_vm9, %v300_v37, %v8883_v35  ;;  %v8921_v2 = vpop.permute.xlu2 %99 }
  0xa6   :  { %v8894_v42 = vand.u32 4294901760, %v314_v41  ;;  %v944_v43 = vand.u32 4294901760, %v943_v0  ;;  %v950_v54 = vand.u32 4294901760, %v949_v39 }
  0xa8   :  { %v8898_v47 = vsub.f32 %v314_v41, %v8894_v42  ;;  %876 = vmatpush.msra.mxu0 %v8894_v42  ;;  %945 = vmatpush.msra.mxu1 %v944_v43 }
  0xa9   :  { %1072 = vmatpush.msra.mxu3 %v8894_v42 }
  0xaa   :  { %951 = vmatpush.msra.mxu1 %v950_v54  ;;  %1028 = vmatpush.msra.mxu2 %v8898_v47  ;;  %v13342_v55 = vand.u32 4294901760, %v8898_v47 }
  0xab   :  { %354 = vrot.lane.b32.xlu1 %v8727_v22, %s8544_s9  ;;  %878 = vmatpush.msra.mxu0 %v8856_v16 }
  0xac   :  { %246 = vrot.lane.b32.xlu0 %v8640_v3, %s8546_s13  ;;  %199 = vrot.lane.b32.xlu2 %v8640_v3, %s8547_s16  ;;  %v8914_v57 = vpop.permute.xlu1 %726  ;;  %v8916_v59 = vpop.permute.xlu0 %242  ;;  %v955_v61 = vsub.f32 %v8898_v47, %v13342_v55 }
  0xad   :  { %13445 = vst [vmem:[#allocation5_spill] sm:$0xff] %v8914_v57  ;;  %v255_v4 = vsel %vm254_vm10, %v8792_v48, %v8916_v59  ;;  %1074 = vmatpush.msra.mxu3 %v8856_v16  ;;  %1031 = vmatpush.msra.mxu2 %v8872_v31 }
  0xae   :  { %v8928_v6 = vand.u32 4294901760, %v255_v4  ;;  %v956_v7 = vand.u32 4294901760, %v955_v61  ;;  %v8955_v61 = vpop.permute.xlu2 %52 }
  0xb0   :  { %880 = vmatpush.msra.mxu0 %v8928_v6  ;;  %957 = vmatpush.msra.mxu1 %v956_v7  ;;  %v8932_v37 = vsub.f32 %v255_v4, %v8928_v6 }
  0xb1   :  { %1076 = vmatpush.msra.mxu3 %v8928_v6 }
  0xb2   :  { %1034 = vmatpush.msra.mxu2 %v8932_v37  ;;  %963 = vmatpush.msra.mxu1 %v962_v15  ;;  %v13340_v48 = vand.u32 4294901760, %v8932_v37 }
  0xb3   :  { %152 = vrot.lane.b32.xlu1 %v8640_v3, %s8548_s17 }
  0xb4   :  { %307 = vrot.lane.b32.xlu0 %v8727_v22, %s8545_s12  ;;  %105 = vrot.lane.b32.xlu2 %v8640_v3, %s8549_s18  ;;  %v8943_v0 = vpop.permute.xlu1 %679  ;;  %v8945_v39 = vpop.permute.xlu0 %195  ;;  %v967_v41 = vsub.f32 %v8932_v37, %v13340_v48 }
  0xb5   :  { %13446 = vst [vmem:[#allocation6_spill] sm:$0xff] %v8943_v0  ;;  %v208_v43 = vsel %vm207_vm11, %v8830_v62, %v8945_v39  ;;  %v691_v55 = vsel %vm689_vm2, %v8704_v14, %v8943_v0 }
  0xb6   :  { %v8953_v54 = vand.u32 4294901760, %v208_v43  ;;  %v968_v56 = vand.u32 4294901760, %v967_v41  ;;  %v9002_v14 = vand.u32 4294901760, %v691_v55 }
  0xb8   :  { %13447 = vst [vmem:[#allocation7_spill] sm:$0xff] %v8953_v54  ;;  %882 = vmatpush.msra.mxu0 %v8953_v54  ;;  %969 = vmatpush.msra.mxu1 %v968_v56  ;;  %v8959_v4 = vsub.f32 %v208_v43, %v8953_v54  ;;  %v738_v43 = vsel %vm736_vm1, %v8702_v13, %v8914_v57  ;;  %v8994_v13 = vpop.permute.xlu2 %491 }
  0xb9   :  { %1078 = vmatpush.msra.mxu3 %v8953_v54  ;;  %v8985_v44 = vand.u32 4294901760, %v738_v43  ;;  %13450 = vst [vmem:[#allocation10_spill] sm:$0xff] %v8994_v13  ;;  %v9031_v51 = vsub.f32 %v691_v55, %v9002_v14  ;;  %v503_v55 = vsel %vm501_vm5, %v8685_v9, %v8994_v13 }
  0xba   :  { %1037 = vmatpush.msra.mxu2 %v8959_v4  ;;  %v13343_v7 = vand.u32 4294901760, %v8959_v4  ;;  %v9076_v13 = vand.u32 4294901760, %v503_v55 }
  0xbb   :  { %58 = vrot.lane.b32.xlu1 %v8640_v3, %s8550_s19 }
  0xbc   :  { %248 = vrot.lane.b32.xlu0 %v8690_v10, %s8546_s13  ;;  %201 = vrot.lane.b32.xlu2 %v8690_v10, %s8547_s16  ;;  %v8970_v62 = vpop.permute.xlu1 %632  ;;  %v8972_v15 = vpop.permute.xlu0 %148  ;;  %v973_v41 = vsub.f32 %v8959_v4, %v13343_v7 }
  0xbd   :  { %13448 = vst [vmem:[#allocation8_spill] sm:$0xff] %v8970_v62  ;;  %v161_v3 = vsel %vm160_vm12, %v8874_v34, %v8972_v15  ;;  %v644_v34 = vsel %vm642_vm0, %v8674_v5, %v8970_v62 }
  0xbe   :  { %v8983_v56 = vand.u32 4294901760, %v161_v3  ;;  %v974_v48 = vand.u32 4294901760, %v973_v41  ;;  %v9020_v17 = vand.u32 4294901760, %v644_v34 }
  0xc0   :  { %13449 = vst [vmem:[#allocation9_spill] sm:$0xff] %v8983_v56  ;;  %884 = vmatpush.msra.mxu0 %v8983_v56  ;;  %975 = vmatpush.msra.mxu1 %v974_v48  ;;  %v8992_v7 = vsub.f32 %v161_v3, %v8983_v56  ;;  %v9007_v48 = vsub.f32 %v738_v43, %v8985_v44 }
  0xc1   :  { %1080 = vmatpush.msra.mxu3 %v8983_v56 }
  0xc2   :  { %1040 = vmatpush.msra.mxu2 %v8992_v7  ;;  %v13350_v41 = vand.u32 4294901760, %v8992_v7 }
  0xc3   :  { %107 = vrot.lane.b32.xlu1 %v8690_v10, %s8549_s18 }
  0xc4   :  { %154 = vrot.lane.b32.xlu0 %v8690_v10, %s8548_s17  ;;  %60 = vrot.lane.b32.xlu2 %v8690_v10, %s8550_s19  ;;  %v9013_v5 = vpop.permute.xlu1 %585  ;;  %v9015_v3 = vpop.permute.xlu0 %101  ;;  %v979_v30 = vsub.f32 %v8992_v7, %v13350_v41 }
  0xc5   :  { %13451 = vst [vmem:[#allocation11_spill] sm:$0xff] %v9013_v5  ;;  %v597_v43 = vsel %vm595_vm3, %v8744_v27, %v9013_v5  ;;  %v114_v63 = vsel %vm113_vm13, %v8921_v2, %v9015_v3  ;;  %v9042_v27 = vld [vmem:[%s13333_s0 + $0x30] sm:$0xff]  ;;  %v13360_v2 = vand.u32 4294901760, %v9007_v48 }
  0xc6   :  { %v9028_v52 = vand.u32 4294901760, %v114_v63  ;;  %v980_v10 = vand.u32 4294901760, %v979_v30  ;;  %v9033_v38 = vand.u32 4294901760, %v597_v43  ;;  %v9046_v30 = vsub.f32 %v644_v34, %v9020_v17 }
  0xc7   :  { %v1242_v24 = vsub.f32 %v9007_v48, %v13360_v2 }
  0xc8   :  { %13452 = vst [vmem:[#allocation12_spill] sm:$0xff] %v9028_v52  ;;  %886 = vmatpush.msra.mxu0 %v9028_v52  ;;  %981 = vmatpush.msra.mxu1 %v980_v10  ;;  %v9037_v41 = vsub.f32 %v114_v63, %v9028_v52  ;;  %v9054_v10 = vpop.permute.xlu2 %350  ;;  %v9057_v26 = vsub.f32 %v597_v43, %v9033_v38 }
  0xc9   :  { %1082 = vmatpush.msra.mxu3 %v9028_v52  ;;  %13453 = vst [vmem:[#allocation13_spill] sm:$0xff] %v9054_v10  ;;  %v13457_v52 = vand.u32 4294901760, %v9031_v51 }
  0xca   :  { %1043 = vmatpush.msra.mxu2 %v9037_v41  ;;  %v13357_v63 = vand.u32 4294901760, %v9037_v41  ;;  %13454 = vst [vmem:[#allocation14_spill] sm:$0xff] %v9057_v26 }
  0xcb   :  { %685 = vrot.lane.b32.xlu1 %v9042_v27, %s8537_s24  ;;  %v1248_v56 = vsub.f32 %v9031_v51, %v13457_v52  ;;  %v13460_v52 = vand.u32 4294901760, %v8722_v21  ;;  %v13462_v21 = vand.u32 4294901760, %v8730_v23 }
  0xcc   :  { %732 = vrot.lane.b32.xlu0 %v9042_v27, %s8536_s23  ;;  %638 = vrot.lane.b32.xlu2 %v9042_v27, %s8538_s25  ;;  %v9066_v9 = vpop.permute.xlu1 %538  ;;  %v9068_v25 = vpop.permute.xlu0 %54  ;;  %v985_v43 = vsub.f32 %v9037_v41, %v13357_v63  ;;  %v755_v63 = vld [vmem:[%s13334_s1] sm:$0xff] }
  0xcd   :  { %13455 = vst [vmem:[#allocation15_spill] sm:$0xff] %v9066_v9  ;;  %v550_v34 = vsel %vm548_vm4, %v8778_v40, %v9066_v9  ;;  %v67_v5 = vsel %vm66_vm14, %v8955_v61, %v9068_v25  ;;  %v1243_v61 = vand.u32 4294901760, %v1242_v24  ;;  %v9103_v54 = vand.u32 4294901760, %v755_v63 }
  0xce   :  { %v9088_v0 = vand.u32 4294901760, %v550_v34  ;;  %v9090_v57 = vand.u32 4294901760, %v67_v5  ;;  %v986_v2 = vand.u32 4294901760, %v985_v43  ;;  %v9106_v43 = vsub.f32 %v503_v55, %v9076_v13 }
  0xcf   :  { %13459 = vst [vmem:[#allocation18_spill] sm:$0xff] %v9103_v54  ;;  %v1249_v55 = vand.u32 4294901760, %v1248_v56 }
  0xd0   :  { %13456 = vst [vmem:[#allocation16_spill] sm:$0xff] %v9090_v57  ;;  %v9097_v9 = vsub.f32 %v550_v34, %v9088_v0  ;;  %888 = vmatpush.msra.mxu0 %v9090_v57  ;;  %987 = vmatpush.msra.mxu1 %v986_v2  ;;  %v9101_v62 = vsub.f32 %v67_v5, %v9090_v57  ;;  %v13461_v34 = vand.u32 4294901760, %v9046_v30 }
  0xd1   :  { %1084 = vmatpush.msra.mxu3 %v9090_v57  ;;  %v362_v2 = vsel %vm360_vm8, %v8756_v32, %v9054_v10 }
  0xd2   :  { %13458 = vst [vmem:[#allocation17_spill] sm:$0xff] %v9097_v9  ;;  %1095 = vmatpush.msrb.mxu0 %v13460_v52  ;;  %v1254_v40 = vsub.f32 %v9046_v30, %v13461_v34  ;;  %1046 = vmatpush.msra.mxu2 %v9101_v62  ;;  %v13367_v24 = vand.u32 4294901760, %v9101_v62  ;;  %v13368_v5 = vand.u32 4294901760, %v9097_v9  ;;  %v13463_v52 = vand.u32 4294901760, %v9057_v26 }
  0xd3   :  { %1244 = vmatpush.msrb.mxu3 %v1243_v61  ;;  %544 = vrot.lane.b32.xlu1 %v9042_v27, %s8540_s29 }
  0xd4   :  { %1099 = vmatpush.msrb.mxu0 %v13462_v21  ;;  %v1260_v61 = vsub.f32 %v9057_v26, %v13463_v52  ;;  %591 = vrot.lane.b32.xlu0 %v9042_v27, %s8539_s28  ;;  %v9131_v34 = vpop.permute.xlu1 %397  ;;  %v9133_v32 = vpop.permute.xlu0 %444  ;;  %v991_v23 = vsub.f32 %v9101_v62, %v13367_v24  ;;  %v1266_v56 = vsub.f32 %v9097_v9, %v13368_v5  ;;  %v1255_v57 = vand.u32 4294901760, %v1254_v40  ;;  %v274_v5 = vld [vmem:[%s13333_s0 + $0x10] sm:$0xff] }
  0xd5   :  { %497 = vrot.lane.b32.xlu2 %v9042_v27, %s8541_s30  ;;  %13464 = vst [vmem:[#allocation19_spill] sm:$0xff] %v9131_v34  ;;  %v9142_v21 = vsub.f32 %v755_v63, %v9103_v54  ;;  %1199 = vmatpush.msrb.mxu2 %v8985_v44  ;;  %v409_v52 = vsel %vm407_vm7, %v8841_v1, %v9131_v34  ;;  %v9155_v63 = vand.u32 4294901760, %v362_v2  ;;  %v9157_v9 = vpop.permute.xlu2 %197  ;;  %v13467_v1 = vand.u32 4294901760, %v8717_v20 }
  0xd6   :  { %13465 = vst [vmem:[#allocation20_spill] sm:$0xff] %v9133_v32  ;;  %1250 = vmatpush.msrb.mxu3 %v1249_v55  ;;  %v456_v10 = vsel %vm454_vm6, %v8813_v53, %v9133_v32  ;;  %v9159_v55 = vand.u32 4294901760, %v409_v52  ;;  %v992_v34 = vand.u32 4294901760, %v991_v23  ;;  %v1261_v53 = vand.u32 4294901760, %v1260_v61 }
  0xd7   :  { %13466 = vst [vmem:[#allocation21_spill] sm:$0xff] %v9142_v21  ;;  %v9161_v54 = vand.u32 4294901760, %v456_v10  ;;  %1103 = vmatpush.msrb.mxu0 %v13467_v1  ;;  %1049 = vmatmul.f32.vlgmr.msra.gmra.mxu2 %v9142_v21  ;;  %v1267_v40 = vand.u32 4294901760, %v1266_v56  ;;  %v13468_v26 = vand.u32 4294901760, %v8766_v36  ;;  %v9175_v20 = vand.u32 4294901760, %v274_v5 }
  0xd8   :  { %1201 = vmatpush.msrb.mxu2 %v9002_v14  ;;  %1256 = vmatpush.msrb.mxu3 %v1255_v57  ;;  %v9168_v24 = vsub.f32 %v409_v52, %v9159_v55  ;;  %v13469_v23 = vand.u32 4294901760, %v9106_v43  ;;  %v9182_v61 = vsub.f32 %v362_v2, %v9155_v63  ;;  %v13470_v56 = vand.u32 4294901760, %v8799_v50 }
  0xd9   :  { %v9171_v32 = vsub.f32 %v456_v10, %v9161_v54  ;;  %1107 = vmatpush.msrb.mxu0 %v13468_v26  ;;  %993 = vmatpush.msra.mxu1 %v992_v34  ;;  %v209_v10 = vsel %vm207_vm11, %v8945_v39, %v9157_v9  ;;  %v9205_v34 = vsub.f32 %v274_v5, %v9175_v20  ;;  %v13471_v39 = vand.u32 4294901760, %v8795_v49 }
  0xda   :  { %1203 = vmatpush.msrb.mxu2 %v9020_v17  ;;  %1262 = vmatpush.msrb.mxu3 %v1261_v53  ;;  %v1272_v57 = vsub.f32 %v9106_v43, %v13469_v23  ;;  %v13380_v36 = vand.u32 4294901760, %v9168_v24  ;;  %v13379_v23 = vand.u32 4294901760, %v9182_v61 }
  0xdb   :  { %1111 = vmatpush.msrb.mxu0 %v13470_v56  ;;  %1162 = vmatpush.msrb.mxu1 %v8712_v18  ;;  %v1277_v26 = vand.u32 4294901760, %v9171_v32 }
  0xdc   :  { %1205 = vmatpush.msrb.mxu2 %v9033_v38  ;;  %1268 = vmatpush.msrb.mxu3 %v1267_v40  ;;  %v9197_v50 = vpop.permute.xlu1 %244  ;;  %v9199_v18 = vpop.permute.xlu0 %303  ;;  %v1273_v52 = vand.u32 4294901760, %v1272_v57  ;;  %v1284_v5 = vsub.f32 %v9168_v24, %v13380_v36 }
  0xdd   :  { %403 = vrot.lane.b32.xlu1 %v9042_v27, %s8543_s8  ;;  %450 = vrot.lane.b32.xlu0 %v9042_v27, %s8542_s7  ;;  %v1278_v2 = vsub.f32 %v9171_v32, %v1277_v26  ;;  %v256_v1 = vsel %vm254_vm10, %v8916_v59, %v9197_v50  ;;  %v315_v53 = vsel %vm313_vm9, %v8883_v35, %v9199_v18  ;;  %v13472_v59 = vand.u32 4294901760, %v8827_v60  ;;  %v9231_v56 = vpop.permute.xlu2 %56 }
  0xde   :  { %356 = vrot.lane.b32.xlu2 %v9042_v27, %s8544_s9  ;;  %1115 = vmatpush.msrb.mxu0 %v13471_v39  ;;  %v9222_v40 = vand.u32 4294901760, %v315_v53  ;;  %v9225_v57 = vand.u32 4294901760, %v256_v1  ;;  %v9229_v35 = vand.u32 4294901760, %v209_v10  ;;  %v1290_v60 = vsub.f32 %v9182_v61, %v13379_v23 }
  0xdf   :  { %1164 = vmatpush.msrb.mxu1 %v8714_v19  ;;  %1207 = vmatpush.msrb.mxu2 %v9088_v0  ;;  %v1279_v49 = vand.u32 4294901760, %v1278_v2  ;;  %v13377_v19 = vand.u32 4294901760, %v9205_v34  ;;  %v13473_v2 = vand.u32 4294901760, %v8863_v29  ;;  %v9255_v29 = vld [vmem:[%s13333_s0 + $0x38] sm:$0xff] }
  0xe0   :  { %1274 = vmatpush.msrb.mxu3 %v1273_v52  ;;  %1119 = vmatpush.msrb.mxu0 %v13472_v59  ;;  %v9234_v39 = vsub.f32 %v315_v53, %v9222_v40  ;;  %v1285_v52 = vand.u32 4294901760, %v1284_v5  ;;  %v13474_v59 = vand.u32 4294901760, %v8859_v28 }
  0xe1   :  { %1166 = vmatpush.msrb.mxu1 %v8698_v12  ;;  %1209 = vmatpush.msrb.mxu2 %v9076_v13  ;;  %v9248_v12 = vsub.f32 %v256_v1, %v9225_v57 }
  0xe2   :  { %1123 = vmatpush.msrb.mxu0 %v13473_v2  ;;  %1280 = vmatpush.msrb.mxu3 %v1279_v49  ;;  %v13378_v53 = vand.u32 4294901760, %v9234_v39  ;;  %v1302_v49 = vsub.f32 %v9205_v34, %v13377_v19  ;;  %v1291_v19 = vand.u32 4294901760, %v1290_v60  ;;  %v9307_v60 = vand.u32 4294901760, %v9142_v21 }
  0xe3   :  { %1168 = vmatpush.msrb.mxu1 %v8759_v33  ;;  %1211 = vmatpush.msrb.mxu2 %v9161_v54  ;;  %v9258_v33 = vsub.f32 %v209_v10, %v9229_v35  ;;  %v68_v10 = vsel %vm66_vm14, %v9068_v25, %v9231_v56 }
  0xe4   :  { %1127 = vmatpush.msrb.mxu0 %v13474_v59  ;;  %1286 = vmatpush.msrb.mxu3 %v1285_v52  ;;  %v9262_v5 = vpop.permute.xlu1 %103  ;;  %v9264_v1 = vpop.permute.xlu0 %150  ;;  %v1296_v28 = vsub.f32 %v9234_v39, %v13378_v53  ;;  %v13475_v52 = vand.u32 4294901760, %v8898_v47  ;;  %v9296_v23 = vand.u32 4294901760, %v68_v10  ;;  %v13476_v47 = vand.u32 4294901760, %v8872_v31  ;;  %13477 = vst [vmem:[#allocation22_spill] sm:$0xff] %v9307_v60 }
  0xe5   :  { %1170 = vmatpush.msrb.mxu1 %v8788_v45  ;;  %1213 = vmatpush.msrb.mxu2 %v9159_v55  ;;  %v115_v45 = vsel %vm113_vm13, %v9015_v3, %v9262_v5  ;;  %v162_v2 = vsel %vm160_vm12, %v8972_v15, %v9264_v1  ;;  %v1307_v3 = vand.u32 4294901760, %v9248_v12 }
  0xe6   :  { %250 = vrot.lane.b32.xlu1 %v8727_v22, %s8546_s13  ;;  %309 = vrot.lane.b32.xlu0 %v9042_v27, %s8545_s12  ;;  %v9289_v25 = vand.u32 4294901760, %v115_v45  ;;  %v9291_v59 = vand.u32 4294901760, %v162_v2  ;;  %v1297_v53 = vand.u32 4294901760, %v1296_v28  ;;  %v9309_v28 = vpop.permute.xlu2 %634 }
  0xe7   :  { %734 = vrot.lane.b32.xlu2 %v9255_v29, %s8536_s23  ;;  %1131 = vmatpush.msrb.mxu0 %v13475_v52  ;;  %v1303_v52 = vand.u32 4294901760, %v1302_v49  ;;  %v9323_v49 = vsub.f32 %v68_v10, %v9296_v23 }
  0xe8   :  { %1172 = vmatpush.msrb.mxu1 %v8790_v46  ;;  %1215 = vmatpush.msrb.mxu2 %v9155_v63  ;;  %v9299_v15 = vsub.f32 %v162_v2, %v9291_v59  ;;  %v13382_v46 = vand.u32 4294901760, %v9258_v33  ;;  %v9312_v36 = vsub.f32 %v115_v45, %v9289_v25  ;;  %v13479_v45 = vand.u32 4294901760, %v8959_v4 }
  0xe9   :  { %1292 = vmatpush.msrb.mxu3 %v1291_v19  ;;  %1135 = vmatpush.msrb.mxu0 %v13476_v47  ;;  %v13478_v19 = vand.u32 4294901760, %v8932_v37  ;;  %v13480_v2 = vand.u32 4294901760, %v8992_v7  ;;  %v13483_v7 = vand.u32 4294901760, %v9101_v62 }
  0xea   :  { %1174 = vmatpush.msrb.mxu1 %v8824_v58  ;;  %1217 = vmatpush.msrb.mxu2 %v9222_v40  ;;  %v13381_v31 = vand.u32 4294901760, %v9299_v15  ;;  %v1308_v58 = vsub.f32 %v9248_v12, %v1307_v3  ;;  %v1325_v4 = vand.u32 4294901760, %v9312_v36 }
  0xeb   :  { %1139 = vmatpush.msrb.mxu0 %v13478_v19  ;;  %1298 = vmatpush.msrb.mxu3 %v1297_v53  ;;  %v892_v53 = vsub.f32 %v9142_v21, %v9307_v60  ;;  %v13481_v19 = vand.u32 4294901760, %v9037_v41 }
  0xec   :  { %1176 = vmatpush.msrb.mxu1 %v8851_v8  ;;  %1219 = vmatpush.msrb.mxu2 %v9175_v20  ;;  %v9327_v37 = vpop.permute.xlu1 %681  ;;  %v1314_v8 = vsub.f32 %v9258_v33, %v13382_v46  ;;  %v1320_v10 = vsub.f32 %v9299_v15, %v13381_v31  ;;  %v1309_v47 = vand.u32 4294901760, %v1308_v58 }
  0xed   :  { %1143 = vmatpush.msrb.mxu0 %v13479_v45  ;;  %1304 = vmatpush.msrb.mxu3 %v1303_v52  ;;  %v1331_v52 = vand.u32 4294901760, %v9323_v49  ;;  %v9355_v31 = vand.u32 4294901760, %v892_v53 }
  0xee   :  { %1178 = vmatpush.msrb.mxu1 %v8853_v11  ;;  %1221 = vmatpush.msrb.mxu2 %v9225_v57  ;;  %v9343_v11 = vpop.permute.xlu0 %728  ;;  %v1315_v45 = vand.u32 4294901760, %v1314_v8  ;;  %v1321_v46 = vand.u32 4294901760, %v1320_v10  ;;  %v9364_v58 = vpop.permute.xlu2 %540  ;;  %v13485_v8 = vld [vmem:[#allocation7_spill] sm:$0xff]  ;;  %v13487_v10 = vld [vmem:[#allocation9_spill] sm:$0xff] }
  0xef   :  { %687 = vrot.lane.b32.xlu1 %v9255_v29, %s8537_s24  ;;  %203 = vrot.lane.b32.xlu0 %v8727_v22, %s8547_s16  ;;  %13482 = vst [vmem:[#allocation23_spill] sm:$0xff] %v9355_v31 }
  0xf0   :  { %156 = vrot.lane.b32.xlu2 %v8727_v22, %s8548_s17  ;;  %1147 = vmatpush.msrb.mxu0 %v13480_v2  ;;  %v13488_v2 = vand.u32 4294901760, %v9031_v51 }
  0xf1   :  { %1180 = vmatpush.msrb.mxu1 %v8894_v42  ;;  %1223 = vmatpush.msrb.mxu2 %v9229_v35  ;;  %v1326_v42 = vsub.f32 %v9312_v36, %v1325_v4 }
  0xf2   :  { %1310 = vmatpush.msrb.mxu3 %v1309_v47  ;;  %1151 = vmatpush.msrb.mxu0 %v13481_v19  ;;  %v13489_v47 = vld [vmem:[#allocation12_spill] sm:$0xff]  ;;  %v13490_v19 = vld [vmem:[#allocation14_spill] sm:$0xff] }
  0xf3   :  { %1182 = vmatpush.msrb.mxu1 %v8856_v16  ;;  %1225 = vmatpush.msrb.mxu2 %v9291_v59  ;;  %v1332_v16 = vsub.f32 %v9323_v49, %v1331_v52  ;;  %v1327_v62 = vand.u32 4294901760, %v1326_v42  ;;  %v13492_v42 = vand.u32 4294901760, %v9046_v30 }
  0xf4   :  { %1316 = vmatpush.msrb.mxu3 %v1315_v45  ;;  %1155 = vmatpush.msrb.mxu0 %v13483_v7  ;;  %v13493_v7 = vld [vmem:[#allocation16_spill] sm:$0xff] }
  0xf5   :  { %1184 = vmatpush.msrb.mxu1 %v8928_v6  ;;  %1227 = vmatpush.msrb.mxu2 %v9289_v25  ;;  %v9372_v41 = vpop.permute.xlu1 %730  ;;  %v1333_v53 = vand.u32 4294901760, %v1332_v16  ;;  %v13495_v16 = vld [vmem:[#allocation17_spill] sm:$0xff] }
  0xf6   :  { %894 = vmatmul.f32.vlgmr.msra.gmra.mxu0 %v9355_v31  ;;  %1322 = vmatpush.msrb.mxu3 %v1321_v46  ;;  %13484 = vst [vmem:[#allocation24_spill] sm:$0xff] %v9372_v41  ;;  %v9381_v6 = vpop.permute.xlu0 %587  ;;  %v13486_v46 = vand.u32 4294901760, %v9007_v48 }
  0xf7   :  { %1342 = vmatpush.msra.mxu0 %v9007_v48  ;;  %1186 = vmatpush.msrb.mxu1 %v13485_v8  ;;  %v9396_v48 = vpop.permute.xlu2 %636  ;;  %v13496_v8 = vand.u32 4294901760, %v13490_v19 }
  0xf8   :  { %1229 = vmatpush.msrb.mxu2 %v9296_v23  ;;  %109 = vrot.lane.b32.xlu1 %v8727_v22, %s8549_s18  ;;  %13491 = vst [vmem:[#allocation7_spill] sm:$0xff] %v9396_v48 }
  0xf9   :  { %640 = vrot.lane.b32.xlu0 %v9255_v29, %s8538_s25  ;;  %1328 = vmatpush.msrb.mxu3 %v1327_v62  ;;  %v13498_v62 = vand.u32 4294901760, %v13495_v16 }
  0xfa   :  { %1345 = vmatpush.msra.mxu0 %v9031_v51  ;;  %1436 = vmatpush.msra.mxu2 %v13486_v46  ;;  %v13494_v51 = vld [vmem:[#allocation18_spill] sm:$0xff] }
  0xfb   :  { %1188 = vmatpush.msrb.mxu1 %v13487_v10  ;;  %1334 = vmatpush.msrb.mxu3 %v1333_v53  ;;  %v13500_v53 = vand.u32 4294901760, %v9106_v43 }
  0xfc   :  { %1348 = vmatpush.msra.mxu0 %v9046_v30  ;;  %1440 = vmatpush.msra.mxu2 %v13488_v2 }
  0xfd   :  { %1088 = vmatmul.f32.vlgmr.msra.gmra.mxu3 %v9307_v60  ;;  %1190 = vmatpush.msrb.mxu1 %v13489_v47  ;;  %v9394_v45 = vpop.permute.xlu1 %493  ;;  %v13515_v47 = vld [vmem:[#allocation15_spill] sm:$0xff] }
  0xfe   :  { %1503 = vmatpush.msra.mxu3 %v8985_v44  ;;  %1351 = vmatpush.msra.mxu0 %v13490_v19  ;;  %v9412_v30 = vpop.permute.xlu0 %683  ;;  %v551_v19 = vsel %vm548_vm4, %v13515_v47, %v9364_v58 }
  0xff   :  { %1444 = vmatpush.msra.mxu2 %v13492_v42  ;;  %1192 = vmatpush.msrb.mxu1 %v13493_v7  ;;  %13497 = vst [vmem:[#allocation9_spill] sm:$0xff] %v9412_v30 }
 0x100   :  { %1505 = vmatpush.msra.mxu3 %v9002_v14  ;;  %995 = vmatmul.f32.vlgmr.msra.gmra.mxu1 %v13494_v51 }
 0x101   :  { %1354 = vmatpush.msra.mxu0 %v13495_v16  ;;  %1395 = vmatpush.msra.mxu1 %v8985_v44  ;;  %v13517_v16 = vld [vmem:[#allocation10_spill] sm:$0xff] }
 0x102   :  { %1448 = vmatpush.msra.mxu2 %v13496_v8  ;;  %1507 = vmatpush.msra.mxu3 %v9020_v17  ;;  %v504_v8 = vsel %vm501_vm5, %v13517_v16, %v9394_v45 }
 0x103   :  { %546 = vrot.lane.b32.xlu1 %v9255_v29, %s8540_s29  ;;  %62 = vrot.lane.b32.xlu0 %v8727_v22, %s8550_s19  ;;  %v9428_v22 = vpop.permute.xlu2 %399 }
 0x104   :  { %1357 = vmatpush.msra.mxu0 %v9106_v43  ;;  %1397 = vmatpush.msra.mxu1 %v9002_v14  ;;  %v13502_v14 = vand.u32 4294901760, %v9182_v61  ;;  %v13503_v43 = vand.u32 4294901760, %v9234_v39 }
 0x105   :  { %1452 = vmatpush.msra.mxu2 %v13498_v62  ;;  %1509 = vmatpush.msra.mxu3 %v9033_v38  ;;  %v9421_v44 = vpop.permute.xlu1 %589 }
 0x106   :  { %1360 = vmatpush.msra.mxu0 %v9171_v32  ;;  %1399 = vmatpush.msra.mxu1 %v9020_v17  ;;  %13499 = vst [vmem:[#allocation12_spill] sm:$0xff] %v9421_v44  ;;  %v13501_v17 = vand.u32 4294901760, %v9168_v24 }
 0x107   :  { %1456 = vmatpush.msra.mxu2 %v13500_v53  ;;  %1511 = vmatpush.msra.mxu3 %v9088_v0  ;;  %v13519_v53 = vld [vmem:[#allocation19_spill] sm:$0xff] }
 0x108   :  { %1363 = vmatpush.msra.mxu0 %v9168_v24  ;;  %1401 = vmatpush.msra.mxu1 %v9033_v38  ;;  %v9445_v38 = vpop.permute.xlu0 %446 }
 0x109   :  { %1460 = vmatpush.msra.mxu2 %v1277_v26  ;;  %1513 = vmatpush.msra.mxu3 %v9076_v13 }
 0x10a   :  { %593 = vrot.lane.b32.xlu2 %v9255_v29, %s8539_s28  ;;  %1366 = vmatpush.msra.mxu0 %v9182_v61  ;;  %v13509_v61 = vld [vmem:[#allocation6_spill] sm:$0xff] }
 0x10b   :  { %1403 = vmatpush.msra.mxu1 %v9088_v0  ;;  %1464 = vmatpush.msra.mxu2 %v13501_v17  ;;  %v9462_v24 = vpop.permute.xlu2 %495  ;;  %v692_v26 = vsel %vm689_vm2, %v13509_v61, %v9327_v37  ;;  %v410_v17 = vsel %vm407_vm7, %v13519_v53, %v9428_v22  ;;  %v23_v53 = vld [vmem:[%s13335_s2] sm:$0xff] }
 0x10c   :  { %1515 = vmatpush.msra.mxu3 %v9161_v54  ;;  %405 = vrot.lane.b32.xlu1 %v9255_v29, %s8543_s8  ;;  %13505 = vst [vmem:[#allocation14_spill] sm:$0xff] %v9462_v24  ;;  %v9501_v46 = vand.u32 4294901760, %v692_v26  ;;  %v9584_v61 = vand.u32 4294901760, %v410_v17 }
 0x10d   :  { %452 = vrot.lane.b32.xlu0 %v9255_v29, %s8542_s7  ;;  %1369 = vmatpush.msra.mxu0 %v9234_v39  ;;  %v9450_v0 = vpop.permute.xlu1 %352 }
 0x10e   :  { %1405 = vmatpush.msra.mxu1 %v9076_v13  ;;  %1468 = vmatpush.msra.mxu2 %v13502_v14  ;;  %v13504_v13 = vand.u32 4294901760, %v9205_v34  ;;  %v9564_v14 = vand.u32 4294901760, %v504_v8  ;;  %13522 = vst [vmem:[#allocation15_spill] sm:$0xff] %v9584_v61 }
 0x10f   :  { %1517 = vmatpush.msra.mxu3 %v9159_v55  ;;  %1372 = vmatpush.msra.mxu0 %v9205_v34  ;;  %v13510_v34 = vand.u32 4294901760, %v9258_v33 }
 0x110   :  { %1407 = vmatpush.msra.mxu1 %v9161_v54  ;;  %1472 = vmatpush.msra.mxu2 %v13503_v43  ;;  %v13506_v54 = vld [vmem:[#allocation5_spill] sm:$0xff] }
 0x111   :  { %1519 = vmatpush.msra.mxu3 %v9155_v63  ;;  %1375 = vmatpush.msra.mxu0 %v9248_v12  ;;  %v739_v32 = vsel %vm736_vm1, %v13506_v54, %v9343_v11  ;;  %v13512_v12 = vld [vmem:[#allocation8_spill] sm:$0xff] }
 0x112   :  { %1409 = vmatpush.msra.mxu1 %v9159_v55  ;;  %1476 = vmatpush.msra.mxu2 %v13504_v13  ;;  %v9491_v39 = vand.u32 4294901760, %v739_v32  ;;  %13520 = vst [vmem:[#allocation8_spill] sm:$0xff] %v9564_v14 }
 0x113   :  { %1521 = vmatpush.msra.mxu3 %v9222_v40  ;;  %499 = vrot.lane.b32.xlu2 %v9255_v29, %s8541_s30  ;;  %v9513_v10 = vpop.permute.xlu2 %401 }
 0x114   :  { %1378 = vmatpush.msra.mxu0 %v9258_v33  ;;  %1411 = vmatpush.msra.mxu1 %v9155_v63  ;;  %v9483_v63 = vpop.permute.xlu0 %542  ;;  %v9508_v33 = vsub.f32 %v739_v32, %v9491_v39  ;;  %13514 = vst [vmem:[#allocation5_spill] sm:$0xff] %v9513_v10 }
 0x115   :  { %1480 = vmatpush.msra.mxu2 %v1307_v3  ;;  %1523 = vmatpush.msra.mxu3 %v9175_v20  ;;  %v9479_v55 = vpop.permute.xlu1 %448  ;;  %13508 = vst [vmem:[#allocation17_spill] sm:$0xff] %v9483_v63  ;;  %v645_v3 = vsel %vm642_vm0, %v13512_v12, %v9309_v28 }
 0x116   :  { %252 = vrot.lane.b32.xlu1 %v9042_v27, %s8546_s13  ;;  %311 = vrot.lane.b32.xlu0 %v9255_v29, %s8545_s12  ;;  %13507 = vst [vmem:[#allocation16_spill] sm:$0xff] %v9479_v55  ;;  %v9518_v2 = vand.u32 4294901760, %v645_v3  ;;  %v13385_v7 = vand.u32 4294901760, %v9508_v33 }
 0x117   :  { %1381 = vmatpush.msra.mxu0 %v9299_v15  ;;  %1413 = vmatpush.msra.mxu1 %v9222_v40  ;;  %v13511_v40 = vand.u32 4294901760, %v9299_v15 }
 0x118   :  { %1484 = vmatpush.msra.mxu2 %v13510_v34  ;;  %1525 = vmatpush.msra.mxu3 %v9225_v57  ;;  %v13523_v34 = vld [vmem:[#allocation13_spill] sm:$0xff] }
 0x119   :  { %1235 = vmatmul.f32.vlgmr.msrb.gmra.mxu2 %v9355_v31  ;;  %1384 = vmatpush.msra.mxu0 %v9312_v36  ;;  %v9531_v36 = vsub.f32 %v692_v26, %v9501_v46 }
 0x11a   :  { %1415 = vmatpush.msra.mxu1 %v9175_v20  ;;  %1488 = vmatpush.msra.mxu2 %v13511_v40  ;;  %v13513_v20 = vld [vmem:[#allocation11_spill] sm:$0xff]  ;;  %v363_v40 = vsel %vm360_vm8, %v13523_v34, %v9450_v0  ;;  %v9630_v34 = vsub.f32 %v410_v17, %v9584_v61 }
 0x11b   :  { %1157 = vmatmul.f32.vlgmr.msrb.gmra.mxu0 %v13494_v51  ;;  %1336 = vmatmul.f32.vlgmr.msrb.gmra.mxu3 %v13494_v51  ;;  %v598_v15 = vsel %vm595_vm3, %v13513_v20, %v9381_v6  ;;  %v13384_v62 = vand.u32 4294901760, %v9531_v36  ;;  %v9586_v26 = vpop.permute.xlu2 %199  ;;  %v9610_v16 = vand.u32 4294901760, %v363_v40 }
 0x11c   :  { %1527 = vmatpush.msra.mxu3 %v9229_v35  ;;  %1387 = vmatpush.msra.mxu0 %v9323_v49  ;;  %v13518_v49 = vld [vmem:[#allocation20_spill] sm:$0xff]  ;;  %v13528_v31 = vand.u32 4294901760, %v9630_v34 }
 0x11d   :  { %1417 = vmatpush.msra.mxu1 %v9225_v57  ;;  %1492 = vmatpush.msra.mxu2 %v1325_v4  ;;  %v9525_v42 = vpop.permute.xlu1 %354  ;;  %v9533_v57 = vand.u32 4294901760, %v598_v15  ;;  %v9538_v4 = vand.u32 4294901760, %v551_v19  ;;  %13524 = vst [vmem:[#allocation10_spill] sm:$0xff] %v9610_v16 }
 0x11e   :  { %1194 = vmatmul.f32.vlgmr.msrb.gmra.mxu1 %v13494_v51  ;;  %1529 = vmatpush.msra.mxu3 %v9291_v59  ;;  %13516 = vst [vmem:[#allocation6_spill] sm:$0xff] %v9525_v42 }
 0x11f   :  { %1540 = vmatpush.msrb.mxu0 %v9491_v39  ;;  %358 = vrot.lane.b32.xlu2 %v9255_v29, %s8544_s9  ;;  %v9546_v29 = vpop.permute.xlu0 %305  ;;  %v9569_v43 = vsub.f32 %v598_v15, %v9533_v57  ;;  %v9577_v13 = vsub.f32 %v551_v19, %v9538_v4 }
 0x120   :  { %1419 = vmatpush.msra.mxu1 %v9229_v35  ;;  %1496 = vmatpush.msra.mxu2 %v1331_v52  ;;  %v9552_v35 = vsub.f32 %v645_v3, %v9518_v2  ;;  %v457_v52 = vsel %vm454_vm6, %v13518_v49, %v9445_v38  ;;  %v9601_v3 = vsub.f32 %v504_v8, %v9564_v14 }
 0x121   :  { %1531 = vmatpush.msra.mxu3 %v9289_v25  ;;  %1542 = vmatpush.msrb.mxu0 %v9501_v46  ;;  %v9579_v54 = vand.u32 4294901760, %v457_v52  ;;  %v13387_v20 = vand.u32 4294901760, %v9569_v43  ;;  %v316_v15 = vsel %vm313_vm9, %v9199_v18, %v9546_v29  ;;  %v13388_v19 = vand.u32 4294901760, %v9577_v13  ;;  %v275_v18 = vld [vmem:[%s13333_s0 + $0x18] sm:$0xff] }
 0x122   :  { %1683 = vmatpush.msrb.mxu2 %v9508_v33  ;;  %111 = vrot.lane.b32.xlu1 %v9042_v27, %s8549_s18  ;;  %v13383_v32 = vand.u32 4294901760, %v9552_v35 }
 0x123   :  { %158 = vrot.lane.b32.xlu0 %v9042_v27, %s8548_s17  ;;  %1421 = vmatpush.msra.mxu1 %v9291_v59  ;;  %v1583_v59 = vsub.f32 %v9508_v33, %v13385_v7  ;;  %13521 = vst [vmem:[#allocation11_spill] sm:$0xff] %v9579_v54  ;;  %v9618_v49 = vsub.f32 %v457_v52, %v9579_v54  ;;  %v13386_v52 = vmov 0  }
 0x124   :  { %1498 = vmatmul.f32.vlgmr.msra.gmra.mxu2 %v13494_v51  ;;  %1533 = vmatpush.msra.mxu3 %v9296_v23  ;;  %v1595_v8 = vsub.f32 %v9552_v35, %v13383_v32  ;;  %v9632_v32 = vand.u32 4294901760, %v316_v15  ;;  %v1607_v17 = vsub.f32 %v9577_v13, %v13388_v19 }
 0x125   :  { %1544 = vmatpush.msrb.mxu0 %v9518_v2  ;;  %1686 = vmatpush.msrb.mxu2 %v9531_v36  ;;  %v9596_v12 = vpop.permute.xlu1 %152  ;;  %v1584_v47 = vand.u32 4294901760, %v1583_v59 }
 0x126   :  { %1423 = vmatpush.msra.mxu1 %v9289_v25  ;;  %1736 = vmatpush.msrb.mxu3 %v9491_v39  ;;  %v1589_v25 = vsub.f32 %v9531_v36, %v13384_v62  ;;  %v9644_v62 = vand.u32 4294901760, %v275_v18  ;;  %v1596_v7 = vand.u32 4294901760, %v1595_v8  ;;  %v9666_v19 = vsub.f32 %v316_v15, %v9632_v32 }
 0x127   :  { %1390 = vmatmul.f32.vlgmr.msra.gmra.mxu0 %v9142_v21  ;;  %1535 = vmatmul.f32.vlgmr.msra.gmra.mxu3 %v13494_v51  ;;  %v9627_v59 = vpop.permute.xlu0 %246  ;;  %v740_v15 = vsel %vm736_vm1, %v9343_v11, %v9372_v41  ;;  %v1625_v11 = vsub.f32 %v9630_v34, %v13528_v31  ;;  %v646_v21 = vsel %vm642_vm0, %v9309_v28, %v9396_v48 }
 0x128   :  { %1546 = vmatpush.msrb.mxu0 %v9533_v57  ;;  %1689 = vmatpush.msrb.mxu2 %v9552_v35  ;;  %13526 = vst [vmem:[#allocation20_spill] sm:$0xff] %v9666_v19  ;;  %v9743_v31 = vand.u32 4294901760, %v646_v21 }
 0x129   :  { %1425 = vmatpush.msra.mxu1 %v9296_v23  ;;  %1738 = vmatpush.msrb.mxu3 %v9501_v46  ;;  %v1590_v23 = vand.u32 4294901760, %v1589_v25  ;;  %v1601_v25 = vsub.f32 %v9569_v43, %v13387_v20  ;;  %v9651_v20 = vsub.f32 %v363_v40, %v9610_v16  ;;  %v13525_v40 = vand.u32 4294901760, %v9601_v3 }
 0x12a   :  { %1429 = vmatmul.f32.vlgmr.msra.gmra.mxu1 %v9307_v60  ;;  %1548 = vmatpush.msrb.mxu0 %v9538_v4 }
 0x12b   :  { %1585 = vmatpush.msrb.mxu1 %v1584_v47  ;;  %1692 = vmatpush.msrb.mxu2 %v9569_v43  ;;  %v9671_v47 = vpop.permute.xlu2 %105  ;;  %v13529_v28 = vand.u32 4294901760, %v9651_v20 }
 0x12c   :  { %1740 = vmatpush.msrb.mxu3 %v9518_v2  ;;  %8520 = vset.pattern.permute.xlu0 %v13386_v52  ;;  %v257_v52 = vsel %vm254_vm10, %v9197_v50, %v9627_v59  ;;  %v1602_v50 = vand.u32 4294901760, %v1601_v25  ;;  %v9678_v25 = vsub.f32 %v275_v18, %v9644_v62 }
 0x12d   :  { %1550 = vmatpush.msrb.mxu0 %v9564_v14  ;;  %1591 = vmatpush.msrb.mxu1 %v1590_v23  ;;  %v210_v23 = vsel %vm207_vm11, %v9157_v9, %v9586_v26  ;;  %v163_v9 = vsel %vm160_vm12, %v9264_v1, %v9596_v12  ;;  %v9674_v8 = vand.u32 4294901760, %v257_v52  ;;  %v13527_v1 = vand.u32 4294901760, %v9618_v49 }
 0x12e   :  { %1695 = vmatpush.msrb.mxu2 %v9577_v13  ;;  %854 = vperm.xlu0 %8520, %v23_v53   ;;  %v1613_v53 = vsub.f32 %v9601_v3, %v13525_v40  ;;  %v9680_v40 = vpop.permute.xlu1 %58  ;;  %v9685_v51 = vand.u32 4294901760, %v210_v23  ;;  %v9694_v18 = vand.u32 4294901760, %v163_v9 }
 0x12f   :  { %1742 = vmatpush.msrb.mxu3 %v9533_v57  ;;  %205 = vrot.lane.b32.xlu2 %v9042_v27, %s8547_s16  ;;  %v1619_v60 = vsub.f32 %v9618_v49, %v13527_v1  ;;  %v69_v41 = vsel %vm66_vm14, %v9231_v56, %v9680_v40 }
 0x130   :  { %1552 = vmatpush.msrb.mxu0 %v9579_v54  ;;  %1597 = vmatpush.msrb.mxu1 %v1596_v7  ;;  %v1608_v7 = vand.u32 4294901760, %v1607_v17  ;;  %v1614_v1 = vand.u32 4294901760, %v1613_v53  ;;  %v693_v53 = vsel %vm689_vm2, %v9327_v37, %v9412_v30  ;;  %v9726_v17 = vsub.f32 %v210_v23, %v9685_v51 }
 0x131   :  { %1698 = vmatpush.msrb.mxu2 %v9601_v3  ;;  %1744 = vmatpush.msrb.mxu3 %v9538_v4  ;;  %v1620_v56 = vand.u32 4294901760, %v1619_v60  ;;  %v9735_v37 = vsub.f32 %v163_v9, %v9694_v18  ;;  %v1626_v60 = vand.u32 4294901760, %v1625_v11  ;;  %v13532_v23 = vand.u32 4294901760, %v9666_v19 }
 0x132   :  { %1554 = vmatpush.msrb.mxu0 %v9584_v61  ;;  %1603 = vmatpush.msrb.mxu1 %v1602_v50  ;;  %v116_v50 = vsel %vm113_vm13, %v9262_v5, %v9671_v47  ;;  %v9715_v5 = vsub.f32 %v257_v52, %v9674_v8  ;;  %v9732_v52 = vpop.permute.xlu0 %307  ;;  %v9745_v30 = vand.u32 4294901760, %v693_v53  ;;  %v13533_v9 = vand.u32 4294901760, %v9678_v25 }
 0x133   :  { %1701 = vmatpush.msrb.mxu2 %v9618_v49  ;;  %1746 = vmatpush.msrb.mxu3 %v9564_v14  ;;  %v9710_v14 = vand.u32 4294901760, %v740_v15  ;;  %v9728_v48 = vand.u32 4294901760, %v116_v50  ;;  %13531 = vst [vmem:[#allocation13_spill] sm:$0xff] %v9732_v52 }
 0x134   :  { %1556 = vmatpush.msrb.mxu0 %v9610_v16  ;;  %1609 = vmatpush.msrb.mxu1 %v1608_v7  ;;  %v1631_v7 = vsub.f32 %v9651_v20, %v13529_v28  ;;  %v1637_v28 = vsub.f32 %v9666_v19, %v13532_v23 }
 0x135   :  { %1704 = vmatpush.msrb.mxu2 %v9630_v34  ;;  %1748 = vmatpush.msrb.mxu3 %v9579_v54  ;;  %13530 = vst [vmem:[#allocation19_spill] sm:$0xff] %v9728_v48  ;;  %v13404_v54 = vand.u32 4294901760, %v9715_v5  ;;  %v9754_v11 = vsub.f32 %v740_v15, %v9710_v14  ;;  %v9767_v15 = vsub.f32 %v116_v50, %v9728_v48 }
 0x136   :  { %1558 = vmatpush.msrb.mxu0 %v9632_v32  ;;  %1615 = vmatpush.msrb.mxu1 %v1614_v1  ;;  %v9737_v1 = vand.u32 4294901760, %v69_v41  ;;  %v1632_v23 = vand.u32 4294901760, %v1631_v7  ;;  %v505_v7 = vsel %vm501_vm5, %v9394_v45, %v9462_v24  ;;  %v9788_v45 = vsub.f32 %v646_v21, %v9743_v31 }
 0x137   :  { %1707 = vmatpush.msrb.mxu2 %v9651_v20  ;;  %1750 = vmatpush.msrb.mxu3 %v9584_v61  ;;  %v1643_v61 = vsub.f32 %v9678_v25, %v13533_v9  ;;  %v9804_v24 = vand.u32 4294901760, %v505_v7 }
 0x138   :  { %1560 = vmatpush.msrb.mxu0 %v9644_v62  ;;  %1621 = vmatpush.msrb.mxu1 %v1620_v56  ;;  %v599_v56 = vsel %vm595_vm3, %v9381_v6, %v9421_v44  ;;  %v9771_v6 = vsub.f32 %v69_v41, %v9737_v1  ;;  %v1649_v41 = vsub.f32 %v9715_v5, %v13404_v54 }
 0x139   :  { %1710 = vmatpush.msrb.mxu2 %v9666_v19  ;;  %1752 = vmatpush.msrb.mxu3 %v9610_v16  ;;  %v552_v16 = vsel %vm548_vm4, %v9364_v58, %v9483_v63  ;;  %v1638_v58 = vand.u32 4294901760, %v1637_v28  ;;  %v9780_v19 = vand.u32 4294901760, %v599_v56  ;;  %v1644_v50 = vand.u32 4294901760, %v1643_v61 }
 0x13a   :  { %1562 = vmatpush.msrb.mxu0 %v9674_v8  ;;  %1627 = vmatpush.msrb.mxu1 %v1626_v60  ;;  %v9778_v60 = vsub.f32 %v693_v53, %v9745_v30  ;;  %v9791_v28 = vand.u32 4294901760, %v552_v16  ;;  %v13534_v53 = vand.u32 4294901760, %v9726_v17  ;;  %v13535_v61 = vand.u32 4294901760, %v9735_v37 }
 0x13b   :  { %1713 = vmatpush.msrb.mxu2 %v9678_v25  ;;  %1754 = vmatpush.msrb.mxu3 %v9632_v32  ;;  %v1650_v54 = vand.u32 4294901760, %v1649_v41  ;;  %v9841_v44 = vsub.f32 %v505_v7, %v9804_v24 }
 0x13c   :  { %1564 = vmatpush.msrb.mxu0 %v9685_v51  ;;  %1633 = vmatpush.msrb.mxu1 %v1632_v23  ;;  %v1655_v9 = vsub.f32 %v9726_v17, %v13534_v53  ;;  %v1661_v21 = vsub.f32 %v9735_v37, %v13535_v61  ;;  %v411_v53 = vsel %vm407_vm7, %v9428_v22, %v9513_v10  ;;  %v9819_v23 = vpop.permute.xlu0 %248  ;;  %v13536_v22 = vand.u32 4294901760, %v9754_v11 }
 0x13d   :  { %1716 = vmatpush.msrb.mxu2 %v9715_v5  ;;  %1756 = vmatpush.msrb.mxu3 %v9644_v62  ;;  %v9816_v61 = vsub.f32 %v599_v56, %v9780_v19  ;;  %v13540_v7 = vand.u32 4294901760, %v9778_v60 }
 0x13e   :  { %1566 = vmatpush.msrb.mxu0 %v9694_v18  ;;  %1639 = vmatpush.msrb.mxu1 %v1638_v58  ;;  %v458_v58 = vsel %vm454_vm6, %v9445_v38, %v9479_v55  ;;  %v9823_v55 = vsub.f32 %v552_v16, %v9791_v28  ;;  %v1924_v56 = vsub.f32 %v9754_v11, %v13536_v22  ;;  %v1662_v41 = vand.u32 4294901760, %v1661_v21 }
 0x13f   :  { %1719 = vmatpush.msrb.mxu2 %v9726_v17  ;;  %1758 = vmatpush.msrb.mxu3 %v9674_v8  ;;  %v9831_v10 = vand.u32 4294901760, %v458_v58  ;;  %v13537_v16 = vand.u32 4294901760, %v9767_v15  ;;  %v9843_v22 = vand.u32 4294901760, %v411_v53  ;;  %v13539_v21 = vand.u32 4294901760, %v9508_v33 }
 0x140   :  { %64 = vrot.lane.b32.xlu2 %v9042_v27, %s8550_s19  ;;  %1568 = vmatpush.msrb.mxu0 %v9728_v48  ;;  %v1656_v27 = vand.u32 4294901760, %v1655_v9  ;;  %v13538_v9 = vand.u32 4294901760, %v9771_v6  ;;  %v1925_v33 = vand.u32 4294901760, %v1924_v56 }
 0x141   :  { %1645 = vmatpush.msrb.mxu1 %v1644_v50  ;;  %1722 = vmatpush.msrb.mxu2 %v9735_v37  ;;  %v1667_v38 = vsub.f32 %v9767_v15, %v13537_v16  ;;  %v317_v16 = vsel %vm313_vm9, %v9546_v29, %v9732_v52  ;;  %v9876_v56 = vsub.f32 %v411_v53, %v9843_v22  ;;  %v13543_v29 = vand.u32 4294901760, %v9552_v35 }
 0x142   :  { %1760 = vmatpush.msrb.mxu3 %v9685_v51  ;;  %1570 = vmatpush.msrb.mxu0 %v9737_v1  ;;  %v1673_v63 = vsub.f32 %v9771_v6, %v13538_v9  ;;  %v1930_v9 = vsub.f32 %v9778_v60, %v13540_v7  ;;  %v9870_v7 = vsub.f32 %v458_v58, %v9831_v10  ;;  %v13545_v35 = vand.u32 4294901760, %v9569_v43 }
 0x143   :  { %1651 = vmatpush.msrb.mxu1 %v1650_v54  ;;  %1725 = vmatpush.msrb.mxu2 %v9767_v15  ;;  %v364_v54 = vsel %vm360_vm8, %v9450_v0, %v9525_v42  ;;  %v13541_v0 = vand.u32 4294901760, %v9531_v36  ;;  %v1668_v52 = vand.u32 4294901760, %v1667_v38 }
 0x144   :  { %1762 = vmatpush.msrb.mxu3 %v9694_v18  ;;  %1777 = vmatpush.msra.mxu0 %v13539_v21  ;;  %v13542_v21 = vand.u32 4294901760, %v9788_v45  ;;  %v9872_v50 = vand.u32 4294901760, %v364_v54  ;;  %v1674_v36 = vand.u32 4294901760, %v1673_v63  ;;  %v1931_v38 = vand.u32 4294901760, %v1930_v9 }
 0x145   :  { %1657 = vmatpush.msrb.mxu1 %v1656_v27  ;;  %1728 = vmatpush.msrb.mxu2 %v9771_v6  ;;  %v276_v27 = vld [vmem:[%s13333_s0 + $0x20] sm:$0xff]  ;;  %v1959_v58 = vand.u32 4294901760, %v9870_v7 }
 0x146   :  { %1764 = vmatpush.msrb.mxu3 %v9728_v48  ;;  %1781 = vmatpush.msra.mxu0 %v13541_v0  ;;  %v1936_v42 = vsub.f32 %v9788_v45, %v13542_v21  ;;  %v9878_v0 = vpop.permute.xlu2 %201  ;;  %v9880_v21 = vand.u32 4294901760, %v317_v16  ;;  %v9889_v53 = vand.u32 4294901760, %v276_v27  ;;  %v258_v48 = vsel %vm254_vm10, %v9627_v59, %v9819_v23 }
 0x147   :  { %1663 = vmatpush.msrb.mxu1 %v1662_v41  ;;  %1881 = vmatpush.msra.mxu2 %v9710_v14  ;;  %v13544_v41 = vand.u32 4294901760, %v9816_v61  ;;  %v211_v59 = vsel %vm207_vm11, %v9586_v26, %v9878_v0 }
 0x148   :  { %1766 = vmatpush.msrb.mxu3 %v9737_v1  ;;  %1785 = vmatpush.msra.mxu0 %v13543_v29  ;;  %v9898_v29 = vsub.f32 %v364_v54, %v9872_v50  ;;  %v1937_v9 = vand.u32 4294901760, %v1936_v42  ;;  %v9910_v43 = vsub.f32 %v317_v16, %v9880_v21  ;;  %v13547_v54 = vand.u32 4294901760, %v9577_v13 }
 0x149   :  { %1669 = vmatpush.msrb.mxu1 %v1668_v52  ;;  %v1942_v63 = vsub.f32 %v9816_v61, %v13544_v41  ;;  %1883 = vmatpush.msra.mxu2 %v9745_v30  ;;  %v9900_v52 = vpop.permute.xlu0 %154  ;;  %v13548_v42 = vand.u32 4294901760, %v9841_v44  ;;  %v9923_v16 = vsub.f32 %v276_v27, %v9889_v53  ;;  %v1960_v27 = vsub.f32 %v9870_v7, %v1959_v58 }
 0x14a   :  { %1926 = vmatpush.msra.mxu3 %v1925_v33  ;;  %1789 = vmatpush.msra.mxu0 %v13545_v35  ;;  %v13546_v33 = vand.u32 4294901760, %v9823_v55  ;;  %v9919_v35 = vand.u32 4294901760, %v258_v48  ;;  %v164_v13 = vsel %vm160_vm12, %v9596_v12, %v9900_v52  ;;  %v13550_v12 = vand.u32 4294901760, %v9618_v49 }
 0x14b   :  { %1675 = vmatpush.msrb.mxu1 %v1674_v36  ;;  %1885 = vmatpush.msra.mxu2 %v9743_v31  ;;  %v1954_v36 = vsub.f32 %v9841_v44, %v13548_v42  ;;  %v1943_v26 = vand.u32 4294901760, %v1942_v63  ;;  %v9933_v42 = vand.u32 4294901760, %v211_v59  ;;  %v13416_v63 = vand.u32 4294901760, %v9898_v29 }
 0x14c   :  { %1932 = vmatpush.msra.mxu3 %v1931_v38  ;;  %v1948_v41 = vsub.f32 %v9823_v55, %v13546_v33  ;;  %1793 = vmatpush.msra.mxu0 %v13547_v54  ;;  %v13413_v38 = vand.u32 4294901760, %v9876_v56  ;;  %v9925_v33 = vpop.permute.xlu1 %107  ;;  %v13549_v54 = vand.u32 4294901760, %v9601_v3  ;;  %v13415_v49 = vand.u32 4294901760, %v9923_v16 }
 0x14d   :  { %1844 = vmatpush.msra.mxu1 %v9491_v39  ;;  %1887 = vmatpush.msra.mxu2 %v9780_v19 }
 0x14e   :  { %1938 = vmatpush.msra.mxu3 %v1937_v9  ;;  %1797 = vmatpush.msra.mxu0 %v13549_v54  ;;  %v1949_v39 = vand.u32 4294901760, %v1948_v41  ;;  %v1955_v9 = vand.u32 4294901760, %v1954_v36  ;;  %v1966_v3 = vsub.f32 %v9876_v56, %v13413_v38  ;;  %v117_v41 = vsel %vm113_vm13, %v9671_v47, %v9925_v33  ;;  %v9957_v36 = vpop.permute.xlu2 %60 }
 0x14f   :  { %1846 = vmatpush.msra.mxu1 %v9501_v46  ;;  %1889 = vmatpush.msra.mxu2 %v9791_v28  ;;  %v9948_v46 = vsub.f32 %v258_v48, %v9919_v35  ;;  %v9953_v54 = vand.u32 4294901760, %v164_v13  ;;  %v9963_v48 = vsub.f32 %v211_v59, %v9933_v42  ;;  %v70_v47 = vsel %vm66_vm14, %v9680_v40, %v9957_v36 }
 0x150   :  { %1944 = vmatpush.msra.mxu3 %v1943_v26  ;;  %1801 = vmatpush.msra.mxu0 %v13550_v12  ;;  %v13414_v26 = vand.u32 4294901760, %v9910_v43  ;;  %v13551_v12 = vand.u32 4294901760, %v9630_v34  ;;  %v9972_v38 = vand.u32 4294901760, %v117_v41  ;;  %v13552_v34 = vand.u32 4294901760, %v9651_v20  ;;  %v13553_v20 = vld [vmem:[#allocation20_spill] sm:$0xff] }
 0x151   :  { %1848 = vmatpush.msra.mxu1 %v9518_v2  ;;  %1891 = vmatpush.msra.mxu2 %v9804_v24  ;;  %v1961_v2 = vand.u32 4294901760, %v1960_v27  ;;  %v1967_v59 = vand.u32 4294901760, %v1966_v3  ;;  %v1984_v40 = vsub.f32 %v9923_v16, %v13415_v49  ;;  %v1989_v27 = vand.u32 4294901760, %v9948_v46  ;;  %v9993_v3 = vpop.permute.xlu0 %732 }
 0x152   :  { %1950 = vmatpush.msra.mxu3 %v1949_v39  ;;  %1805 = vmatpush.msra.mxu0 %v13551_v12  ;;  %v1972_v39 = vsub.f32 %v9898_v29, %v13416_v63  ;;  %v9978_v12 = vsub.f32 %v164_v13, %v9953_v54  ;;  %v13554_v13 = vand.u32 4294901760, %v13553_v20  ;;  %v13556_v49 = vand.u32 4294901760, %v9678_v25  ;;  %v13557_v63 = vld [vmem:[#allocation11_spill] sm:$0xff] }
 0x153   :  { %1850 = vmatpush.msra.mxu1 %v9533_v57  ;;  %1893 = vmatpush.msra.mxu2 %v9831_v10  ;;  %v1978_v57 = vsub.f32 %v9910_v43, %v13414_v26  ;;  %v9998_v26 = vsub.f32 %v117_v41, %v9972_v38  ;;  %v13558_v25 = vand.u32 4294901760, %v9715_v5 }
 0x154   :  { %1956 = vmatpush.msra.mxu3 %v1955_v9  ;;  %1809 = vmatpush.msra.mxu0 %v13552_v34  ;;  %v9988_v9 = vand.u32 4294901760, %v70_v47  ;;  %v1995_v34 = vand.u32 4294901760, %v9963_v48  ;;  %v10011_v41 = vpop.permute.xlu1 %685 }
 0x155   :  { %1852 = vmatpush.msra.mxu1 %v9538_v4  ;;  %1895 = vmatpush.msra.mxu2 %v9843_v22  ;;  %v13555_v4 = vld [vmem:[#allocation8_spill] sm:$0xff]  ;;  %v1979_v20 = vand.u32 4294901760, %v1978_v57  ;;  %v13560_v57 = vand.u32 4294901760, %v9726_v17 }
 0x156   :  { %1962 = vmatpush.msra.mxu3 %v1961_v2  ;;  %1813 = vmatpush.msra.mxu0 %v13554_v13  ;;  %v1973_v2 = vand.u32 4294901760, %v1972_v39  ;;  %v1985_v13 = vand.u32 4294901760, %v1984_v40  ;;  %v2001_v39 = vand.u32 4294901760, %v9978_v12  ;;  %v13561_v40 = vld [vmem:[#allocation10_spill] sm:$0xff] }
 0x157   :  { %1854 = vmatpush.msra.mxu1 %v13555_v4  ;;  %1897 = vmatpush.msra.mxu2 %v9872_v50  ;;  %v10009_v4 = vsub.f32 %v70_v47, %v9988_v9  ;;  %v2007_v47 = vand.u32 4294901760, %v9998_v26 }
 0x158   :  { %1968 = vmatpush.msra.mxu3 %v1967_v59  ;;  %1817 = vmatpush.msra.mxu0 %v13556_v49  ;;  %v1990_v59 = vsub.f32 %v9948_v46, %v1989_v27  ;;  %v1996_v49 = vsub.f32 %v9963_v48, %v1995_v34  ;;  %v2002_v5 = vsub.f32 %v9978_v12, %v2001_v39 }
 0x159   :  { %1856 = vmatpush.msra.mxu1 %v13557_v63  ;;  %1899 = vmatpush.msra.mxu2 %v9880_v21  ;;  %v13559_v63 = vld [vmem:[#allocation15_spill] sm:$0xff] }
 0x15a   :  { %1974 = vmatpush.msra.mxu3 %v1973_v2  ;;  %1821 = vmatpush.msra.mxu0 %v13558_v25  ;;  %v1991_v2 = vand.u32 4294901760, %v1990_v59  ;;  %v2013_v25 = vand.u32 4294901760, %v10009_v4  ;;  %v1997_v17 = vand.u32 4294901760, %v1996_v49  ;;  %v2008_v59 = vsub.f32 %v9998_v26, %v2007_v47 }
 0x15b   :  { %1858 = vmatpush.msra.mxu1 %v13559_v63  ;;  %1901 = vmatpush.msra.mxu2 %v9889_v53  ;;  %v10039_v63 = vpop.permute.xlu0 %591 }
 0x15c   :  { %1980 = vmatpush.msra.mxu3 %v1979_v20  ;;  %1825 = vmatpush.msra.mxu0 %v13560_v57  ;;  %v13562_v20 = vand.u32 4294901760, %v9735_v37  ;;  %v13564_v37 = vld [vmem:[#allocation21_spill] sm:$0xff]  ;;  %v2003_v57 = vand.u32 4294901760, %v2002_v5  ;;  %v10050_v49 = vpop.permute.xlu1 %544  ;;  %v2009_v5 = vand.u32 4294901760, %v2008_v59  ;;  %v13571_v59 = vld [vmem:[#allocation19_spill] sm:$0xff] }
 0x15d   :  { %1860 = vmatpush.msra.mxu1 %v13561_v40  ;;  %1903 = vmatpush.msra.mxu2 %v9919_v35  ;;  %v10042_v40 = vpop.permute.xlu2 %638 }
 0x15e   :  { %1986 = vmatpush.msra.mxu3 %v1985_v13  ;;  %1829 = vmatpush.msra.mxu0 %v13562_v20  ;;  %v13563_v13 = vand.u32 4294901760, %v9767_v15  ;;  %v13565_v15 = vld [vmem:[#allocation23_spill] sm:$0xff]  ;;  %v13567_v20 = vand.u32 4294901760, %v9771_v6  ;;  %v13569_v6 = vand.u32 4294901760, %v9754_v11 }
 0x15f   :  { %1862 = vmatpush.msra.mxu1 %v9632_v32  ;;  %1905 = vmatpush.msra.mxu2 %v9933_v42  ;;  %v2014_v32 = vsub.f32 %v10009_v4, %v2013_v25 }
 0x160   :  { %1992 = vmatpush.msra.mxu3 %v1991_v2  ;;  %1833 = vmatpush.msra.mxu0 %v13563_v13  ;;  %v13566_v2 = vld [vmem:[#allocation22_spill] sm:$0xff]  ;;  %v13570_v13 = vand.u32 4294901760, %v9778_v60 }
 0x161   :  { %1731 = vmatmul.f32.vlgmr.msrb.gmra.mxu2 %v13564_v37  ;;  %1864 = vmatpush.msra.mxu1 %v9644_v62  ;;  %v13568_v62 = vld [vmem:[#allocation18_spill] sm:$0xff] }
 0x162   :  { %1998 = vmatpush.msra.mxu3 %v1997_v17  ;;  %1907 = vmatpush.msra.mxu2 %v9953_v54  ;;  %v2015_v17 = vand.u32 4294901760, %v2014_v32 }
 0x163   :  { %1576 = vmatmul.f32.vlgmr.msrb.gmra.mxu0 %v13565_v15  ;;  %1770 = vmatmul.f32.vlgmr.msrb.gmra.mxu3 %v13566_v2 }
 0x164   :  { %2004 = vmatpush.msra.mxu3 %v2003_v57  ;;  %1837 = vmatpush.msra.mxu0 %v13567_v20  ;;  %v10078_v57 = vpop.permute.xlu1 %403 }
 0x165   :  { %1866 = vmatpush.msra.mxu1 %v9674_v8  ;;  %1909 = vmatpush.msra.mxu2 %v9972_v38  ;;  %v10066_v8 = vpop.permute.xlu0 %450 }
 0x166   :  { %2010 = vmatpush.msra.mxu3 %v2009_v5  ;;  %1677 = vmatmul.f32.vlgmr.msrb.gmra.mxu1 %v13568_v62 }
 0x167   :  { %2024 = vmatpush.msrb.mxu0 %v9754_v11  ;;  %1868 = vmatpush.msra.mxu1 %v9685_v51  ;;  %v10071_v51 = vpop.permute.xlu2 %497  ;;  %v13572_v11 = vand.u32 4294901760, %v9788_v45 }
 0x168   :  { %1911 = vmatpush.msra.mxu2 %v9988_v9  ;;  %2016 = vmatpush.msra.mxu3 %v2015_v17 }
 0x169   :  { %2027 = vmatpush.msrb.mxu0 %v9778_v60  ;;  %1870 = vmatpush.msra.mxu1 %v9694_v18  ;;  %v13573_v18 = vand.u32 4294901760, %v9816_v61  ;;  %v13574_v60 = vand.u32 4294901760, %v9823_v55 }
 0x16a   :  { %2118 = vmatpush.msrb.mxu2 %v13569_v6  ;;  %2185 = vmatpush.msrb.mxu3 %v9710_v14 }
 0x16b   :  { %2030 = vmatpush.msrb.mxu0 %v9788_v45  ;;  %1872 = vmatpush.msra.mxu1 %v13571_v59 }
 0x16c   :  { %2122 = vmatpush.msrb.mxu2 %v13570_v13  ;;  %2187 = vmatpush.msrb.mxu3 %v9745_v30  ;;  %v13587_v13 = vld [vmem:[#allocation6_spill] sm:$0xff] }
 0x16d   :  { %1839 = vmatmul.f32.vlgmr.msra.gmra.mxu0 %v13568_v62  ;;  %1874 = vmatpush.msra.mxu1 %v9737_v1  ;;  %v13575_v1 = vand.u32 4294901760, %v9841_v44  ;;  %v10097_v45 = vpop.permute.xlu0 %309 }
 0x16e   :  { %2126 = vmatpush.msrb.mxu2 %v13572_v11  ;;  %2033 = vmatpush.msrb.mxu0 %v9816_v61  ;;  %v13588_v11 = vld [vmem:[#allocation5_spill] sm:$0xff] }
 0x16f   :  { %2189 = vmatpush.msrb.mxu3 %v9743_v31  ;;  %1876 = vmatmul.f32.vlgmr.msra.gmra.mxu1 %v13568_v62 }
 0x170   :  { %2130 = vmatpush.msrb.mxu2 %v13573_v18  ;;  %2036 = vmatpush.msrb.mxu0 %v9823_v55  ;;  %v13577_v55 = vand.u32 4294901760, %v9898_v29 }
 0x171   :  { %2077 = vmatpush.msrb.mxu1 %v9710_v14  ;;  %2191 = vmatpush.msrb.mxu3 %v9780_v19  ;;  %v10101_v14 = vpop.permute.xlu2 %356 }
 0x172   :  { %2039 = vmatpush.msrb.mxu0 %v9841_v44  ;;  %2134 = vmatpush.msrb.mxu2 %v13574_v60  ;;  %v13576_v44 = vand.u32 4294901760, %v9876_v56  ;;  %v365_v59 = vsel %vm360_vm8, %v13587_v13, %v10101_v14 }
 0x173   :  { %2079 = vmatpush.msrb.mxu1 %v9745_v30  ;;  %2193 = vmatpush.msrb.mxu3 %v9791_v28  ;;  %v10108_v30 = vpop.permute.xlu1 %250 }
 0x174   :  { %2042 = vmatpush.msrb.mxu0 %v9870_v7  ;;  %2138 = vmatpush.msrb.mxu2 %v13575_v1 }
 0x175   :  { %2081 = vmatpush.msrb.mxu1 %v9743_v31  ;;  %2195 = vmatpush.msrb.mxu3 %v9804_v24  ;;  %v13579_v31 = vand.u32 4294901760, %v9923_v16  ;;  %v10131_v61 = vpop.permute.xlu0 %203 }
 0x176   :  { %2045 = vmatpush.msrb.mxu0 %v9876_v56  ;;  %2142 = vmatpush.msrb.mxu2 %v1959_v58  ;;  %v13582_v58 = vld [vmem:[#allocation7_spill] sm:$0xff] }
 0x177   :  { %2083 = vmatpush.msrb.mxu1 %v9780_v19  ;;  %2197 = vmatpush.msrb.mxu3 %v9831_v10  ;;  %v13578_v19 = vand.u32 4294901760, %v9910_v43 }
 0x178   :  { %2048 = vmatpush.msrb.mxu0 %v9898_v29  ;;  %2146 = vmatpush.msrb.mxu2 %v13576_v44 }
 0x179   :  { %2085 = vmatpush.msrb.mxu1 %v9791_v28  ;;  %2199 = vmatpush.msrb.mxu3 %v9843_v22  ;;  %v13580_v28 = vld [vmem:[#allocation24_spill] sm:$0xff]  ;;  %v10135_v7 = vpop.permute.xlu2 %734 }
 0x17a   :  { %2051 = vmatpush.msrb.mxu0 %v9910_v43  ;;  %2150 = vmatpush.msrb.mxu2 %v13577_v55 }
 0x17b   :  { %2087 = vmatpush.msrb.mxu1 %v9804_v24  ;;  %2201 = vmatpush.msrb.mxu3 %v9872_v50  ;;  %v741_v24 = vsel %vm736_vm1, %v13580_v28, %v9993_v3  ;;  %v10150_v43 = vpop.permute.xlu1 %687 }
 0x17c   :  { %2054 = vmatpush.msrb.mxu0 %v9923_v16  ;;  %2154 = vmatpush.msrb.mxu2 %v13578_v19  ;;  %v10148_v29 = vand.u32 4294901760, %v741_v24  ;;  %v10239_v19 = vand.u32 4294901760, %v365_v59 }
 0x17d   :  { %2089 = vmatpush.msrb.mxu1 %v9831_v10  ;;  %2203 = vmatpush.msrb.mxu3 %v9880_v21  ;;  %v13581_v10 = vld [vmem:[#allocation9_spill] sm:$0xff]  ;;  %v10190_v20 = vpop.permute.xlu0 %640 }
 0x17e   :  { %2057 = vmatpush.msrb.mxu0 %v9948_v46  ;;  %2158 = vmatpush.msrb.mxu2 %v13579_v31  ;;  %v694_v56 = vsel %vm689_vm2, %v13581_v10, %v10011_v41  ;;  %v13583_v46 = vld [vmem:[#allocation12_spill] sm:$0xff]  ;;  %v10284_v13 = vsub.f32 %v365_v59, %v10239_v19 }
 0x17f   :  { %2091 = vmatpush.msrb.mxu1 %v9843_v22  ;;  %2205 = vmatpush.msrb.mxu3 %v9889_v53  ;;  %v647_v22 = vsel %vm642_vm0, %v13582_v58, %v10042_v40 }
 0x180   :  { %2060 = vmatpush.msrb.mxu0 %v9963_v48  ;;  %2162 = vmatpush.msrb.mxu2 %v1989_v27  ;;  %v10161_v16 = vand.u32 4294901760, %v647_v22  ;;  %v600_v27 = vsel %vm595_vm3, %v13583_v46, %v10039_v63  ;;  %v13584_v48 = vld [vmem:[#allocation17_spill] sm:$0xff] }
 0x181   :  { %2093 = vmatpush.msrb.mxu1 %v9872_v50  ;;  %2207 = vmatpush.msrb.mxu3 %v9919_v35  ;;  %v10157_v50 = vand.u32 4294901760, %v694_v56  ;;  %v10185_v32 = vand.u32 4294901760, %v600_v27  ;;  %v10200_v6 = vpop.permute.xlu2 %156 }
 0x182   :  { %2063 = vmatpush.msrb.mxu0 %v9978_v12  ;;  %2166 = vmatpush.msrb.mxu2 %v1995_v34  ;;  %v553_v34 = vsel %vm548_vm4, %v13584_v48, %v10050_v49 }
 0x183   :  { %2095 = vmatpush.msrb.mxu1 %v9880_v21  ;;  %2209 = vmatpush.msrb.mxu3 %v9933_v42  ;;  %v10170_v21 = vsub.f32 %v741_v24, %v10148_v29  ;;  %v10198_v17 = vand.u32 4294901760, %v553_v34  ;;  %v10223_v18 = vsub.f32 %v600_v27, %v10185_v32  ;;  %v13589_v24 = vld [vmem:[#allocation13_spill] sm:$0xff] }
 0x184   :  { %1917 = vmatmul.f32.vlgmr.msra.gmra.mxu2 %v13565_v15  ;;  %2066 = vmatpush.msrb.mxu0 %v9998_v26  ;;  %v318_v10 = vsel %vm313_vm9, %v13589_v24, %v10097_v45  ;;  %v742_v24 = vsel %vm736_vm1, %v9993_v3, %v10135_v7  ;;  %v212_v3 = vsel %vm207_vm11, %v9878_v0, %v10131_v61 }
 0x185   :  { %2097 = vmatpush.msrb.mxu1 %v9889_v53  ;;  %2170 = vmatpush.msrb.mxu2 %v2001_v39  ;;  %v13585_v53 = vld [vmem:[#allocation14_spill] sm:$0xff]  ;;  %v10183_v39 = vsub.f32 %v694_v56, %v10157_v50  ;;  %v13421_v5 = vand.u32 4294901760, %v10170_v21  ;;  %v10230_v44 = vsub.f32 %v553_v34, %v10198_v17  ;;  %v13417_v58 = vand.u32 4294901760, %v10223_v18 }
 0x186   :  { %2211 = vmatpush.msrb.mxu3 %v9953_v54  ;;  %2069 = vmatpush.msrb.mxu0 %v10009_v4  ;;  %v506_v12 = vsel %vm501_vm5, %v13585_v53, %v10071_v51  ;;  %v412_v4 = vsel %vm407_vm7, %v13588_v11, %v10078_v57 }
 0x187   :  { %2018 = vmatmul.f32.vlgmr.msra.gmra.mxu3 %v13568_v62  ;;  %2099 = vmatpush.msrb.mxu1 %v9919_v35  ;;  %v10195_v35 = vsub.f32 %v647_v22, %v10161_v16  ;;  %v10205_v26 = vand.u32 4294901760, %v506_v12  ;;  %v13420_v60 = vand.u32 4294901760, %v10183_v39  ;;  %v10241_v31 = vand.u32 4294901760, %v412_v4  ;;  %v277_v22 = vld [vmem:[%s13333_s0 + $0x28] sm:$0xff] }
 0x188   :  { %2174 = vmatpush.msrb.mxu2 %v2007_v47  ;;  %2213 = vmatpush.msrb.mxu3 %v9972_v38  ;;  %v13586_v47 = vld [vmem:[#allocation16_spill] sm:$0xff]  ;;  %v13419_v34 = vand.u32 4294901760, %v10230_v44 }
 0x189   :  { %2222 = vmatpush.msra.mxu0 %v10148_v29  ;;  %2101 = vmatpush.msrb.mxu1 %v9933_v42  ;;  %v459_v42 = vsel %vm454_vm6, %v13586_v47, %v10066_v8  ;;  %v13418_v1 = vand.u32 4294901760, %v10195_v35  ;;  %v10246_v28 = vsub.f32 %v506_v12, %v10205_v26  ;;  %v2271_v56 = vsub.f32 %v10183_v39, %v13420_v60  ;;  %v10265_v46 = vpop.permute.xlu2 %593  ;;  %v10278_v47 = vpop.permute.xlu0 %62 }
 0x18a   :  { %2178 = vmatpush.msrb.mxu2 %v2013_v25  ;;  %2215 = vmatpush.msrb.mxu3 %v9988_v9  ;;  %v10218_v25 = vpop.permute.xlu1 %109  ;;  %v10232_v55 = vand.u32 4294901760, %v459_v42  ;;  %v10274_v53 = vsub.f32 %v412_v4, %v10241_v31  ;;  %v10276_v12 = vand.u32 4294901760, %v318_v10  ;;  %v2283_v4 = vsub.f32 %v10223_v18, %v13417_v58 }
 0x18b   :  { %2224 = vmatpush.msra.mxu0 %v10157_v50  ;;  %2103 = vmatpush.msrb.mxu1 %v9953_v54  ;;  %v2265_v54 = vsub.f32 %v10170_v21, %v13421_v5  ;;  %v2272_v11 = vand.u32 4294901760, %v2271_v56  ;;  %v10327_v60 = vand.u32 4294901760, %v742_v24  ;;  %v118_v0 = vsel %vm113_vm13, %v9925_v33, %v10218_v25 }
 0x18c   :  { %2365 = vmatpush.msra.mxu2 %v10170_v21  ;;  %2418 = vmatpush.msra.mxu3 %v10148_v29  ;;  %v10270_v48 = vsub.f32 %v459_v42, %v10232_v55  ;;  %13590 = vst [vmem:[#allocation20_spill] sm:$0xff] %v10276_v12  ;;  %v259_v42 = vsel %vm254_vm10, %v9819_v23, %v10108_v30  ;;  %v13426_v7 = vand.u32 4294901760, %v10274_v53  ;;  %v10378_v33 = vand.u32 4294901760, %v118_v0 }
 0x18d   :  { %2180 = vmatmul.f32.vlgmr.msrb.gmra.mxu2 %v13568_v62  ;;  %2226 = vmatpush.msra.mxu0 %v10161_v16  ;;  %v2266_v27 = vand.u32 4294901760, %v2265_v54  ;;  %v10293_v54 = vand.u32 4294901760, %v277_v22  ;;  %v165_v23 = vsel %vm160_vm12, %v9900_v52, %v10200_v6  ;;  %v10316_v52 = vsub.f32 %v318_v10, %v10276_v12 }
 0x18e   :  { %2368 = vmatpush.msra.mxu2 %v10183_v39  ;;  %2420 = vmatpush.msra.mxu3 %v10157_v50  ;;  %v13423_v58 = vand.u32 4294901760, %v10270_v48  ;;  %v10329_v5 = vand.u32 4294901760, %v165_v23  ;;  %v695_v10 = vsel %vm689_vm2, %v10011_v41, %v10150_v43  ;;  %v2307_v41 = vsub.f32 %v10274_v53, %v13426_v7  ;;  %13597 = vst [vmem:[#allocation24_spill] sm:$0xff] %v10378_v33 }
 0x18f   :  { %2105 = vmatpush.msrb.mxu1 %v9972_v38  ;;  %2072 = vmatmul.f32.vlgmr.msrb.gmra.mxu0 %v13564_v37  ;;  %v2277_v38 = vsub.f32 %v10195_v35, %v13418_v1  ;;  %13591 = vst [vmem:[#allocation8_spill] sm:$0xff] %v10293_v54  ;;  %v10308_v1 = vand.u32 4294901760, %v259_v42  ;;  %v13428_v43 = vand.u32 4294901760, %v10316_v52  ;;  %v648_v7 = vsel %vm642_vm0, %v10042_v40, %v10190_v20 }
 0x190   :  { %2217 = vmatmul.f32.vlgmr.msrb.gmra.mxu3 %v13568_v62  ;;  %2228 = vmatpush.msra.mxu0 %v10185_v32  ;;  %13593 = vst [vmem:[#allocation15_spill] sm:$0xff] %v10329_v5  ;;  %v10360_v62 = vsub.f32 %v742_v24, %v10327_v60  ;;  %v601_v24 = vsel %vm595_vm3, %v10039_v63, %v10265_v46 }
 0x191   :  { %2371 = vmatpush.msra.mxu2 %v10195_v35  ;;  %2422 = vmatpush.msra.mxu3 %v10161_v16  ;;  %v2278_v59 = vand.u32 4294901760, %v2277_v38  ;;  %13592 = vst [vmem:[#allocation11_spill] sm:$0xff] %v10308_v1  ;;  %v2284_v38 = vand.u32 4294901760, %v2283_v4  ;;  %v10336_v4 = vand.u32 4294901760, %v212_v3  ;;  %v2319_v20 = vsub.f32 %v10316_v52, %v13428_v43 }
 0x192   :  { %2107 = vmatpush.msrb.mxu1 %v9988_v9  ;;  %2230 = vmatpush.msra.mxu0 %v10198_v17  ;;  %v13422_v9 = vand.u32 4294901760, %v10246_v28  ;;  %v547_v56 = vpop.permute.xlu1 %546  ;;  %13596 = vst [vmem:[#allocation19_spill] sm:$0xff] %v10360_v62  ;;  %v10387_v63 = vsub.f32 %v165_v23, %v10329_v5  ;;  %v10400_v37 = vand.u32 4294901760, %v601_v24 }
 0x193   :  { %2111 = vmatmul.f32.vlgmr.msrb.gmra.mxu1 %v13566_v2  ;;  %2374 = vmatpush.msra.mxu2 %v10223_v18  ;;  %13594 = vst [vmem:[#allocation10_spill] sm:$0xff] %v10336_v4  ;;  %v10362_v2 = vand.u32 4294901760, %v695_v10 }
 0x194   :  { %2267 = vmatpush.msra.mxu1 %v2266_v27  ;;  %2424 = vmatpush.msra.mxu3 %v10185_v32  ;;  %v2289_v27 = vsub.f32 %v10230_v44, %v13419_v34  ;;  %v10324_v34 = vsub.f32 %v277_v22, %v10293_v54 }
 0x195   :  { %2232 = vmatpush.msra.mxu0 %v10205_v26  ;;  %2377 = vmatpush.msra.mxu2 %v10230_v44  ;;  %v10403_v23 = vsub.f32 %v695_v10, %v10362_v2 }
 0x196   :  { %2273 = vmatpush.msra.mxu1 %v2272_v11  ;;  %2426 = vmatpush.msra.mxu3 %v10198_v17  ;;  %v2295_v11 = vsub.f32 %v10246_v28, %v13422_v9  ;;  %v2290_v22 = vand.u32 4294901760, %v2289_v27  ;;  %v10343_v9 = vsub.f32 %v259_v42, %v10308_v1  ;;  %v500_v27 = vpop.permute.xlu2 %499 }
 0x197   :  { %2234 = vmatpush.msra.mxu0 %v10232_v55  ;;  %2380 = vmatpush.msra.mxu2 %v10246_v28  ;;  %v507_v46 = vsel %vm501_vm5, %v10071_v51, %v500_v27  ;;  %v2320_v51 = vand.u32 4294901760, %v2319_v20 }
 0x198   :  { %2279 = vmatpush.msra.mxu1 %v2278_v59  ;;  %2428 = vmatpush.msra.mxu3 %v10205_v26  ;;  %v2301_v59 = vsub.f32 %v10270_v48, %v13423_v58  ;;  %v2296_v42 = vand.u32 4294901760, %v2295_v11  ;;  %v453_v11 = vpop.permute.xlu0 %452 }
 0x199   :  { %2236 = vmatpush.msra.mxu0 %v10241_v31  ;;  %2383 = vmatpush.msra.mxu2 %v10270_v48 }
 0x19a   :  { %2285 = vmatpush.msra.mxu1 %v2284_v38  ;;  %2430 = vmatpush.msra.mxu3 %v10232_v55  ;;  %v13595_v38 = vand.u32 4294901760, %v10284_v13  ;;  %v2302_v40 = vand.u32 4294901760, %v2301_v59  ;;  %v406_v15 = vpop.permute.xlu1 %405 }
 0x19b   :  { %2238 = vmatpush.msra.mxu0 %v10239_v19  ;;  %2386 = vmatpush.msra.mxu2 %v10274_v53 }
 0x19c   :  { %2291 = vmatpush.msra.mxu1 %v2290_v22  ;;  %2432 = vmatpush.msra.mxu3 %v10241_v31  ;;  %v2313_v58 = vsub.f32 %v10284_v13, %v13595_v38  ;;  %v71_v22 = vsel %vm66_vm14, %v9957_v36, %v10278_v47  ;;  %v10376_v38 = vsub.f32 %v212_v3, %v10336_v4  ;;  %v2308_v36 = vand.u32 4294901760, %v2307_v41 }
 0x19d   :  { %2240 = vmatpush.msra.mxu0 %v10276_v12  ;;  %2389 = vmatpush.msra.mxu2 %v10284_v13  ;;  %v10390_v3 = vand.u32 4294901760, %v648_v7  ;;  %v10394_v59 = vand.u32 4294901760, %v71_v22  ;;  %v13599_v41 = vand.u32 4294901760, %v10324_v34 }
 0x19e   :  { %2297 = vmatpush.msra.mxu1 %v2296_v42  ;;  %2434 = vmatpush.msra.mxu3 %v10239_v19  ;;  %v554_v42 = vsel %vm548_vm4, %v10050_v49, %v547_v56  ;;  %v10409_v56 = vsub.f32 %v118_v0, %v10378_v33  ;;  %v13600_v49 = vand.u32 4294901760, %v10343_v9 }
 0x19f   :  { %2242 = vmatpush.msra.mxu0 %v10293_v54  ;;  %2392 = vmatpush.msra.mxu2 %v10316_v52  ;;  %13598 = vst [vmem:[#allocation9_spill] sm:$0xff] %v10394_v59  ;;  %v2325_v43 = vsub.f32 %v10324_v34, %v13599_v41  ;;  %v10415_v10 = vand.u32 4294901760, %v554_v42  ;;  %v10431_v41 = vsub.f32 %v601_v24, %v10400_v37 }
 0x1a0   :  { %2303 = vmatpush.msra.mxu1 %v2302_v40  ;;  %2436 = vmatpush.msra.mxu3 %v10276_v12  ;;  %v2314_v40 = vand.u32 4294901760, %v2313_v58  ;;  %v2331_v0 = vsub.f32 %v10343_v9, %v13600_v49  ;;  %v10427_v58 = vsub.f32 %v71_v22, %v10394_v59  ;;  %v460_v12 = vsel %vm454_vm6, %v10066_v8, %v453_v11  ;;  %v359_v22 = vpop.permute.xlu2 %358 }
 0x1a1   :  { %2244 = vmatpush.msra.mxu0 %v10308_v1  ;;  %2395 = vmatpush.msra.mxu2 %v10324_v34  ;;  %v2326_v27 = vand.u32 4294901760, %v2325_v43  ;;  %v10438_v49 = vand.u32 4294901760, %v507_v46  ;;  %v13601_v43 = vand.u32 4294901760, %v10376_v38  ;;  %v13602_v11 = vand.u32 4294901760, %v10360_v62 }
 0x1a2   :  { %2309 = vmatpush.msra.mxu1 %v2308_v36  ;;  %2438 = vmatpush.msra.mxu3 %v10293_v54  ;;  %v10424_v54 = vsub.f32 %v648_v7, %v10390_v3  ;;  %v10451_v7 = vsub.f32 %v554_v42, %v10415_v10  ;;  %v312_v36 = vpop.permute.xlu0 %311  ;;  %v366_v8 = vsel %vm360_vm8, %v10101_v14, %v359_v22  ;;  %v13605_v22 = vand.u32 4294901760, %v10409_v56 }
 0x1a3   :  { %2246 = vmatpush.msra.mxu0 %v10336_v4  ;;  %2398 = vmatpush.msra.mxu2 %v10343_v9  ;;  %v2337_v24 = vsub.f32 %v10376_v38, %v13601_v43  ;;  %v2606_v20 = vsub.f32 %v10360_v62, %v13602_v11  ;;  %v2332_v43 = vand.u32 4294901760, %v2331_v0  ;;  %v10474_v0 = vsub.f32 %v507_v46, %v10438_v49  ;;  %v253_v11 = vpop.permute.xlu1 %252 }
 0x1a4   :  { %2315 = vmatpush.msra.mxu1 %v2314_v40  ;;  %2440 = vmatpush.msra.mxu3 %v10308_v1  ;;  %v413_v40 = vsel %vm407_vm7, %v10078_v57, %v406_v15  ;;  %v13603_v15 = vand.u32 4294901760, %v10387_v63  ;;  %v2349_v42 = vsub.f32 %v10409_v56, %v13605_v22  ;;  %v319_v62 = vsel %vm313_vm9, %v10097_v45, %v312_v36 }
 0x1a5   :  { %2248 = vmatpush.msra.mxu0 %v10329_v5  ;;  %2401 = vmatpush.msra.mxu2 %v10376_v38  ;;  %v2338_v14 = vand.u32 4294901760, %v2337_v24  ;;  %v13606_v1 = vand.u32 4294901760, %v10170_v21  ;;  %v278_v24 = vld [vmem:[%s13333_s0 + $0x30] sm:$0xff]  ;;  %v13607_v45 = vand.u32 4294901760, %v10424_v54 }
 0x1a6   :  { %2321 = vmatpush.msra.mxu1 %v2320_v51  ;;  %2442 = vmatpush.msra.mxu3 %v10336_v4  ;;  %v2343_v57 = vsub.f32 %v10387_v63, %v13603_v15  ;;  %v10458_v51 = vand.u32 4294901760, %v460_v12  ;;  %v10465_v4 = vand.u32 4294901760, %v413_v40  ;;  %v13604_v15 = vand.u32 4294901760, %v10403_v23 }
 0x1a7   :  { %2250 = vmatpush.msra.mxu0 %v10378_v33  ;;  %2404 = vmatpush.msra.mxu2 %v10387_v63  ;;  %v2618_v21 = vsub.f32 %v10424_v54, %v13607_v45  ;;  %v2350_v45 = vand.u32 4294901760, %v2349_v42 }
 0x1a8   :  { %2327 = vmatpush.msra.mxu1 %v2326_v27  ;;  %2444 = vmatpush.msra.mxu3 %v10329_v5  ;;  %v2612_v27 = vsub.f32 %v10403_v23, %v13604_v15  ;;  %v2607_v15 = vand.u32 4294901760, %v2606_v20  ;;  %v2344_v46 = vand.u32 4294901760, %v2343_v57  ;;  %v10492_v22 = vsub.f32 %v460_v12, %v10458_v51 }
 0x1a9   :  { %2252 = vmatpush.msra.mxu0 %v10394_v59  ;;  %2407 = vmatpush.msra.mxu2 %v10409_v56  ;;  %v10502_v20 = vsub.f32 %v413_v40, %v10465_v4  ;;  %v13609_v57 = vand.u32 4294901760, %v10183_v39  ;;  %v10513_v40 = vand.u32 4294901760, %v278_v24  ;;  %v260_v39 = vsel %vm254_vm10, %v10108_v30, %v253_v11 }
 0x1aa   :  { %2333 = vmatpush.msra.mxu1 %v2332_v43  ;;  %2446 = vmatpush.msra.mxu3 %v10378_v33  ;;  %v10489_v43 = vand.u32 4294901760, %v366_v8  ;;  %v2613_v12 = vand.u32 4294901760, %v2612_v27  ;;  %v10510_v33 = vand.u32 4294901760, %v319_v62  ;;  %v13612_v27 = vand.u32 4294901760, %v10451_v7 }
 0x1ab   :  { %2459 = vmatpush.msrb.mxu0 %v13606_v1  ;;  %2410 = vmatpush.msra.mxu2 %v10427_v58  ;;  %v13608_v1 = vand.u32 4294901760, %v10427_v58  ;;  %v2619_v42 = vand.u32 4294901760, %v2618_v21  ;;  %v13613_v11 = vand.u32 4294901760, %v10223_v18  ;;  %v13614_v21 = vand.u32 4294901760, %v10474_v0 }
 0x1ac   :  { %2339 = vmatpush.msra.mxu1 %v2338_v14  ;;  %2448 = vmatpush.msra.mxu3 %v10394_v59  ;;  %v13610_v14 = vand.u32 4294901760, %v10431_v41  ;;  %v206_v59 = vpop.permute.xlu2 %205  ;;  %v13615_v18 = vand.u32 4294901760, %v10230_v44  ;;  %v13616_v44 = vand.u32 4294901760, %v10246_v28 }
 0x1ad   :  { %v2355_v36 = vsub.f32 %v10427_v58, %v13608_v1  ;;  %2463 = vmatpush.msrb.mxu0 %v13609_v57  ;;  %2563 = vmatpush.msrb.mxu2 %v10327_v60  ;;  %v13611_v57 = vand.u32 4294901760, %v10195_v35  ;;  %v2641_v1 = vand.u32 4294901760, %v10492_v22  ;;  %v213_v30 = vsel %vm207_vm11, %v10131_v61, %v206_v59  ;;  %v159_v35 = vpop.permute.xlu0 %158 }
 0x1ae   :  { %v2624_v5 = vsub.f32 %v10431_v41, %v13610_v14  ;;  %2608 = vmatpush.msrb.mxu3 %v2607_v15  ;;  %2345 = vmatpush.msra.mxu1 %v2344_v46  ;;  %v2630_v14 = vsub.f32 %v10451_v7, %v13612_v27  ;;  %v10524_v15 = vsub.f32 %v366_v8, %v10489_v43  ;;  %v2647_v27 = vand.u32 4294901760, %v10502_v20 }
 0x1af   :  { %2467 = vmatpush.msrb.mxu0 %v13611_v57  ;;  %2565 = vmatpush.msrb.mxu2 %v10362_v2  ;;  %v2356_v46 = vand.u32 4294901760, %v2355_v36  ;;  %v10533_v8 = vand.u32 4294901760, %v260_v39  ;;  %v2636_v61 = vsub.f32 %v10474_v0, %v13614_v21  ;;  %v10542_v59 = vsub.f32 %v278_v24, %v10513_v40 }
 0x1b0   :  { %2614 = vmatpush.msrb.mxu3 %v2613_v12  ;;  %2351 = vmatpush.msra.mxu1 %v2350_v45  ;;  %v2625_v57 = vand.u32 4294901760, %v2624_v5  ;;  %v10536_v12 = vsub.f32 %v319_v62, %v10510_v33  ;;  %v2631_v5 = vand.u32 4294901760, %v2630_v14  ;;  %v10547_v36 = vand.u32 4294901760, %v213_v30  ;;  %v112_v45 = vpop.permute.xlu1 %111 }
 0x1b1   :  { %2471 = vmatpush.msrb.mxu0 %v13613_v11  ;;  %2567 = vmatpush.msrb.mxu2 %v10390_v3  ;;  %v166_v62 = vsel %vm160_vm12, %v10200_v6, %v159_v35  ;;  %v2642_v24 = vsub.f32 %v10492_v22, %v2641_v1  ;;  %v10563_v6 = vsub.f32 %v260_v39, %v10533_v8  ;;  %v2665_v11 = vand.u32 4294901760, %v10542_v59 }
 0x1b2   :  { %2620 = vmatpush.msrb.mxu3 %v2619_v42  ;;  %2357 = vmatpush.msra.mxu1 %v2356_v46  ;;  %v2653_v42 = vand.u32 4294901760, %v10524_v15  ;;  %v2637_v46 = vand.u32 4294901760, %v2636_v61  ;;  %v2659_v35 = vand.u32 4294901760, %v10536_v12  ;;  %v119_v28 = vsel %vm113_vm13, %v10218_v25, %v112_v45 }
 0x1b3   :  { %2475 = vmatpush.msrb.mxu0 %v13615_v18  ;;  %2569 = vmatpush.msrb.mxu2 %v10400_v37  ;;  %v10576_v39 = vsub.f32 %v213_v30, %v10547_v36  ;;  %v2643_v21 = vand.u32 4294901760, %v2642_v24  ;;  %v13618_v18 = vand.u32 4294901760, %v10274_v53 }
 0x1b4   :  { %2526 = vmatpush.msrb.mxu1 %v10148_v29  ;;  %2626 = vmatpush.msrb.mxu3 %v2625_v57  ;;  %v2648_v29 = vsub.f32 %v10502_v20, %v2647_v27  ;;  %v65_v14 = vpop.permute.xlu2 %64  ;;  %v13617_v57 = vand.u32 4294901760, %v10270_v48  ;;  %v2654_v61 = vsub.f32 %v10524_v15, %v2653_v42  ;;  %v10587_v48 = vand.u32 4294901760, %v119_v28 }
 0x1b5   :  { %2479 = vmatpush.msrb.mxu0 %v13616_v44  ;;  %2571 = vmatpush.msrb.mxu2 %v10415_v10  ;;  %v72_v25 = vsel %vm66_vm14, %v10278_v47, %v65_v14  ;;  %v2660_v30 = vsub.f32 %v10536_v12, %v2659_v35  ;;  %v2671_v47 = vand.u32 4294901760, %v10563_v6  ;;  %v2677_v44 = vand.u32 4294901760, %v10576_v39 }
 0x1b6   :  { %2528 = vmatpush.msrb.mxu1 %v10157_v50  ;;  %2632 = vmatpush.msrb.mxu3 %v2631_v5  ;;  %v10570_v50 = vand.u32 4294901760, %v166_v62  ;;  %v2666_v5 = vsub.f32 %v10542_v59, %v2665_v11  ;;  %v10603_v45 = vand.u32 4294901760, %v72_v25  ;;  %v2655_v24 = vand.u32 4294901760, %v2654_v61 }
 0x1b7   :  { %2483 = vmatpush.msrb.mxu0 %v13617_v57  ;;  %2573 = vmatpush.msrb.mxu2 %v10438_v49  ;;  %v2672_v14 = vsub.f32 %v10563_v6, %v2671_v47  ;;  %v13622_v57 = vand.u32 4294901760, %v10343_v9 }
 0x1b8   :  { %2530 = vmatpush.msrb.mxu1 %v10161_v16  ;;  %2638 = vmatpush.msrb.mxu3 %v2637_v46  ;;  %v2649_v16 = vand.u32 4294901760, %v2648_v29  ;;  %v10598_v53 = vsub.f32 %v166_v62, %v10570_v50  ;;  %v13620_v29 = vand.u32 4294901760, %v10316_v52  ;;  %v10611_v62 = vsub.f32 %v119_v28, %v10587_v48 }
 0x1b9   :  { %2487 = vmatpush.msrb.mxu0 %v13618_v18  ;;  %2575 = vmatpush.msrb.mxu2 %v10458_v51  ;;  %v13621_v46 = vand.u32 4294901760, %v10324_v34  ;;  %v2678_v28 = vsub.f32 %v10576_v39, %v2677_v44  ;;  %v13625_v18 = vld [vmem:[#allocation20_spill] sm:$0xff] }
 0x1ba   :  { %2532 = vmatpush.msrb.mxu1 %v10185_v32  ;;  %2644 = vmatpush.msrb.mxu3 %v2643_v21  ;;  %v13619_v32 = vand.u32 4294901760, %v10284_v13  ;;  %v2667_v13 = vand.u32 4294901760, %v2666_v5  ;;  %v2683_v52 = vand.u32 4294901760, %v10598_v53  ;;  %v2689_v34 = vand.u32 4294901760, %v10611_v62  ;;  %v13628_v5 = vld [vmem:[#allocation8_spill] sm:$0xff] }
 0x1bb   :  { %2577 = vmatpush.msrb.mxu2 %v10465_v4  ;;  %v13623_v21 = vand.u32 4294901760, %v10376_v38  ;;  %v2679_v9 = vand.u32 4294901760, %v2678_v28  ;;  %v13626_v38 = vld [vmem:[#allocation21_spill] sm:$0xff]  ;;  %v13635_v28 = vld [vmem:[#allocation10_spill] sm:$0xff] }
 0x1bc   :  { %2491 = vmatpush.msrb.mxu0 %v13619_v32  ;;  %2534 = vmatpush.msrb.mxu1 %v10198_v17  ;;  %v2661_v17 = vand.u32 4294901760, %v2660_v30  ;;  %v2684_v61 = vsub.f32 %v10598_v53, %v2683_v52  ;;  %v13629_v32 = vld [vmem:[#allocation23_spill] sm:$0xff] }
 0x1bd   :  { %2650 = vmatpush.msrb.mxu3 %v2649_v16  ;;  %2579 = vmatpush.msrb.mxu2 %v10489_v43  ;;  %v13627_v16 = vand.u32 4294901760, %v10409_v56  ;;  %v13632_v56 = vld [vmem:[#allocation11_spill] sm:$0xff] }
 0x1be   :  { %2495 = vmatpush.msrb.mxu0 %v13620_v29  ;;  %2536 = vmatpush.msrb.mxu1 %v10205_v26  ;;  %v10622_v26 = vsub.f32 %v72_v25, %v10603_v45  ;;  %v13624_v25 = vand.u32 4294901760, %v10387_v63  ;;  %v2685_v30 = vand.u32 4294901760, %v2684_v61  ;;  %v13631_v29 = vand.u32 4294901760, %v10427_v58 }
 0x1bf   :  { %2656 = vmatpush.msrb.mxu3 %v2655_v24  ;;  %2581 = vmatpush.msrb.mxu2 %v10510_v33  ;;  %v13630_v24 = vld [vmem:[#allocation22_spill] sm:$0xff]  ;;  %v13640_v61 = vand.u32 4294901760, %v10424_v54 }
 0x1c0   :  { %2499 = vmatpush.msrb.mxu0 %v13621_v46  ;;  %2538 = vmatpush.msrb.mxu1 %v10232_v55  ;;  %v2673_v55 = vand.u32 4294901760, %v2672_v14  ;;  %v13634_v46 = vld [vmem:[#allocation19_spill] sm:$0xff] }
 0x1c1   :  { %2662 = vmatpush.msrb.mxu3 %v2661_v17  ;;  %2583 = vmatpush.msrb.mxu2 %v10513_v40  ;;  %v13636_v58 = vand.u32 4294901760, %v13634_v46 }
 0x1c2   :  { %2503 = vmatpush.msrb.mxu0 %v13622_v57  ;;  %2540 = vmatpush.msrb.mxu1 %v10241_v31  ;;  %v2695_v31 = vand.u32 4294901760, %v10622_v26  ;;  %v13637_v57 = vld [vmem:[#allocation15_spill] sm:$0xff] }
 0x1c3   :  { %2668 = vmatpush.msrb.mxu3 %v2667_v13  ;;  %2585 = vmatpush.msrb.mxu2 %v10533_v8  ;;  %v13633_v13 = vld [vmem:[#allocation18_spill] sm:$0xff] }
 0x1c4   :  { %2507 = vmatpush.msrb.mxu0 %v13623_v21  ;;  %2542 = vmatpush.msrb.mxu1 %v10239_v19  ;;  %v2690_v19 = vsub.f32 %v10611_v62, %v2689_v34  ;;  %v2696_v63 = vsub.f32 %v10622_v26, %v2695_v31  ;;  %v13639_v21 = vld [vmem:[#allocation24_spill] sm:$0xff] }
 0x1c5   :  { %2674 = vmatpush.msrb.mxu3 %v2673_v55  ;;  %2587 = vmatpush.msrb.mxu2 %v10547_v36  ;;  %v13638_v55 = vand.u32 4294901760, %v10403_v23 }
 0x1c6   :  { %2511 = vmatpush.msrb.mxu0 %v13624_v25  ;;  %2544 = vmatpush.msrb.mxu1 %v13625_v18  ;;  %v2691_v17 = vand.u32 4294901760, %v2690_v19  ;;  %v2697_v14 = vand.u32 4294901760, %v2696_v63  ;;  %v13642_v25 = vand.u32 4294901760, %v10431_v41 }
 0x1c7   :  { %2680 = vmatpush.msrb.mxu3 %v2679_v9  ;;  %2413 = vmatmul.f32.vlgmr.msra.gmra.mxu2 %v13626_v38  ;;  %v13641_v9 = vld [vmem:[#allocation9_spill] sm:$0xff] }
 0x1c8   :  { %2515 = vmatpush.msrb.mxu0 %v13627_v16  ;;  %2546 = vmatpush.msrb.mxu1 %v13628_v5 }
 0x1c9   :  { %2589 = vmatpush.msrb.mxu2 %v10570_v50  ;;  %2686 = vmatpush.msrb.mxu3 %v2685_v30 }
 0x1ca   :  { %2258 = vmatmul.f32.vlgmr.msra.gmra.mxu0 %v13629_v32  ;;  %2452 = vmatmul.f32.vlgmr.msra.gmra.mxu3 %v13630_v24 }
 0x1cb   :  { %2519 = vmatpush.msrb.mxu0 %v13631_v29  ;;  %2548 = vmatpush.msrb.mxu1 %v13632_v56 }
 0x1cc   :  { %2591 = vmatpush.msrb.mxu2 %v10587_v48  ;;  %2692 = vmatpush.msrb.mxu3 %v2691_v17 }
 0x1cd   :  { %2359 = vmatmul.f32.vlgmr.msra.gmra.mxu1 %v13633_v13  ;;  %2706 = vmatpush.msra.mxu0 %v13634_v46 }
 0x1ce   :  { %2550 = vmatpush.msrb.mxu1 %v13635_v28  ;;  %2593 = vmatpush.msrb.mxu2 %v10603_v45 }
 0x1cf   :  { %2698 = vmatpush.msrb.mxu3 %v2697_v14  ;;  %2709 = vmatpush.msra.mxu0 %v10403_v23  ;;  %v13644_v23 = vand.u32 4294901760, %v10474_v0  ;;  %v855_v14 = vpop.permute.xlu0 %854 }
 0x1d0   :  { %2800 = vmatpush.msra.mxu2 %v13636_v58  ;;  %2552 = vmatpush.msrb.mxu1 %v13637_v57 }
 0x1d1   :  { %2867 = vmatpush.msra.mxu3 %v10327_v60  ;;  %2712 = vmatpush.msra.mxu0 %v10424_v54  ;;  %v13643_v54 = vand.u32 4294901760, %v10451_v7 }
 0x1d2   :  { %2804 = vmatpush.msra.mxu2 %v13638_v55  ;;  %2554 = vmatpush.msrb.mxu1 %v13639_v21 }
 0x1d3   :  { %2869 = vmatpush.msra.mxu3 %v10362_v2  ;;  %2521 = vmatmul.f32.vlgmr.msrb.gmra.mxu0 %v13633_v13 }
 0x1d4   :  { %2808 = vmatpush.msra.mxu2 %v13640_v61  ;;  %2715 = vmatpush.msra.mxu0 %v10431_v41 }
 0x1d5   :  { %2871 = vmatpush.msra.mxu3 %v10390_v3  ;;  %2556 = vmatpush.msrb.mxu1 %v13641_v9 }
 0x1d6   :  { %2812 = vmatpush.msra.mxu2 %v13642_v25  ;;  %2558 = vmatmul.f32.vlgmr.msrb.gmra.mxu1 %v13633_v13 }
 0x1d7   :  { %2718 = vmatpush.msra.mxu0 %v10451_v7  ;;  %2759 = vmatpush.msra.mxu1 %v10327_v60  ;;  %v10760_v60 = vpop.f32.mrf.mxu2 }
 0x1d8   :  { %2873 = vmatpush.msra.mxu3 %v10400_v37  ;;  %2816 = vmatpush.msra.mxu2 %v13643_v54 }
 0x1d9   :  { %2721 = vmatpush.msra.mxu0 %v10474_v0  ;;  %2761 = vmatpush.msra.mxu1 %v10362_v2  ;;  %v10758_v2 = vpop.f32.mrf.mxu1 }
 0x1da   :  { %2875 = vmatpush.msra.mxu3 %v10415_v10  ;;  %2820 = vmatpush.msra.mxu2 %v13644_v23 }
 0x1db   :  { %2724 = vmatpush.msra.mxu0 %v10492_v22  ;;  %2763 = vmatpush.msra.mxu1 %v10390_v3 }
 0x1dc   :  { %2877 = vmatpush.msra.mxu3 %v10438_v49  ;;  %2824 = vmatpush.msra.mxu2 %v2641_v1 }
 0x1dd   :  { %2727 = vmatpush.msra.mxu0 %v10502_v20  ;;  %2765 = vmatpush.msra.mxu1 %v10400_v37  ;;  %v10756_v37 = vpop.f32.mrf.mxu0 }
 0x1de   :  { %2879 = vmatpush.msra.mxu3 %v10458_v51  ;;  %2828 = vmatpush.msra.mxu2 %v2647_v27  ;;  %v896_v58 = vadd.f32 %v10756_v37, %v855_v14 }
 0x1df   :  { %2730 = vmatpush.msra.mxu0 %v10524_v15  ;;  %2767 = vmatpush.msra.mxu1 %v10415_v10  ;;  %v10768_v41 = vpop.f32.mrf.mxu2 }
 0x1e0   :  { %2881 = vmatpush.msra.mxu3 %v10465_v4  ;;  %2832 = vmatpush.msra.mxu2 %v2653_v42  ;;  %v1237_v28 = vadd.f32 %v10768_v41, %v855_v14  ;;  %v997_v25 = vadd.f32 %v10758_v2, %v896_v58  ;;  %v8553_v2 = vmov 1  }
 0x1e1   :  { %2733 = vmatpush.msra.mxu0 %v10536_v12  ;;  %2769 = vmatpush.msra.mxu1 %v10438_v49  ;;  %v10766_v3 = vpop.f32.mrf.mxu1  ;;  %v2909_v12 = vld [vmem:[%s13337_s3] sm:$0xff] }
 0x1e2   :  { %2883 = vmatpush.msra.mxu3 %v10489_v43  ;;  %2599 = vmatmul.f32.vlgmr.msrb.gmra.mxu2 %v13629_v32 }
 0x1e3   :  { %2736 = vmatpush.msra.mxu0 %v10542_v59  ;;  %2771 = vmatpush.msra.mxu1 %v10458_v51 }
 0x1e4   :  { %2836 = vmatpush.msra.mxu2 %v2659_v35  ;;  %2885 = vmatpush.msra.mxu3 %v10510_v33  ;;  %v2910_v35 = vld [vmem:[%s13336_s4] sm:$0xff] }
 0x1e5   :  { %2739 = vmatpush.msra.mxu0 %v10563_v6  ;;  %2700 = vmatmul.f32.vlgmr.msrb.gmra.mxu3 %v13633_v13 }
 0x1e6   :  { %2773 = vmatpush.msra.mxu1 %v10465_v4  ;;  %2840 = vmatpush.msra.mxu2 %v2665_v11  ;;  %v10762_v4 = vpop.f32.mrf.mxu0  ;;  %v2920_v11 = vsel %vm2918_vm15, %v2909_v12, 0  ;;  %v10832_v12 = vld [vmem:[%s13335_s2] sm:$0xff] }
 0x1e7   :  { %2887 = vmatpush.msra.mxu3 %v10513_v40  ;;  %2742 = vmatpush.msra.mxu0 %v10576_v39  ;;  %v10776_v51 = vpop.f32.mrf.mxu2 }
 0x1e8   :  { %2775 = vmatpush.msra.mxu1 %v10489_v43  ;;  %2844 = vmatpush.msra.mxu2 %v2671_v47  ;;  %v2913_v43 = vld [vmem:[%s13336_s4 + $0x18] sm:$0xff] }
 0x1e9   :  { %2889 = vmatpush.msra.mxu3 %v10533_v8  ;;  %2745 = vmatpush.msra.mxu0 %v10598_v53  ;;  %v10774_v49 = vpop.f32.mrf.mxu1  ;;  %v10787_v1 = vand.u32 4294901760, %v2913_v43  ;;  %v2940_v53 = vand.u32 4294901760, %v2910_v35 }
 0x1ea   :  { %2777 = vmatpush.msra.mxu1 %v10510_v33  ;;  %2848 = vmatpush.msra.mxu2 %v2677_v44  ;;  %v10764_v33 = vpop.f32.mrf.mxu3 }
 0x1eb   :  { %2891 = vmatpush.msra.mxu3 %v10547_v36  ;;  %2748 = vmatpush.msra.mxu0 %v10611_v62  ;;  %v2964_v15 = vsub.f32 %v2913_v43, %v10787_v1 }
 0x1ec   :  { %2779 = vmatpush.msra.mxu1 %v10513_v40  ;;  %2852 = vmatpush.msra.mxu2 %v2683_v52  ;;  %v2912_v40 = vld [vmem:[%s13336_s4 + $0x10] sm:$0xff] }
 0x1ed   :  { %2893 = vmatpush.msra.mxu3 %v10570_v50  ;;  %2751 = vmatpush.msra.mxu0 %v10622_v26  ;;  %v10794_v27 = vand.u32 4294901760, %v2912_v40  ;;  %v2965_v42 = vand.u32 4294901760, %v2964_v15  ;;  %v2982_v26 = vsub.f32 %v2910_v35, %v2940_v53 }
 0x1ee   :  { %2781 = vmatpush.msra.mxu1 %v10533_v8  ;;  %2856 = vmatpush.msra.mxu2 %v2689_v34  ;;  %v10770_v10 = vpop.f32.mrf.mxu0  ;;  %v2911_v8 = vld [vmem:[%s13336_s4 + $0x8] sm:$0xff] }
 0x1ef   :  { %2895 = vmatpush.msra.mxu3 %v10587_v48  ;;  %2754 = vmatmul.f32.vlgmr.msra.gmra.mxu0 %v13626_v38  ;;  %v10803_v59 = vpop.f32.mrf.mxu2  ;;  %v2938_v6 = vand.u32 4294901760, %v2911_v8  ;;  %v2966_v39 = vsub.f32 %v2964_v15, %v2965_v42  ;;  %v2983_v16 = vand.u32 4294901760, %v2982_v26 }
 0x1f0   :  { %2783 = vmatpush.msra.mxu1 %v10547_v36  ;;  %2860 = vmatpush.msra.mxu2 %v2695_v31  ;;  %v2970_v36 = vsub.f32 %v2912_v40, %v10794_v27 }
 0x1f1   :  { %2897 = vmatpush.msra.mxu3 %v10603_v45  ;;  %2862 = vmatmul.f32.vlgmr.msra.gmra.mxu2 %v13633_v13  ;;  %v10785_v20 = vpop.f32.mrf.mxu1  ;;  %v2967_v62 = vand.u32 4294901760, %v2966_v39  ;;  %v2984_v32 = vsub.f32 %v2982_v26, %v2983_v16 }
 0x1f2   :  { %2785 = vmatpush.msra.mxu1 %v10570_v50  ;;  %2899 = vmatmul.f32.vlgmr.msra.gmra.mxu3 %v13633_v13  ;;  %v10772_v7 = vpop.f32.mrf.mxu3  ;;  %v2971_v47 = vand.u32 4294901760, %v2970_v36 }
 0x1f3   :  { %2935 = vmatpush.msrb.mxu0 %v10787_v1  ;;  %3035 = vmatpush.msrb.mxu3 %v10787_v1  ;;  %v2985_v17 = vand.u32 4294901760, %v2984_v32  ;;  %v1338_v61 = vadd.f32 %v10772_v7, %v1237_v28 }
 0x1f4   :  { %2787 = vmatpush.msra.mxu1 %v10587_v48  ;;  %3006 = vmatpush.msrb.mxu2 %v2964_v15  ;;  %v2976_v48 = vsub.f32 %v2911_v8, %v2938_v6  ;;  %v2972_v52 = vsub.f32 %v2970_v36, %v2971_v47 }
 0x1f5   :  { %2937 = vmatpush.msrb.mxu0 %v10794_v27  ;;  %3037 = vmatpush.msrb.mxu3 %v10794_v27  ;;  %v1392_v43 = vadd.f32 %v10770_v10, %v1338_v61 }
 0x1f6   :  { %2789 = vmatpush.msra.mxu1 %v10603_v45  ;;  %v10778_v0 = vpop.f32.mrf.mxu0  ;;  %3009 = vmatpush.msrb.mxu2 %v2970_v36  ;;  %v2942_v45 = vand.u32 4294901760, %v2920_v11  ;;  %v2977_v34 = vand.u32 4294901760, %v2976_v48  ;;  %v2973_v19 = vand.u32 4294901760, %v2972_v52 }
 0x1f7   :  { %2793 = vmatmul.f32.vlgmr.msra.gmra.mxu1 %v13630_v24  ;;  %2939 = vmatpush.msrb.mxu0 %v2938_v6  ;;  %v1578_v57 = vadd.f32 %v10778_v0, %v855_v14  ;;  %v1051_v0 = vadd.f32 %v10760_v60, %v997_v25 }
 0x1f8   :  { %3039 = vmatpush.msrb.mxu3 %v2938_v6  ;;  %3012 = vmatpush.msrb.mxu2 %v2976_v48  ;;  %v2943_v31 = vsub.f32 %v2920_v11, %v2942_v45  ;;  %v2978_v38 = vsub.f32 %v2976_v48, %v2977_v34 }
 0x1f9   :  { %2941 = vmatpush.msrb.mxu0 %v2940_v53  ;;  %v10815_v18 = vpop.f32.mrf.mxu1  ;;  %2968 = vmatpush.msrb.mxu1 %v2967_v62  ;;  %v1679_v54 = vadd.f32 %v10785_v20, %v1578_v57  ;;  %v1431_v20 = vadd.f32 %v10774_v49, %v1392_v43  ;;  %v1090_v60 = vadd.f32 %v10764_v33, %v1051_v0 }
 0x1fa   :  { %v10783_v22 = vpop.f32.mrf.mxu3  ;;  %3041 = vmatpush.msrb.mxu3 %v2940_v53  ;;  %3015 = vmatpush.msrb.mxu2 %v2982_v26  ;;  %v2944_v30 = vand.u32 4294901760, %v2943_v31  ;;  %v2979_v63 = vand.u32 4294901760, %v2978_v38 }
 0x1fb   :  { %3064 = vmatpush.msra.mxu0 %v2965_v42  ;;  %3018 = vmatmul.f32.vlgmr.msrb.gmra.mxu2 %v2943_v31  ;;  %v1733_v40 = vadd.f32 %v10803_v59, %v1679_v54  ;;  %v1500_v42 = vadd.f32 %v10776_v51, %v1431_v20  ;;  %v1159_v49 = vadd.f32 %v10762_v4, %v1090_v60  ;;  %v24_v51 = vld [vmem:[%s13338_s5] sm:$0x3f] }
 0x1fc   :  { %2974 = vmatpush.msrb.mxu1 %v2973_v19  ;;  %v2945_v24 = vsub.f32 %v2943_v31, %v2944_v30  ;;  %3045 = vmatmul.f32.vlgmr.msrb.gmra.mxu3 %v2944_v30  ;;  %v10857_v52 = vperm.slane %v24_v51, 1  ;;  %v10860_v31 = vperm.slane %v24_v51, 0  ;;  %v10863_v38 = vperm.slane %v24_v51, 2 }
 0x1fd   :  { %3068 = vmatpush.msra.mxu0 %v2971_v47  ;;  %8522 = vset.pattern.permute.xlu0 %v8553_v2  ;;  %v10842_v47 = vadd.f32 %v10783_v22, %v1500_v42  ;;  %v10849_v33 = vadd.f32 %v10766_v3, %v1159_v49  ;;  %v10877_v25 = vperm.slane %v24_v51, 5  ;;  %v8555_v49 = vmov 2  }
 0x1fe   :  { %v10811_v50 = vpop.f32.mrf.mxu0  ;;  %2980 = vmatpush.msrb.mxu1 %v2979_v63  ;;  %v2946_v56 = vand.u32 4294901760, %v2945_v24  ;;  %3254 = vperm.xlu0 %8522, %v10832_v12   ;;  %v10867_v63 = vperm.slane %v24_v51, 3 }
 0x1ff   :  { %3072 = vmatpush.msra.mxu0 %v2977_v34  ;;  %v2904_v26 = vmax.f32 %v10842_v47, 0.0  ;;  %v2903_v3 = vmax.f32 %v10849_v33, 0.0  ;;  %8523 = vset.pattern.permute.xlu1 %v8555_v49 }
 0x200   :  { %2986 = vmatpush.msrb.mxu1 %v2985_v17  ;;  %2947 = vmatmul.f32.vlgmr.msrb.gmra.mxu0 %v2946_v56 }
 0x201   :  { %3076 = vmatpush.msra.mxu0 %v2983_v16  ;;  %2988 = vmatmul.f32.vlgmr.msrb.gmra.mxu1 %v2942_v45 }
 0x202   :  { %v10813_v44 = vpop.f32.mrf.mxu3  ;;  %3095 = vmatpush.msra.mxu1 %v10787_v1 }
 0x203   :  { %v1772_v10 = vadd.f32 %v10813_v44, %v1733_v40 }
 0x204   :  { %3097 = vmatpush.msra.mxu1 %v10794_v27  ;;  %v8552_v27 = vmov 3  }
 0x205   :  { %8521 = vset.pattern.permute.xlu2 %v8552_v27  ;;  %v1841_v11 = vadd.f32 %v10811_v50, %v1772_v10 }
 0x206   :  { %3099 = vmatpush.msra.mxu1 %v2938_v6  ;;  %2915 = vperm.xlu2 %8521, %v10832_v12  }
 0x207   :  { %v1918_v5 = vpop.f32.mrf.mxu2  ;;  %v10855_v50 = vadd.f32 %v10815_v18, %v1841_v11 }
 0x208   :  { %v1919_v9 = vadd.f32 %v1918_v5, %v855_v14  ;;  %3101 = vmatpush.msra.mxu1 %v2940_v53  ;;  %3078 = vmatmul.f32.vlgmr.msra.gmra.mxu0 %v2942_v45  ;;  %v3197_v5 = vmul.f32 %v2904_v26, %v10857_v52 }
 0x209   :  { %3103 = vmatmul.f32.vlgmr.msra.gmra.mxu1 %v2942_v45  ;;  %v13440_v45 = vmov 0.0   ;;  %v2905_v16 = vmax.f32 %v10855_v50, 0.0 }
 0x20a   :  { %v2019_v13 = vpop.f32.mrf.mxu3  ;;  %3441 = vrot.lane.b32.xlu0 %v13440_v45, %s8548_s17 }
 0x20b   :  { %v2020_v1 = vadd.f32 %v2019_v13, %v1919_v9  ;;  %v3198_v56 = vmul.f32 %v2905_v16, %v10863_v38  ;;  %v10873_v13 = vperm.slane %v24_v51, 4 }
 0x20c   :  { %v2073_v29 = vpop.f32.mrf.mxu0 }
 0x20d   :  { %v2074_v8 = vadd.f32 %v2073_v29, %v2020_v1  ;;  %v3196_v29 = vmul.f32 %v2903_v3, %v10860_v31 }
 0x20e   :  { %3487 = vrot.lane.b32.xlu2 %v13440_v45, %s8546_s13 }
 0x20f   :  { %v3202_v57 = vadd.f32 %v3197_v5, %v3196_v29 }
 0x210   :  { %v2112_v46 = vpop.f32.mrf.mxu1  ;;  %v2181_v55 = vpop.f32.mrf.mxu2 }
 0x211   :  { %v2113_v6 = vadd.f32 %v2112_v46, %v2074_v8  ;;  %v3203_v61 = vadd.f32 %v3202_v57, %v3198_v56 }
 0x213   :  { %v2218_v41 = vpop.f32.mrf.mxu3  ;;  %v2182_v53 = vadd.f32 %v2181_v55, %v2113_v6 }
 0x215   :  { %v2219_v34 = vadd.f32 %v2218_v41, %v2182_v53 }
 0x216   :  { %3349 = vrot.lane.b32.xlu2 %v13440_v45, %s8550_s19 }
 0x217   :  { %v2906_v32 = vmax.f32 %v2219_v34, 0.0 }
 0x219   :  { %v3199_v55 = vmul.f32 %v2906_v32, %v10867_v63 }
 0x247   :  { %v2259_v21 = vpop.f32.mrf.mxu0 }
 0x248   :  { %v2260_v23 = vadd.f32 %v2259_v21, %v855_v14 }
 0x24a   :  { %v2360_v37 = vpop.f32.mrf.mxu1  ;;  %v2414_v7 = vpop.f32.mrf.mxu2 }
 0x24b   :  { %v2361_v15 = vadd.f32 %v2360_v37, %v2260_v23  ;;  %v3204_v23 = vadd.f32 %v3203_v61, %v3199_v55 }
 0x24d   :  { %v2415_v59 = vadd.f32 %v2414_v7, %v2361_v15  ;;  %v2453_v36 = vpop.f32.mrf.mxu3 }
 0x24f   :  { %v2454_v39 = vadd.f32 %v2453_v36, %v2415_v59 }
 0x250   :  { %v2522_v35 = vpop.f32.mrf.mxu0 }
 0x251   :  { %v2523_v22 = vadd.f32 %v2522_v35, %v2454_v39  ;;  %v13645_v35 = vmov 0  }
 0x253   :  { %v2559_v4 = vpop.f32.mrf.mxu1 }
 0x254   :  { %v2560_v30 = vadd.f32 %v2559_v4, %v2523_v22 }
 0x260   :  { %v2916_v0 = vpop.permute.xlu2 %2915 }
 0x265   :  { %v2600_v48 = vpop.f32.mrf.mxu2 }
 0x266   :  { %v2601_v44 = vadd.f32 %v2600_v48, %v855_v14  ;;  %v2907_v14 = vmax.f32 %v2560_v30, 0.0 }
 0x268   :  { %v2701_v62 = vpop.f32.mrf.mxu3  ;;  %v3200_v9 = vmul.f32 %v2907_v14, %v10873_v13  ;;  %v10896_v56 = vpop.permute.xlu2 %3487 }
 0x269   :  { %v2702_v18 = vadd.f32 %v2701_v62, %v2601_v44 }
 0x26a   :  { %v3205_v43 = vadd.f32 %v3204_v23, %v3200_v9 }
 0x26c   :  { %v2755_v19 = vpop.f32.mrf.mxu0 }
 0x26d   :  { %v2756_v24 = vadd.f32 %v2755_v19, %v2702_v18 }
 0x274   :  { %v2794_v17 = vpop.f32.mrf.mxu1  ;;  %v2863_v28 = vpop.f32.mrf.mxu2 }
 0x275   :  { %v2795_v46 = vadd.f32 %v2794_v17, %v2756_v24  ;;  %v2900_v58 = vpop.f32.mrf.mxu3 }
 0x277   :  { %v2864_v21 = vadd.f32 %v2863_v28, %v2795_v46  ;;  %v10900_v46 = vpop.permute.xlu0 %3254 }
 0x279   :  { %v2901_v54 = vadd.f32 %v2900_v58, %v2864_v21 }
 0x27b   :  { %v2908_v41 = vmax.f32 %v2901_v54, 0.0 }
 0x27d   :  { %v3201_v37 = vmul.f32 %v2908_v41, %v10877_v25  ;;  %v2948_v40 = vpop.f32.mrf.mxu0 }
 0x27e   :  { %v2989_v15 = vpop.f32.mrf.mxu1  ;;  %v2949_v7 = vadd.f32 %v2948_v40, %v2916_v0  ;;  %v3019_v27 = vpop.f32.mrf.mxu2 }
 0x27f   :  { %v3206_v1 = vadd.f32 %v3205_v43, %v3201_v37  ;;  %v3046_v20 = vpop.f32.mrf.mxu3  ;;  %v10902_v55 = vpop.permute.xlu0 %3441 }
 0x280   :  { %v2990_v2 = vadd.f32 %v2989_v15, %v2949_v7 }
 0x281   :  { %3207 = vadd.xlane.f32.xlu1 %v3206_v1 }
 0x282   :  { %v3020_v8 = vadd.f32 %v3019_v27, %v2990_v2 }
 0x284   :  { %v3047_v60 = vadd.f32 %v3046_v20, %v3020_v8 }
 0x285   :  { %v3079_v10 = vpop.f32.mrf.mxu0 }
 0x286   :  { %v3104_v59 = vpop.f32.mrf.mxu1  ;;  %v3080_v36 = vadd.f32 %v3079_v10, %v3047_v60 }
 0x288   :  { %v3105_v42 = vadd.f32 %v3104_v59, %v3080_v36 }
 0x28a   :  { %v3107_v6 = vmax.f32 %v3105_v42, 0.0 }
 0x28c   :  { %3181 = vperm.xlu0 %8522, %v3107_v6  }
 0x294   :  { %8524 = vset.pattern.permute.xlu0 %v13645_v35 }
 0x295   :  { %3141 = vperm.xlu0 %8524, %v3107_v6  }
 0x29a   :  { %3264 = vperm.xlu1 %8523, %v10832_v12  }
 0x2a2   :  { %3395 = vrot.lane.b32.xlu1 %v13440_v45, %s8549_s18 }
 0x2f4   :  { %v3208_v11 = vpop.xlane.xlu1 %3207 }
 0x2f5   :  { %v3209_v39 = vmul.f32 0.0022222223, %v3208_v11 }
 0x2f7   :  { %v3210_v48 = vsub.f32 %v2903_v3, %v3209_v39  ;;  %v3211_v47 = vsub.f32 %v2904_v26, %v3209_v39  ;;  %v3212_v53 = vsub.f32 %v2905_v16, %v3209_v39  ;;  %v3213_v33 = vsub.f32 %v2906_v32, %v3209_v39 }
 0x2f8   :  { %v10884_v4 = vsub.f32 %v2907_v14, %v3209_v39  ;;  %v10889_v44 = vsub.f32 %v2908_v41, %v3209_v39  ;;  %v10898_v14 = vpop.permute.xlu2 %3349 }
 0x2f9   :  { %v3216_v51 = vmul.f32 %v3210_v48, %v10860_v31  ;;  %v3217_v50 = vmul.f32 %v3211_v47, %v10857_v52  ;;  %v3218_v22 = vmul.f32 %v3212_v53, %v10863_v38  ;;  %v3219_v12 = vmul.f32 %v3213_v33, %v10867_v63 }
 0x2fa   :  { %v3220_v3 = vmul.f32 %v10884_v4, %v10873_v13  ;;  %v3221_v16 = vmul.f32 %v10889_v44, %v10877_v25 }
 0x2fb   :  { %v3222_v62 = vmul.f32 %v3216_v51, %v3216_v51  ;;  %v3223_v34 = vmul.f32 %v3217_v50, %v3217_v50  ;;  %v3224_v26 = vmul.f32 %v3218_v22, %v3218_v22  ;;  %v3225_v30 = vmul.f32 %v3219_v12, %v3219_v12 }
 0x2fc   :  { %v3226_v5 = vmul.f32 %v3220_v3, %v3220_v3  ;;  %v3227_v24 = vmul.f32 %v3221_v16, %v3221_v16 }
 0x2fd   :  { %v3228_v19 = vadd.f32 %v3223_v34, %v3222_v62 }
 0x2fe   :  { %v3182_v54 = vpop.permute.xlu0 %3181 }
 0x2ff   :  { %v3229_v18 = vadd.f32 %v3228_v19, %v3224_v26  ;;  %v3184_v1 = vmul.f32 0.0, %v3182_v54 }
 0x301   :  { %v3230_v32 = vadd.f32 %v3229_v18, %v3225_v30 }
 0x303   :  { %v3231_v29 = vadd.f32 %v3230_v32, %v3226_v5 }
 0x305   :  { %v3232_v17 = vadd.f32 %v3231_v29, %v3227_v24 }
 0x307   :  { %3233 = vadd.xlane.f32.xlu2 %v3232_v17  ;;  %v3142_v2 = vpop.permute.xlu0 %3141 }
 0x308   :  { %v3190_v20 = vadd.f32 %v3184_v1, %v3142_v2 }
 0x30c   :  { %v3265_v15 = vpop.permute.xlu1 %3264 }
 0x314   :  { %v11012_v18 = vpop.permute.xlu1 %3395 }
 0x37a   :  { %v3234_v28 = vpop.xlane.xlu2 %3233 }
 0x37b   :  { %v3235_v58 = vmul.f32 0.0022222223, %v3234_v28 }
 0x37d   :  { %v3236_v57 = vadd.f32 1e-05, %v3235_v58 }
 0x37f   :  { %8529 = vrsqrt.f32 %v3236_v57  ;;  %vm3243_vm1 = vweird.f32 %v3236_v57 }
 0x385   :  { %v8530_v21 = vpop.eup %8529 }
 0x386   :  { %v3238_v61 = vmul.f32 %v8530_v21, %v3236_v57  ;;  %vm3244_vm0 = vweird.f32 %v8530_v21 }
 0x387   :  { %vm3245_vm2 = vmor %vm3243_vm1, %vm3244_vm0 }
 0x388   :  { %v3239_v9 = vmul.f32 %v8530_v21, %v3238_v61 }
 0x38a   :  { %v3240_v23 = vmul.f32 0.5, %v3239_v9 }
 0x38c   :  { %v3241_v41 = vsub.f32 1.5, %v3240_v23 }
 0x38e   :  { %v3242_v37 = vmul.f32 %v8530_v21, %v3241_v41 }
 0x390   :  { %v3246_v43 = vsel %vm3245_vm2, %v8530_v21, %v3242_v37 }
 0x391   :  { %v3247_v0 = vmul.f32 %v3246_v43, %v3210_v48  ;;  %v3248_v40 = vmul.f32 %v3246_v43, %v3211_v47  ;;  %v3249_v6 = vmul.f32 %v3246_v43, %v3212_v53  ;;  %v3250_v35 = vmul.f32 %v3246_v43, %v3213_v33 }
 0x392   :  { %v3147_v47 = vmul.f32 0.0, %v3142_v2  ;;  %v3251_v12 = vmul.f32 %v3246_v43, %v10884_v4  ;;  %v3252_v3 = vmul.f32 %v3246_v43, %v10889_v44  ;;  %v3715_v2 = vld [vmem:[%s13334_s1 + $0x8] sm:$0xff] }
 0x393   :  { %v3257_v7 = vmul.f32 %v10900_v46, %v3247_v0  ;;  %v3258_v27 = vmul.f32 %v10900_v46, %v3248_v40  ;;  %v3259_v49 = vmul.f32 %v10900_v46, %v3249_v6  ;;  %v3260_v39 = vmul.f32 %v10900_v46, %v3250_v35 }
 0x394   :  { %v3193_v33 = vadd.f32 %v3182_v54, %v3147_v47  ;;  %v3261_v62 = vmul.f32 %v10900_v46, %v3251_v12  ;;  %v3262_v19 = vmul.f32 %v10900_v46, %v3252_v3 }
 0x395   :  { %v3267_v8 = vadd.f32 %v3265_v15, %v3257_v7  ;;  %v3268_v60 = vadd.f32 %v3265_v15, %v3258_v27  ;;  %v3269_v11 = vadd.f32 %v3265_v15, %v3259_v49  ;;  %v3270_v53 = vadd.f32 %v3265_v15, %v3260_v39 }
 0x396   :  { %v3271_v34 = vadd.f32 %v3265_v15, %v3261_v62  ;;  %v3272_v16 = vadd.f32 %v3265_v15, %v3262_v19 }
 0x397   :  { %v3273_v10 = vadd.f32 %v3267_v8, %v3190_v20  ;;  %v3274_v59 = vadd.f32 %v3268_v60, %v3190_v20  ;;  %v3275_v48 = vadd.f32 %v3269_v11, %v3190_v20  ;;  %v3276_v50 = vadd.f32 %v3270_v53, %v3193_v33 }
 0x398   :  { %v3277_v4 = vadd.f32 %v3271_v34, %v3193_v33  ;;  %v3278_v44 = vadd.f32 %v3272_v16, %v3193_v33 }
 0x399   :  { %v10907_v36 = vmul.f32 %v3273_v10, %v10860_v31  ;;  %v10910_v42 = vmul.f32 %v3274_v59, %v10857_v52  ;;  %v10933_v51 = vmul.f32 %v3275_v48, %v10863_v38  ;;  %v10942_v22 = vmul.f32 %v3276_v50, %v10867_v63 }
 0x39a   :  { %v10972_v26 = vmul.f32 %v3277_v4, %v10873_v13  ;;  %v10988_v30 = vmul.f32 %v3278_v44, %v10877_v25  ;;  %v11091_v59 = vand.u32 4294901760, %v3715_v2 }
 0x39b   :  { %3639 = vrot.lane.b32.xlu1 %v10910_v42, %s8542_s7  ;;  %3685 = vrot.lane.b32.xlu0 %v10910_v42, %s8541_s30  ;;  %v11085_v60 = vand.u32 4294901760, %v10907_v36 }
 0x39c   :  { %3683 = vrot.lane.b32.xlu2 %v10907_v36, %s8541_s30  ;;  %v11117_v53 = vsub.f32 %v3715_v2, %v11091_v59 }
 0x39d   :  { %v11112_v48 = vsub.f32 %v10907_v36, %v11085_v60 }
 0x39f   :  { %v3925_v4 = vand.u32 4294901760, %v11112_v48 }
 0x3a3   :  { %3545 = vrot.lane.b32.xlu1 %v10907_v36, %s8545_s12  ;;  %3637 = vrot.lane.b32.xlu0 %v10907_v36, %s8542_s7 }
 0x3a4   :  { %3593 = vrot.lane.b32.xlu2 %v10910_v42, %s8543_s8 }
 0x3ab   :  { %3489 = vrot.lane.b32.xlu1 %v10907_v36, %s8546_s13  ;;  %3591 = vrot.lane.b32.xlu0 %v10907_v36, %s8543_s8 }
 0x3ac   :  { %3443 = vrot.lane.b32.xlu2 %v10907_v36, %s8548_s17 }
 0x3b3   :  { %3351 = vrot.lane.b32.xlu1 %v10907_v36, %s8550_s19  ;;  %3547 = vrot.lane.b32.xlu0 %v10910_v42, %s8545_s12 }
 0x3b4   :  { %3641 = vrot.lane.b32.xlu2 %v10933_v51, %s8542_s7 }
 0x3bb   :  { %3595 = vrot.lane.b32.xlu1 %v10933_v51, %s8543_s8  ;;  %3397 = vrot.lane.b32.xlu0 %v10907_v36, %s8549_s18 }
 0x3bc   :  { %3689 = vrot.lane.b32.xlu2 %v10942_v22, %s8541_s30 }
 0x3c3   :  { %3491 = vrot.lane.b32.xlu1 %v10910_v42, %s8546_s13  ;;  %3687 = vrot.lane.b32.xlu0 %v10933_v51, %s8541_s30 }
 0x3c4   :  { %3445 = vrot.lane.b32.xlu2 %v10910_v42, %s8548_s17 }
 0x3cb   :  { %3597 = vrot.lane.b32.xlu1 %v10942_v22, %s8543_s8  ;;  %3549 = vrot.lane.b32.xlu0 %v10933_v51, %s8545_s12 }
 0x3cc   :  { %3551 = vrot.lane.b32.xlu2 %v10942_v22, %s8545_s12 }
 0x3d3   :  { %3353 = vrot.lane.b32.xlu1 %v10910_v42, %s8550_s19  ;;  %3643 = vrot.lane.b32.xlu0 %v10942_v22, %s8542_s7 }
 0x3d4   :  { %3447 = vrot.lane.b32.xlu2 %v10933_v51, %s8548_s17 }
 0x3db   :  { %3401 = vrot.lane.b32.xlu1 %v10933_v51, %s8549_s18  ;;  %3399 = vrot.lane.b32.xlu0 %v10910_v42, %s8549_s18 }
 0x3dc   :  { %3691 = vrot.lane.b32.xlu2 %v10972_v26, %s8541_s30 }
 0x3e3   :  { %3645 = vrot.lane.b32.xlu1 %v10972_v26, %s8542_s7  ;;  %3493 = vrot.lane.b32.xlu0 %v10933_v51, %s8546_s13 }
 0x3e4   :  { %3553 = vrot.lane.b32.xlu2 %v10972_v26, %s8545_s12 }
 0x3eb   :  { %3693 = vrot.lane.b32.xlu1 %v10988_v30, %s8541_s30  ;;  %3355 = vrot.lane.b32.xlu0 %v10933_v51, %s8550_s19 }
 0x3ec   :  { %3647 = vrot.lane.b32.xlu2 %v10988_v30, %s8542_s7 }
 0x3f3   :  { %3449 = vrot.lane.b32.xlu1 %v10942_v22, %s8548_s17  ;;  %3599 = vrot.lane.b32.xlu0 %v10972_v26, %s8543_s8 }
 0x3f4   :  { %3403 = vrot.lane.b32.xlu2 %v10942_v22, %s8549_s18 }
 0x3f6   :  { %v3684_v5 = vpop.permute.xlu2 %3683 }
 0x3fb   :  { %3555 = vrot.lane.b32.xlu1 %v10988_v30, %s8545_s12  ;;  %3495 = vrot.lane.b32.xlu0 %v10942_v22, %s8546_s13 }
 0x3fc   :  { %3497 = vrot.lane.b32.xlu2 %v10972_v26, %s8546_s13 }
 0x3fe   :  { %v11030_v46 = vpop.permute.xlu2 %3593 }
 0x403   :  { %3451 = vrot.lane.b32.xlu1 %v10972_v26, %s8548_s17  ;;  %3601 = vrot.lane.b32.xlu0 %v10988_v30, %s8543_s8 }
 0x404   :  { %3359 = vrot.lane.b32.xlu2 %v10972_v26, %s8550_s19 }
 0x406   :  { %v11056_v37 = vpop.permute.xlu2 %3443 }
 0x407   :  { %v3455_v10 = vsel %vm160_vm12, %v10902_v55, %v11056_v37 }
 0x408   :  { %v11101_v35 = vand.u32 4294901760, %v3455_v10 }
 0x40a   :  { %v11128_v34 = vsub.f32 %v3455_v10, %v11101_v35 }
 0x40b   :  { %3695 = vrot.lane.b32.xlu1 %v13440_v45, %s8541_s30  ;;  %3357 = vrot.lane.b32.xlu0 %v10942_v22, %s8550_s19 }
 0x40c   :  { %3603 = vrot.lane.b32.xlu2 %v13440_v45, %s8543_s8 }
 0x40d   :  { %v11022_v32 = vpop.permute.xlu1 %3639  ;;  %v11024_v24 = vpop.permute.xlu0 %3685 }
 0x40e   :  { %v3697_v29 = vsel %vm501_vm5, %v3684_v5, %v11024_v24  ;;  %v11099_v49 = vpop.permute.xlu2 %3641 }
 0x40f   :  { %v11028_v17 = vand.u32 4294901760, %v3697_v29 }
 0x411   :  { %v11033_v28 = vsub.f32 %v3697_v29, %v11028_v17  ;;  %3831 = vmatpush.msra.mxu2 %v11028_v17  ;;  %4027 = vmatpush.msrb.mxu1 %v11028_v17 }
 0x413   :  { %v3901_v58 = vand.u32 4294901760, %v11033_v28  ;;  %3557 = vrot.lane.b32.xlu1 %v13440_v45, %s8545_s12  ;;  %3405 = vrot.lane.b32.xlu0 %v10972_v26, %s8549_s18 }
 0x414   :  { %3453 = vrot.lane.b32.xlu2 %v10988_v30, %s8548_s17  ;;  %3981 = vmatpush.msrb.mxu0 %v11033_v28 }
 0x415   :  { %v3902_v57 = vsub.f32 %v11033_v28, %v3901_v58  ;;  %v3546_v21 = vpop.permute.xlu1 %3545  ;;  %v3638_v61 = vpop.permute.xlu0 %3637 }
 0x416   :  { %v3651_v9 = vsel %vm454_vm6, %v3638_v61, %v11022_v32  ;;  %v11160_v61 = vpop.permute.xlu2 %3689 }
 0x417   :  { %v11050_v54 = vand.u32 4294901760, %v3651_v9  ;;  %v3903_v23 = vand.u32 4294901760, %v3902_v57  ;;  %v3926_v57 = vsub.f32 %v11112_v48, %v3925_v4 }
 0x419   :  { %v11053_v41 = vsub.f32 %v3651_v9, %v11050_v54  ;;  %3833 = vmatpush.msra.mxu2 %v11050_v54  ;;  %3904 = vmatpush.msra.mxu3 %v3903_v23 }
 0x41a   :  { %4029 = vmatpush.msrb.mxu1 %v11050_v54 }
 0x41b   :  { %3407 = vrot.lane.b32.xlu1 %v10988_v30, %s8549_s18  ;;  %3649 = vrot.lane.b32.xlu0 %v13440_v45, %s8542_s7  ;;  %v3907_v43 = vand.u32 4294901760, %v11053_v41 }
 0x41c   :  { %3984 = vmatpush.msrb.mxu0 %v11053_v41 }
 0x41d   :  { %v11065_v1 = vpop.permute.xlu1 %3489  ;;  %v3592_v0 = vpop.permute.xlu0 %3591  ;;  %v3908_v40 = vsub.f32 %v11053_v41, %v3907_v43 }
 0x41e   :  { %v3605_v15 = vsel %vm407_vm7, %v3592_v0, %v11030_v46  ;;  %v3501_v20 = vsel %vm254_vm10, %v10896_v56, %v11065_v1 }
 0x41f   :  { %v11072_v7 = vand.u32 4294901760, %v3605_v15  ;;  %v3909_v27 = vand.u32 4294901760, %v3908_v40  ;;  %v11093_v6 = vand.u32 4294901760, %v3501_v20  ;;  %v3652_v40 = vsel %vm454_vm6, %v11022_v32, %v11099_v49 }
 0x420   :  { %v3927_v32 = vand.u32 4294901760, %v3926_v57 }
 0x421   :  { %v11081_v8 = vsub.f32 %v3605_v15, %v11072_v7  ;;  %3835 = vmatpush.msra.mxu2 %v11072_v7  ;;  %3910 = vmatpush.msra.mxu3 %v3909_v27  ;;  %v11120_v33 = vsub.f32 %v3501_v20, %v11093_v6 }
 0x422   :  { %4031 = vmatpush.msrb.mxu1 %v11072_v7 }
 0x423   :  { %3499 = vrot.lane.b32.xlu0 %v10988_v30, %s8546_s13  ;;  %3987 = vmatpush.msrb.mxu0 %v11081_v8  ;;  %v3913_v56 = vand.u32 4294901760, %v11081_v8  ;;  %v3931_v16 = vand.u32 4294901760, %v11120_v33 }
 0x425   :  { %v11103_v11 = vpop.permute.xlu1 %3351  ;;  %v11105_v55 = vpop.permute.xlu0 %3547  ;;  %v3914_v39 = vsub.f32 %v11081_v8, %v3913_v56 }
 0x426   :  { %v3559_v47 = vsel %vm313_vm9, %v3546_v21, %v11105_v55  ;;  %v3363_v50 = vsel %vm66_vm14, %v10898_v14, %v11103_v11  ;;  %v11139_v14 = vand.u32 4294901760, %v11117_v53  ;;  %v3937_v21 = vand.u32 4294901760, %v11128_v34 }
 0x427   :  { %v11125_v12 = vand.u32 4294901760, %v3559_v47  ;;  %v3915_v62 = vand.u32 4294901760, %v3914_v39  ;;  %v11135_v3 = vand.u32 4294901760, %v3363_v50  ;;  %v11193_v39 = vand.u32 4294901760, %v3652_v40 }
 0x428   :  { %v3851_v0 = vsub.f32 %v11117_v53, %v11139_v14  ;;  %v3938_v10 = vsub.f32 %v11128_v34, %v3937_v21 }
 0x429   :  { %v11131_v36 = vsub.f32 %v3559_v47, %v11125_v12  ;;  %3837 = vmatpush.msra.mxu2 %v11125_v12  ;;  %3916 = vmatpush.msra.mxu3 %v3915_v62  ;;  %v11163_v9 = vsub.f32 %v3363_v50, %v11135_v3 }
 0x42a   :  { %4033 = vmatpush.msrb.mxu1 %v11125_v12 }
 0x42b   :  { %3361 = vrot.lane.b32.xlu0 %v10988_v30, %s8550_s19  ;;  %3839 = vmatpush.msra.mxu2 %v11085_v60  ;;  %v3919_v19 = vand.u32 4294901760, %v11131_v36  ;;  %v13439_v47 = vand.u32 4294901760, %v11163_v9 }
 0x42c   :  { %3990 = vmatpush.msrb.mxu0 %v11131_v36  ;;  %4035 = vmatpush.msrb.mxu1 %v11085_v60 }
 0x42d   :  { %v11148_v44 = vpop.permute.xlu1 %3595  ;;  %v11150_v5 = vpop.permute.xlu0 %3397  ;;  %3841 = vmatpush.msra.mxu2 %v11093_v6  ;;  %v3920_v29 = vsub.f32 %v11131_v36, %v3919_v19  ;;  %v3950_v28 = vsub.f32 %v11163_v9, %v13439_v47 }
 0x42e   :  { %v3409_v23 = vsel %vm113_vm13, %v11012_v18, %v11150_v5  ;;  %3993 = vmatpush.msrb.mxu0 %v11112_v48  ;;  %4037 = vmatpush.msrb.mxu1 %v11093_v6  ;;  %v3932_v18 = vsub.f32 %v11120_v33, %v3931_v16  ;;  %v3606_v2 = vsel %vm407_vm7, %v11030_v46, %v11148_v44  ;;  %v11198_v46 = vand.u32 4294901760, %v3851_v0 }
 0x42f   :  { %v11175_v15 = vand.u32 4294901760, %v3409_v23  ;;  %3843 = vmatpush.msra.mxu2 %v11101_v35  ;;  %v3921_v27 = vand.u32 4294901760, %v3920_v29  ;;  %v11202_v29 = vand.u32 4294901760, %v3606_v2  ;;  %v3939_v0 = vand.u32 4294901760, %v3938_v10 }
 0x430   :  { %3996 = vmatpush.msrb.mxu0 %v11120_v33  ;;  %4039 = vmatpush.msrb.mxu1 %v11101_v35  ;;  %v3933_v50 = vand.u32 4294901760, %v3932_v18  ;;  %v11216_v18 = vsub.f32 %v3652_v40, %v11193_v39  ;;  %v11230_v40 = vpop.permute.xlu2 %3445  ;;  %v3951_v41 = vand.u32 4294901760, %v3950_v28 }
 0x431   :  { %v11187_v20 = vsub.f32 %v3409_v23, %v11175_v15  ;;  %3845 = vmatpush.msra.mxu2 %v11175_v15  ;;  %3922 = vmatpush.msra.mxu3 %v3921_v27  ;;  %v11233_v10 = vsub.f32 %v3606_v2, %v11202_v29 }
 0x432   :  { %3999 = vmatpush.msrb.mxu0 %v11128_v34  ;;  %4041 = vmatpush.msrb.mxu1 %v11175_v15  ;;  %v4248_v2 = vand.u32 4294901760, %v11216_v18 }
 0x433   :  { %3847 = vmatpush.msra.mxu2 %v11135_v3  ;;  %3928 = vmatpush.msra.mxu3 %v3927_v32  ;;  %v3943_v62 = vand.u32 4294901760, %v11187_v20 }
 0x434   :  { %4002 = vmatpush.msrb.mxu0 %v11187_v20  ;;  %4043 = vmatpush.msrb.mxu1 %v11135_v3  ;;  %v4249_v28 = vsub.f32 %v11216_v18, %v4248_v2 }
 0x435   :  { %4082 = vmatpush.msrb.mxu2 %v3901_v58  ;;  %v11208_v57 = vpop.permute.xlu1 %3491  ;;  %v11210_v23 = vpop.permute.xlu0 %3687  ;;  %3934 = vmatpush.msra.mxu3 %v3933_v50  ;;  %v3944_v27 = vsub.f32 %v11187_v20, %v3943_v62 }
 0x436   :  { %v3698_v32 = vsel %vm501_vm5, %v11024_v24, %v11210_v23  ;;  %4005 = vmatpush.msrb.mxu0 %v11163_v9  ;;  %3853 = vmatmul.f32.vlgmr.msra.gmra.mxu2 %v11198_v46  ;;  %v3502_v50 = vsel %vm254_vm10, %v11065_v1, %v11208_v57  ;;  %v3456_v1 = vsel %vm160_vm12, %v11056_v37, %v11230_v40  ;;  %v4250_v33 = vand.u32 4294901760, %v4249_v28 }
 0x437   :  { %v11226_v58 = vand.u32 4294901760, %v3698_v32  ;;  %4086 = vmatpush.msrb.mxu2 %v3907_v43  ;;  %3940 = vmatpush.msra.mxu3 %v3939_v0  ;;  %v3945_v24 = vand.u32 4294901760, %v3944_v27  ;;  %v11247_v43 = vand.u32 4294901760, %v10910_v42  ;;  %v11259_v8 = vand.u32 4294901760, %v3502_v50 }
 0x438   :  { %4008 = vmatmul.f32.vlgmr.msrb.gmra.mxu0 %v11117_v53  ;;  %4047 = vmatmul.f32.vlgmr.msrb.gmra.mxu1 %v11139_v14  ;;  %v3699_v28 = vsel %vm501_vm5, %v11210_v23, %v11160_v61 }
 0x439   :  { %v11241_v47 = vsub.f32 %v3698_v32, %v11226_v58  ;;  %4090 = vmatpush.msrb.mxu2 %v3913_v56  ;;  %4172 = vmatpush.msra.mxu0 %v11226_v58  ;;  %v4254_v56 = vand.u32 4294901760, %v11233_v10  ;;  %v11283_v48 = vsub.f32 %v10910_v42, %v11247_v43 }
 0x43a   :  { %3946 = vmatpush.msra.mxu3 %v3945_v24  ;;  %6111 = vrot.lane.b32.xlu0 %v13440_v45, %s8546_s13 }
 0x43b   :  { %v4242_v0 = vand.u32 4294901760, %v11241_v47  ;;  %4094 = vmatpush.msrb.mxu2 %v3919_v19  ;;  %4174 = vmatpush.msra.mxu0 %v11193_v39  ;;  %v11272_v19 = vand.u32 4294901760, %v3456_v1  ;;  %v4255_v24 = vsub.f32 %v11233_v10, %v4254_v56 }
 0x43c   :  { %3952 = vmatpush.msra.mxu3 %v3951_v41 }
 0x43d   :  { %v4243_v27 = vsub.f32 %v11241_v47, %v4242_v0  ;;  %4098 = vmatpush.msrb.mxu2 %v3925_v4  ;;  %v11268_v37 = vpop.permute.xlu1 %3597  ;;  %v11270_v36 = vpop.permute.xlu0 %3549  ;;  %4176 = vmatpush.msra.mxu0 %v11202_v29  ;;  %v11291_v4 = vsub.f32 %v3502_v50, %v11259_v8 }
 0x43e   :  { %4135 = vmatpush.msrb.mxu3 %v11028_v17  ;;  %v3560_v32 = vsel %vm313_vm9, %v11105_v55, %v11270_v36 }
 0x43f   :  { %v11285_v17 = vand.u32 4294901760, %v3560_v32  ;;  %4102 = vmatpush.msrb.mxu2 %v3931_v16  ;;  %v4244_v55 = vand.u32 4294901760, %v4243_v27  ;;  %3954 = vmatmul.f32.vlgmr.msra.gmra.mxu3 %v11091_v59  ;;  %v4266_v16 = vand.u32 4294901760, %v11283_v48  ;;  %v4272_v34 = vand.u32 4294901760, %v11291_v4 }
 0x440   :  { %4137 = vmatpush.msrb.mxu3 %v11050_v54  ;;  %v11304_v54 = vsub.f32 %v3456_v1, %v11272_v19 }
 0x441   :  { %v11298_v42 = vsub.f32 %v3560_v32, %v11285_v17  ;;  %4106 = vmatpush.msrb.mxu2 %v3937_v21  ;;  %4178 = vmatpush.msra.mxu0 %v11285_v17  ;;  %v13646_v21 = vand.u32 4294901760, %v11163_v9  ;;  %v4267_v9 = vsub.f32 %v11283_v48, %v4266_v16 }
 0x442   :  { %4139 = vmatpush.msrb.mxu3 %v11072_v7  ;;  %4245 = vmatpush.msra.mxu1 %v4244_v55  ;;  %v4256_v7 = vand.u32 4294901760, %v4255_v24  ;;  %v11351_v55 = vpop.permute.xlu2 %3551 }
 0x443   :  { %4110 = vmatpush.msrb.mxu2 %v3943_v62  ;;  %v4260_v50 = vand.u32 4294901760, %v11298_v42  ;;  %4180 = vmatpush.msra.mxu0 %v11247_v43  ;;  %v4268_v32 = vand.u32 4294901760, %v4267_v9 }
 0x444   :  { %4141 = vmatpush.msrb.mxu3 %v11125_v12  ;;  %4251 = vmatpush.msra.mxu1 %v4250_v33 }
 0x445   :  { %4114 = vmatpush.msrb.mxu2 %v13646_v21  ;;  %v11317_v41 = vpop.permute.xlu1 %3353  ;;  %v11319_v1 = vpop.permute.xlu0 %3643  ;;  %v4261_v12 = vsub.f32 %v11298_v42, %v4260_v50  ;;  %4182 = vmatpush.msra.mxu0 %v11259_v8 }
 0x446   :  { %4143 = vmatpush.msrb.mxu3 %v11085_v60  ;;  %v3364_v20 = vsel %vm66_vm14, %v11103_v11, %v11317_v41  ;;  %4257 = vmatpush.msra.mxu1 %v4256_v7  ;;  %v4278_v60 = vand.u32 4294901760, %v11304_v54  ;;  %v4273_v11 = vsub.f32 %v11291_v4, %v4272_v34  ;;  %v3653_v33 = vsel %vm454_vm6, %v11099_v49, %v11319_v1 }
 0x447   :  { %4322 = vmatpush.msra.mxu2 %v11241_v47  ;;  %v4262_v62 = vand.u32 4294901760, %v4261_v12  ;;  %4184 = vmatpush.msra.mxu0 %v11272_v19  ;;  %v11339_v27 = vand.u32 4294901760, %v3364_v20  ;;  %v11361_v7 = vand.u32 4294901760, %v3699_v28  ;;  %v3607_v49 = vsel %vm407_vm7, %v11148_v44, %v11268_v37 }
 0x448   :  { %4145 = vmatpush.msrb.mxu3 %v11093_v6  ;;  %4116 = vmatmul.f32.vlgmr.msrb.gmra.mxu2 %v11091_v59  ;;  %v4279_v6 = vsub.f32 %v11304_v54, %v4278_v60  ;;  %v4274_v24 = vand.u32 4294901760, %v4273_v11  ;;  %v3561_v44 = vsel %vm313_vm9, %v11270_v36, %v11351_v55 }
 0x449   :  { %4325 = vmatpush.msra.mxu2 %v11216_v18  ;;  %4263 = vmatpush.msra.mxu1 %v4262_v62  ;;  %v11383_v9 = vsub.f32 %v3699_v28, %v11361_v7  ;;  %v11389_v62 = vand.u32 4294901760, %v3607_v49 }
 0x44a   :  { %4147 = vmatpush.msrb.mxu3 %v11101_v35  ;;  %v11354_v35 = vsub.f32 %v3364_v20, %v11339_v27  ;;  %v4280_v21 = vand.u32 4294901760, %v4279_v6  ;;  %v11400_v6 = vand.u32 4294901760, %v3561_v44 }
 0x44b   :  { %4328 = vmatpush.msra.mxu2 %v11233_v10  ;;  %4269 = vmatpush.msra.mxu1 %v4268_v32  ;;  %v4583_v47 = vand.u32 4294901760, %v11383_v9 }
 0x44c   :  { %4149 = vmatpush.msrb.mxu3 %v11175_v15  ;;  %v13442_v20 = vand.u32 4294901760, %v11354_v35 }
 0x44d   :  { %4331 = vmatpush.msra.mxu2 %v11298_v42  ;;  %v3400_v23 = vpop.permute.xlu0 %3399  ;;  %4275 = vmatpush.msra.mxu1 %v4274_v24  ;;  %v11425_v45 = vpop.permute.xlu1 %3401 }
 0x44e   :  { %4151 = vmatpush.msrb.mxu3 %v11135_v3  ;;  %v3410_v15 = vsel %vm113_vm13, %v11150_v5, %v3400_v23  ;;  %v11373_v3 = vand.u32 4294901760, %v3653_v33  ;;  %v4291_v24 = vsub.f32 %v11354_v35, %v13442_v20  ;;  %v11430_v20 = vand.u32 4294901760, %v10933_v51 }
 0x44f   :  { %v11366_v12 = vand.u32 4294901760, %v3410_v15  ;;  %4334 = vmatpush.msra.mxu2 %v11283_v48  ;;  %4153 = vmatmul.f32.vlgmr.msrb.gmra.mxu3 %v11091_v59 }
 0x450   :  { %4368 = vmatpush.msra.mxu3 %v11226_v58  ;;  %4281 = vmatpush.msra.mxu1 %v4280_v21  ;;  %v11395_v32 = vsub.f32 %v3653_v33, %v11373_v3  ;;  %v11412_v33 = vpop.permute.xlu2 %3447 }
 0x451   :  { %v11377_v5 = vsub.f32 %v3410_v15, %v11366_v12  ;;  %4337 = vmatpush.msra.mxu2 %v11291_v4  ;;  %4186 = vmatpush.msra.mxu0 %v11366_v12 }
 0x452   :  { %4370 = vmatpush.msra.mxu3 %v11193_v39  ;;  %v4589_v18 = vand.u32 4294901760, %v11395_v32 }
 0x453   :  { %4340 = vmatpush.msra.mxu2 %v11304_v54  ;;  %4188 = vmatpush.msra.mxu0 %v11339_v27  ;;  %v13443_v11 = vand.u32 4294901760, %v11377_v5 }
 0x454   :  { %4372 = vmatpush.msra.mxu3 %v11202_v29  ;;  %4194 = vmatmul.f32.vlgmr.msra.gmra.mxu0 %v11198_v46 }
 0x455   :  { %4423 = vmatpush.msrb.mxu0 %v4242_v0  ;;  %4343 = vmatpush.msra.mxu2 %v11377_v5  ;;  %v11403_v36 = vpop.permute.xlu0 %3493  ;;  %v4285_v28 = vsub.f32 %v11377_v5, %v13443_v11  ;;  %v11419_v0 = vsub.f32 %v3607_v49, %v11389_v62  ;;  %v4292_v49 = vand.u32 4294901760, %v4291_v24  ;;  %v11462_v24 = vsub.f32 %v10933_v51, %v11430_v20 }
 0x456   :  { %4374 = vmatpush.msra.mxu3 %v11285_v17  ;;  %v3503_v15 = vsel %vm254_vm10, %v11208_v57, %v11403_v36  ;;  %v11437_v57 = vsub.f32 %v3561_v44, %v11400_v6  ;;  %v4590_v44 = vsub.f32 %v11395_v32, %v4589_v18 }
 0x457   :  { %4427 = vmatpush.msrb.mxu0 %v4248_v2  ;;  %4346 = vmatpush.msra.mxu2 %v11354_v35  ;;  %v4286_v21 = vand.u32 4294901760, %v4285_v28  ;;  %v3457_v2 = vsel %vm160_vm12, %v11230_v40, %v11412_v33  ;;  %v4584_v28 = vsub.f32 %v11383_v9, %v4583_v47  ;;  %v11444_v11 = vand.u32 4294901760, %v3503_v15 }
 0x458   :  { %4376 = vmatpush.msra.mxu3 %v11247_v43  ;;  %v3411_v40 = vsel %vm113_vm13, %v3400_v23, %v11425_v45  ;;  %v4595_v10 = vand.u32 4294901760, %v11419_v0  ;;  %4349 = vmatmul.f32.vlgmr.msra.gmra.mxu2 %v11117_v53 }
 0x459   :  { %4513 = vmatpush.msrb.mxu2 %v11361_v7  ;;  %4431 = vmatpush.msrb.mxu0 %v4254_v56  ;;  %v11453_v56 = vand.u32 4294901760, %v3457_v2  ;;  %v11470_v23 = vand.u32 4294901760, %v3411_v40  ;;  %v4585_v48 = vand.u32 4294901760, %v4584_v28 }
 0x45a   :  { %4378 = vmatpush.msra.mxu3 %v11259_v8  ;;  %4287 = vmatpush.msra.mxu1 %v4286_v21  ;;  %v11473_v21 = vsub.f32 %v3503_v15, %v11444_v11  ;;  %v11489_v15 = vpop.permute.xlu2 %3691 }
 0x45b   :  { %4515 = vmatpush.msrb.mxu2 %v11373_v3  ;;  %4435 = vmatpush.msrb.mxu0 %v4260_v50  ;;  %v4601_v50 = vand.u32 4294901760, %v11437_v57  ;;  %v11502_v4 = vsub.f32 %v3411_v40, %v11470_v23 }
 0x45c   :  { %4380 = vmatpush.msra.mxu3 %v11272_v19  ;;  %4293 = vmatpush.msra.mxu1 %v4292_v49  ;;  %v4607_v49 = vand.u32 4294901760, %v11462_v24 }
 0x45d   :  { %4517 = vmatpush.msrb.mxu2 %v11389_v62  ;;  %4439 = vmatpush.msrb.mxu0 %v4266_v16  ;;  %v11467_v42 = vpop.permute.xlu0 %3355  ;;  %v11487_v16 = vsub.f32 %v3457_v2, %v11453_v56  ;;  %v13647_v2 = vand.u32 4294901760, %v11377_v5 }
 0x45e   :  { %4382 = vmatpush.msra.mxu3 %v11366_v12  ;;  %4476 = vmatpush.msrb.mxu1 %v11226_v58  ;;  %v3365_v51 = vsel %vm66_vm14, %v11317_v41, %v11467_v42  ;;  %v4596_v58 = vsub.f32 %v11419_v0, %v4595_v10  ;;  %v4591_v41 = vand.u32 4294901760, %v4590_v44  ;;  %v13648_v44 = vand.u32 4294901760, %v11354_v35 }
 0x45f   :  { %4519 = vmatpush.msrb.mxu2 %v11400_v6  ;;  %4443 = vmatpush.msrb.mxu0 %v4272_v34  ;;  %v11493_v28 = vand.u32 4294901760, %v3365_v51  ;;  %v4613_v34 = vand.u32 4294901760, %v11473_v21 }
 0x460   :  { %4384 = vmatpush.msra.mxu3 %v11339_v27  ;;  %4478 = vmatpush.msrb.mxu1 %v11193_v39  ;;  %v4602_v39 = vsub.f32 %v11437_v57, %v4601_v50  ;;  %v4597_v54 = vand.u32 4294901760, %v4596_v58  ;;  %v4625_v58 = vand.u32 4294901760, %v11502_v4 }
 0x461   :  { %4521 = vmatpush.msrb.mxu2 %v11430_v20  ;;  %4447 = vmatpush.msrb.mxu0 %v4278_v60  ;;  %v4619_v60 = vand.u32 4294901760, %v11487_v16  ;;  %v11516_v40 = vsub.f32 %v3365_v51, %v11493_v28  ;;  %v11529_v51 = vpop.permute.xlu1 %3645 }
 0x462   :  { %4586 = vmatpush.msrb.mxu3 %v4585_v48  ;;  %4480 = vmatpush.msrb.mxu1 %v11202_v29  ;;  %v4608_v29 = vsub.f32 %v11462_v24, %v4607_v49  ;;  %v4603_v5 = vand.u32 4294901760, %v4602_v39  ;;  %v11539_v39 = vpop.permute.xlu2 %3553 }
 0x463   :  { %4523 = vmatpush.msrb.mxu2 %v11444_v11  ;;  %4451 = vmatpush.msrb.mxu0 %v13647_v2 }
 0x464   :  { %4592 = vmatpush.msrb.mxu3 %v4591_v41  ;;  %4482 = vmatpush.msrb.mxu1 %v11285_v17  ;;  %v4614_v17 = vsub.f32 %v11473_v21, %v4613_v34  ;;  %v4609_v35 = vand.u32 4294901760, %v4608_v29  ;;  %v4631_v41 = vand.u32 4294901760, %v11516_v40 }
 0x465   :  { %4525 = vmatpush.msrb.mxu2 %v11453_v56  ;;  %4455 = vmatpush.msrb.mxu0 %v13648_v44  ;;  %v11520_v48 = vpop.permute.xlu0 %3599 }
 0x466   :  { %4598 = vmatpush.msrb.mxu3 %v4597_v54  ;;  %4484 = vmatpush.msrb.mxu1 %v11247_v43  ;;  %v4620_v43 = vsub.f32 %v11487_v16, %v4619_v60  ;;  %v4615_v2 = vand.u32 4294901760, %v4614_v17  ;;  %v4626_v54 = vsub.f32 %v11502_v4, %v4625_v58  ;;  %v4632_v44 = vsub.f32 %v11516_v40, %v4631_v41 }
 0x467   :  { %4388 = vmatmul.f32.vlgmr.msra.gmra.mxu3 %v11139_v14  ;;  %4527 = vmatpush.msrb.mxu2 %v11470_v23 }
 0x468   :  { %4604 = vmatpush.msrb.mxu3 %v4603_v5  ;;  %4295 = vmatmul.f32.vlgmr.msra.gmra.mxu1 %v11091_v59 }
 0x469   :  { %4663 = vmatpush.msra.mxu0 %v11383_v9  ;;  %4486 = vmatpush.msrb.mxu1 %v11259_v8  ;;  %v4621_v8 = vand.u32 4294901760, %v4620_v43  ;;  %v4627_v9 = vand.u32 4294901760, %v4626_v54 }
 0x46a   :  { %4529 = vmatpush.msrb.mxu2 %v11493_v28  ;;  %4610 = vmatpush.msrb.mxu3 %v4609_v35 }
 0x46b   :  { %4666 = vmatpush.msra.mxu0 %v11395_v32  ;;  %4488 = vmatpush.msrb.mxu1 %v11272_v19  ;;  %v3700_v19 = vsel %vm501_vm5, %v11160_v61, %v11489_v15  ;;  %v11565_v32 = vpop.permute.xlu1 %3693  ;;  %v3654_v61 = vsel %vm454_vm6, %v11319_v1, %v11529_v51  ;;  %v3608_v1 = vsel %vm407_vm7, %v11268_v37, %v11520_v48 }
 0x46c   :  { %4764 = vmatpush.msra.mxu2 %v4583_v47  ;;  %4616 = vmatpush.msrb.mxu3 %v4615_v2  ;;  %v11573_v47 = vpop.permute.xlu2 %3647  ;;  %v11606_v37 = vand.u32 4294901760, %v3608_v1 }
 0x46d   :  { %4669 = vmatpush.msra.mxu0 %v11419_v0  ;;  %4490 = vmatpush.msrb.mxu1 %v11366_v12  ;;  %v11550_v29 = vpop.permute.xlu0 %3495  ;;  %v4633_v12 = vand.u32 4294901760, %v4632_v44 }
 0x46e   :  { %4768 = vmatpush.msra.mxu2 %v4589_v18  ;;  %4622 = vmatpush.msrb.mxu3 %v4621_v8  ;;  %v11588_v18 = vand.u32 4294901760, %v3654_v61 }
 0x46f   :  { %4457 = vmatmul.f32.vlgmr.msrb.gmra.mxu0 %v11091_v59  ;;  %4492 = vmatpush.msrb.mxu1 %v11339_v27  ;;  %v11571_v27 = vand.u32 4294901760, %v3700_v19 }
 0x470   :  { %4672 = vmatpush.msra.mxu0 %v11437_v57  ;;  %4772 = vmatpush.msra.mxu2 %v4595_v10  ;;  %v3562_v57 = vsel %vm313_vm9, %v11351_v55, %v11539_v39 }
 0x471   :  { %4628 = vmatpush.msrb.mxu3 %v4627_v9  ;;  %4494 = vmatmul.f32.vlgmr.msrb.gmra.mxu1 %v11091_v59 }
 0x472   :  { %4675 = vmatpush.msra.mxu0 %v11462_v24  ;;  %4709 = vmatpush.msra.mxu1 %v11361_v7  ;;  %v11615_v24 = vand.u32 4294901760, %v3562_v57 }
 0x473   :  { %4776 = vmatpush.msra.mxu2 %v4601_v50  ;;  %4634 = vmatpush.msrb.mxu3 %v4633_v12  ;;  %v11617_v55 = vpop.permute.xlu1 %3449 }
 0x474   :  { %4678 = vmatpush.msra.mxu0 %v11473_v21  ;;  %4711 = vmatpush.msra.mxu1 %v11373_v3  ;;  %v11630_v50 = vpop.permute.xlu2 %3403  ;;  %v11633_v21 = vsub.f32 %v3608_v1, %v11606_v37 }
 0x475   :  { %4780 = vmatpush.msra.mxu2 %v4607_v49  ;;  %4817 = vmatpush.msra.mxu3 %v11361_v7  ;;  %v11586_v0 = vpop.permute.xlu0 %3601  ;;  %v11596_v7 = vsub.f32 %v3700_v19, %v11571_v27 }
 0x476   :  { %4681 = vmatpush.msra.mxu0 %v11487_v16  ;;  %4713 = vmatpush.msra.mxu1 %v11389_v62  ;;  %v8556_v16 = vmov 4  }
 0x477   :  { %4784 = vmatpush.msra.mxu2 %v4613_v34  ;;  %4819 = vmatpush.msra.mxu3 %v11373_v3  ;;  %v11610_v3 = vsub.f32 %v3654_v61, %v11588_v18  ;;  %v4924_v10 = vand.u32 4294901760, %v11596_v7 }
 0x478   :  { %4684 = vmatpush.msra.mxu0 %v11502_v4  ;;  %4715 = vmatpush.msra.mxu1 %v11400_v6  ;;  %v11646_v4 = vsub.f32 %v3562_v57, %v11615_v24 }
 0x479   :  { %4788 = vmatpush.msra.mxu2 %v4619_v60  ;;  %4821 = vmatpush.msra.mxu3 %v11389_v62  ;;  %v3504_v62 = vsel %vm254_vm10, %v11403_v36, %v11550_v29  ;;  %v3458_v36 = vsel %vm160_vm12, %v11412_v33, %v11617_v55  ;;  %v4925_v49 = vsub.f32 %v11596_v7, %v4924_v10  ;;  %v11653_v60 = vld [vmem:[%s13335_s2] sm:$0xff] }
 0x47a   :  { %4687 = vmatpush.msra.mxu0 %v11516_v40  ;;  %4717 = vmatpush.msra.mxu1 %v11430_v20  ;;  %v11648_v34 = vand.u32 4294901760, %v3504_v62  ;;  %v3412_v40 = vsel %vm113_vm13, %v11425_v45, %v11630_v50  ;;  %v11668_v17 = vand.u32 4294901760, %v3458_v36  ;;  %v4942_v43 = vand.u32 4294901760, %v11646_v4 }
 0x47b   :  { %4792 = vmatpush.msra.mxu2 %v4625_v58  ;;  %4823 = vmatpush.msra.mxu3 %v11400_v6  ;;  %v11628_v6 = vand.u32 4294901760, %v10942_v22  ;;  %v4936_v58 = vand.u32 4294901760, %v11633_v21  ;;  %v11718_v12 = vpop.permute.xlu1 %3555 }
 0x47c   :  { %4535 = vmatmul.f32.vlgmr.msrb.gmra.mxu2 %v11198_v46  ;;  %4854 = vmatpush.msrb.mxu0 %v11571_v27  ;;  %v11684_v35 = vsub.f32 %v3504_v62, %v11648_v34  ;;  %v4943_v9 = vsub.f32 %v11646_v4, %v4942_v43  ;;  %v3609_v62 = vsel %vm407_vm7, %v11520_v48, %v11586_v0 }
 0x47d   :  { %4719 = vmatpush.msra.mxu1 %v11444_v11  ;;  %4796 = vmatpush.msra.mxu2 %v4631_v41  ;;  %v11657_v33 = vpop.permute.xlu0 %3357  ;;  %v11666_v5 = vsub.f32 %v10942_v22, %v11628_v6  ;;  %v11693_v41 = vsub.f32 %v3458_v36, %v11668_v17  ;;  %v4937_v54 = vsub.f32 %v11633_v21, %v4936_v58 }
 0x47e   :  { %4825 = vmatpush.msra.mxu3 %v11430_v20  ;;  %8525 = vset.pattern.permute.xlu2 %v8556_v16  ;;  %v4930_v20 = vand.u32 4294901760, %v11610_v3  ;;  %v3366_v45 = vsel %vm66_vm14, %v11467_v42, %v11657_v33  ;;  %v4954_v19 = vand.u32 4294901760, %v11684_v35  ;;  %v4944_v16 = vand.u32 4294901760, %v4943_v9 }
 0x47f   :  { %4636 = vmatmul.f32.vlgmr.msrb.gmra.mxu3 %v11091_v59  ;;  %4856 = vmatpush.msrb.mxu0 %v11588_v18  ;;  %v4948_v42 = vand.u32 4294901760, %v11666_v5  ;;  %v11695_v2 = vand.u32 4294901760, %v3366_v45  ;;  %v4938_v57 = vand.u32 4294901760, %v4937_v54  ;;  %v3563_v54 = vsel %vm313_vm9, %v11539_v39, %v11718_v12 }
 0x480   :  { %5004 = vmatpush.msrb.mxu2 %v11596_v7  ;;  %3813 = vperm.xlu2 %8525, %v11653_v60   ;;  %v4931_v22 = vsub.f32 %v11610_v3, %v4930_v20  ;;  %v4955_v36 = vsub.f32 %v11684_v35, %v4954_v19 }
 0x481   :  { %4721 = vmatpush.msra.mxu1 %v11453_v56  ;;  %4827 = vmatpush.msra.mxu3 %v11444_v11  ;;  %v11681_v11 = vand.u32 4294901760, %v3412_v40  ;;  %v11727_v1 = vsub.f32 %v3366_v45, %v11695_v2 }
 0x482   :  { %4858 = vmatpush.msrb.mxu0 %v11606_v37  ;;  %5007 = vmatpush.msrb.mxu2 %v11610_v3  ;;  %v4932_v8 = vand.u32 4294901760, %v4931_v22  ;;  %v4956_v9 = vand.u32 4294901760, %v4955_v36 }
 0x483   :  { %4723 = vmatpush.msra.mxu1 %v11470_v23  ;;  %4829 = vmatpush.msra.mxu3 %v11453_v56  ;;  %v4926_v56 = vand.u32 4294901760, %v4925_v49  ;;  %v11707_v44 = vsub.f32 %v3412_v40, %v11681_v11 }
 0x484   :  { %4860 = vmatpush.msrb.mxu0 %v11615_v24  ;;  %5010 = vmatpush.msrb.mxu2 %v11633_v21 }
 0x485   :  { %4725 = vmatpush.msra.mxu1 %v11493_v28  ;;  %4831 = vmatpush.msra.mxu3 %v11470_v23  ;;  %v3701_v23 = vsel %vm501_vm5, %v11489_v15, %v11565_v32  ;;  %v3655_v15 = vsel %vm454_vm6, %v11529_v51, %v11573_v47  ;;  %v4960_v51 = vand.u32 4294901760, %v11693_v41  ;;  %v13444_v49 = vand.u32 4294901760, %v11707_v44 }
 0x486   :  { %4798 = vmatmul.f32.vlgmr.msra.gmra.mxu2 %v11091_v59  ;;  %4862 = vmatpush.msrb.mxu0 %v11628_v6  ;;  %v11724_v61 = vand.u32 4294901760, %v3701_v23  ;;  %v11742_v40 = vand.u32 4294901760, %v3655_v15 }
 0x487   :  { %4927 = vmatpush.msrb.mxu1 %v4926_v56  ;;  %5013 = vmatpush.msrb.mxu2 %v11646_v4  ;;  %v4961_v22 = vsub.f32 %v11693_v41, %v4960_v51  ;;  %v4972_v56 = vand.u32 4294901760, %v11727_v1 }
 0x488   :  { %4833 = vmatpush.msra.mxu3 %v11493_v28  ;;  %4690 = vmatmul.f32.vlgmr.msra.gmra.mxu0 %v11117_v53  ;;  %v4949_v28 = vsub.f32 %v11666_v5, %v4948_v42  ;;  %v11747_v45 = vsub.f32 %v3701_v23, %v11724_v61  ;;  %v11761_v23 = vpop.permute.xlu2 %3497 }
 0x489   :  { %4835 = vmatmul.f32.vlgmr.msra.gmra.mxu3 %v11091_v59  ;;  %4864 = vmatpush.msrb.mxu0 %v11648_v34  ;;  %v4962_v36 = vand.u32 4294901760, %v4961_v22  ;;  %v3505_v7 = vsel %vm254_vm10, %v11550_v29, %v11761_v23  ;;  %v11792_v22 = vpop.permute.xlu0 %3405 }
 0x48a   :  { %4933 = vmatpush.msrb.mxu1 %v4932_v8  ;;  %5016 = vmatpush.msrb.mxu2 %v11666_v5  ;;  %v4950_v48 = vand.u32 4294901760, %v4949_v28  ;;  %v11757_v8 = vand.u32 4294901760, %v3609_v62  ;;  %v4967_v28 = vsub.f32 %v11707_v44, %v13444_v49  ;;  %v5265_v39 = vand.u32 4294901760, %v11747_v45  ;;  %v11780_v49 = vpop.permute.xlu1 %3451 }
 0x48b   :  { %5050 = vmatpush.msrb.mxu3 %v11571_v27  ;;  %4729 = vmatmul.f32.vlgmr.msra.gmra.mxu1 %v11139_v14 }
 0x48c   :  { %4866 = vmatpush.msrb.mxu0 %v11668_v17  ;;  %4939 = vmatpush.msrb.mxu1 %v4938_v57  ;;  %v11768_v57 = vsub.f32 %v3655_v15, %v11742_v40  ;;  %v11783_v15 = vsub.f32 %v3609_v62, %v11757_v8  ;;  %v11798_v62 = vand.u32 4294901760, %v10972_v26  ;;  %v5266_v29 = vsub.f32 %v11747_v45, %v5265_v39 }
 0x48d   :  { %5019 = vmatpush.msrb.mxu2 %v11684_v35  ;;  %5052 = vmatpush.msrb.mxu3 %v11588_v18 }
 0x48e   :  { %4868 = vmatpush.msrb.mxu0 %v11681_v11  ;;  %4945 = vmatpush.msrb.mxu1 %v4944_v16  ;;  %v11774_v16 = vand.u32 4294901760, %v3563_v54  ;;  %v5271_v3 = vand.u32 4294901760, %v11768_v57 }
 0x48f   :  { %5022 = vmatpush.msrb.mxu2 %v11693_v41  ;;  %5054 = vmatpush.msrb.mxu3 %v11606_v37 }
 0x490   :  { %4870 = vmatpush.msrb.mxu0 %v11695_v2  ;;  %4951 = vmatpush.msrb.mxu1 %v4950_v48  ;;  %v4973_v48 = vsub.f32 %v11727_v1, %v4972_v56  ;;  %v5272_v4 = vsub.f32 %v11768_v57, %v5271_v3 }
 0x491   :  { %5025 = vmatpush.msrb.mxu2 %v11707_v44  ;;  %5056 = vmatpush.msrb.mxu3 %v11615_v24 }
 0x492   :  { %5105 = vmatpush.msra.mxu0 %v4924_v10  ;;  %4957 = vmatpush.msrb.mxu1 %v4956_v9  ;;  %v4968_v10 = vand.u32 4294901760, %v4967_v28  ;;  %v3459_v9 = vsel %vm160_vm12, %v11617_v55, %v11780_v49  ;;  %v4974_v21 = vand.u32 4294901760, %v4973_v48  ;;  %v5277_v28 = vand.u32 4294901760, %v11783_v15 }
 0x493   :  { %5028 = vmatpush.msrb.mxu2 %v11727_v1  ;;  %5058 = vmatpush.msrb.mxu3 %v11628_v6  ;;  %v11821_v55 = vand.u32 4294901760, %v3459_v9 }
 0x494   :  { %5109 = vmatpush.msra.mxu0 %v4930_v20  ;;  %4963 = vmatpush.msrb.mxu1 %v4962_v36  ;;  %v11805_v20 = vsub.f32 %v3563_v54, %v11774_v16  ;;  %v3413_v54 = vsel %vm113_vm13, %v11630_v50, %v11792_v22  ;;  %v11833_v36 = vpop.permute.xlu2 %3359  ;;  %v5267_v50 = vand.u32 4294901760, %v5266_v29  ;;  %v13649_v29 = vand.u32 4294901760, %v11707_v44 }
 0x495   :  { %5195 = vmatpush.msra.mxu2 %v11724_v61  ;;  %5060 = vmatpush.msrb.mxu3 %v11648_v34 }
 0x496   :  { %5113 = vmatpush.msra.mxu0 %v4936_v58  ;;  %4969 = vmatpush.msrb.mxu1 %v4968_v10  ;;  %v11811_v58 = vand.u32 4294901760, %v3505_v7  ;;  %v5283_v48 = vand.u32 4294901760, %v11805_v20  ;;  %v11844_v10 = vand.u32 4294901760, %v3413_v54 }
 0x497   :  { %5197 = vmatpush.msra.mxu2 %v11742_v40  ;;  %5062 = vmatpush.msrb.mxu3 %v11668_v17 }
 0x498   :  { %5117 = vmatpush.msra.mxu0 %v4942_v43  ;;  %4975 = vmatpush.msrb.mxu1 %v4974_v21  ;;  %v11831_v43 = vsub.f32 %v10972_v26, %v11798_v62  ;;  %v11839_v5 = vsub.f32 %v3505_v7, %v11811_v58  ;;  %v5278_v26 = vsub.f32 %v11783_v15, %v5277_v28 }
 0x499   :  { %5199 = vmatpush.msra.mxu2 %v11757_v8  ;;  %5064 = vmatpush.msrb.mxu3 %v11681_v11 }
 0x49a   :  { %5121 = vmatpush.msra.mxu0 %v4948_v42  ;;  %5158 = vmatpush.msra.mxu1 %v11571_v27  ;;  %v3367_v42 = vsel %vm66_vm14, %v11657_v33, %v11833_v36  ;;  %v11855_v27 = vsub.f32 %v3459_v9, %v11821_v55  ;;  %v5273_v33 = vand.u32 4294901760, %v5272_v4  ;;  %v5289_v7 = vand.u32 4294901760, %v11831_v43 }
 0x49b   :  { %5201 = vmatpush.msra.mxu2 %v11774_v16  ;;  %5066 = vmatpush.msrb.mxu3 %v11695_v2  ;;  %v11860_v35 = vand.u32 4294901760, %v3367_v42  ;;  %v5279_v41 = vand.u32 4294901760, %v5278_v26  ;;  %v3650_v26 = vpop.permute.xlu0 %3649 }
 0x49c   :  { %5125 = vmatpush.msra.mxu0 %v4954_v19  ;;  %5160 = vmatpush.msra.mxu1 %v11588_v18  ;;  %v5284_v18 = vsub.f32 %v11805_v20, %v5283_v48  ;;  %v11868_v19 = vsub.f32 %v3413_v54, %v11844_v10  ;;  %v5301_v9 = vand.u32 4294901760, %v11855_v27 }
 0x49d   :  { %5203 = vmatpush.msra.mxu2 %v11798_v62  ;;  %5268 = vmatpush.msra.mxu3 %v5267_v50  ;;  %v11881_v21 = vsub.f32 %v3367_v42, %v11860_v35 }
 0x49e   :  { %5129 = vmatpush.msra.mxu0 %v4960_v51  ;;  %5162 = vmatpush.msra.mxu1 %v11606_v37  ;;  %v5295_v51 = vand.u32 4294901760, %v11839_v5  ;;  %v5290_v37 = vsub.f32 %v11831_v43, %v5289_v7  ;;  %v5285_v44 = vand.u32 4294901760, %v5284_v18  ;;  %v5307_v54 = vand.u32 4294901760, %v11868_v19 }
 0x49f   :  { %5205 = vmatpush.msra.mxu2 %v11811_v58  ;;  %5274 = vmatpush.msra.mxu3 %v5273_v33  ;;  %v5302_v1 = vsub.f32 %v11855_v27, %v5301_v9 }
 0x4a0   :  { %5031 = vmatmul.f32.vlgmr.msrb.gmra.mxu2 %v11117_v53  ;;  %5133 = vmatpush.msra.mxu0 %v13649_v29  ;;  %v5291_v4 = vand.u32 4294901760, %v5290_v37  ;;  %v5308_v42 = vsub.f32 %v11868_v19, %v5307_v54 }
 0x4a1   :  { %5164 = vmatpush.msra.mxu1 %v11615_v24  ;;  %5207 = vmatpush.msra.mxu2 %v11821_v55  ;;  %v5296_v24 = vsub.f32 %v11839_v5, %v5295_v51 }
 0x4a2   :  { %5280 = vmatpush.msra.mxu3 %v5279_v41  ;;  %4876 = vmatmul.f32.vlgmr.msrb.gmra.mxu0 %v11198_v46 }
 0x4a3   :  { %5070 = vmatmul.f32.vlgmr.msrb.gmra.mxu3 %v11139_v14  ;;  %5137 = vmatpush.msra.mxu0 %v4972_v56  ;;  %v3696_v56 = vpop.permute.xlu1 %3695  ;;  %v5297_v50 = vand.u32 4294901760, %v5296_v24 }
 0x4a4   :  { %5166 = vmatpush.msra.mxu1 %v11628_v6  ;;  %5209 = vmatpush.msra.mxu2 %v11844_v10  ;;  %v5313_v6 = vand.u32 4294901760, %v11881_v21 }
 0x4a5   :  { %5286 = vmatpush.msra.mxu3 %v5285_v44  ;;  %4977 = vmatmul.f32.vlgmr.msrb.gmra.mxu1 %v11091_v59 }
 0x4a6   :  { %5345 = vmatpush.msrb.mxu0 %v11747_v45  ;;  %5168 = vmatpush.msra.mxu1 %v11648_v34  ;;  %v5303_v34 = vand.u32 4294901760, %v5302_v1  ;;  %v5314_v33 = vsub.f32 %v11881_v21, %v5313_v6  ;;  %v5309_v45 = vand.u32 4294901760, %v5308_v42 }
 0x4a7   :  { %5211 = vmatpush.msra.mxu2 %v11860_v35  ;;  %5292 = vmatpush.msra.mxu3 %v5291_v4 }
 0x4a8   :  { %5348 = vmatpush.msrb.mxu0 %v11768_v57  ;;  %5170 = vmatpush.msra.mxu1 %v11668_v17  ;;  %v3702_v17 = vsel %vm501_vm5, %v11565_v32, %v3696_v56  ;;  %v3604_v57 = vpop.permute.xlu2 %3603  ;;  %v3656_v32 = vsel %vm454_vm6, %v11573_v47, %v3650_v26 }
 0x4a9   :  { %5446 = vmatpush.msrb.mxu2 %v5265_v39  ;;  %5298 = vmatpush.msra.mxu3 %v5297_v50  ;;  %v11925_v39 = vand.u32 4294901760, %v3702_v17 }
 0x4aa   :  { %5351 = vmatpush.msrb.mxu0 %v11783_v15  ;;  %5172 = vmatpush.msra.mxu1 %v11681_v11  ;;  %v5315_v11 = vand.u32 4294901760, %v5314_v33 }
 0x4ab   :  { %5450 = vmatpush.msrb.mxu2 %v5271_v3  ;;  %5304 = vmatpush.msra.mxu3 %v5303_v34  ;;  %v3558_v15 = vpop.permute.xlu1 %3557  ;;  %v3610_v3 = vsel %vm407_vm7, %v11586_v0, %v3604_v57  ;;  %v11943_v47 = vsub.f32 %v3702_v17, %v11925_v39 }
 0x4ac   :  { %5139 = vmatmul.f32.vlgmr.msra.gmra.mxu0 %v11091_v59  ;;  %5174 = vmatpush.msra.mxu1 %v11695_v2  ;;  %v3500_v2 = vpop.permute.xlu0 %3499  ;;  %v11952_v0 = vand.u32 4294901760, %v3610_v3 }
 0x4ad   :  { %5354 = vmatpush.msrb.mxu0 %v11805_v20  ;;  %5454 = vmatpush.msrb.mxu2 %v5277_v28  ;;  %v11937_v20 = vand.u32 4294901760, %v3656_v32 }
 0x4ae   :  { %5310 = vmatpush.msra.mxu3 %v5309_v45  ;;  %5176 = vmatmul.f32.vlgmr.msra.gmra.mxu1 %v11091_v59 }
 0x4af   :  { %5357 = vmatpush.msrb.mxu0 %v11831_v43  ;;  %5391 = vmatpush.msrb.mxu1 %v11724_v61  ;;  %v11957_v28 = vsub.f32 %v3656_v32, %v11937_v20  ;;  %v3506_v43 = vsel %vm254_vm10, %v11761_v23, %v3500_v2 }
 0x4b0   :  { %5458 = vmatpush.msrb.mxu2 %v5283_v48  ;;  %5316 = vmatpush.msra.mxu3 %v5315_v11  ;;  %v11970_v48 = vsub.f32 %v3610_v3, %v11952_v0 }
 0x4b1   :  { %5360 = vmatpush.msrb.mxu0 %v11839_v5  ;;  %5393 = vmatpush.msrb.mxu1 %v11742_v40 }
 0x4b2   :  { %5462 = vmatpush.msrb.mxu2 %v5289_v7  ;;  %5499 = vmatpush.msrb.mxu3 %v11724_v61  ;;  %v3564_v61 = vsel %vm313_vm9, %v11718_v12, %v3558_v15  ;;  %v5618_v29 = vand.u32 4294901760, %v11970_v48 }
 0x4b3   :  { %5363 = vmatpush.msrb.mxu0 %v11855_v27  ;;  %5395 = vmatpush.msrb.mxu1 %v11757_v8  ;;  %v11961_v12 = vand.u32 4294901760, %v3564_v61  ;;  %v3408_v5 = vpop.permute.xlu1 %3407  ;;  %v5612_v27 = vand.u32 4294901760, %v11957_v28 }
 0x4b4   :  { %5466 = vmatpush.msrb.mxu2 %v5295_v51  ;;  %5501 = vmatpush.msrb.mxu3 %v11742_v40  ;;  %v5606_v40 = vand.u32 4294901760, %v11943_v47  ;;  %v5619_v44 = vsub.f32 %v11970_v48, %v5618_v29 }
 0x4b5   :  { %5366 = vmatpush.msrb.mxu0 %v11868_v19  ;;  %5397 = vmatpush.msrb.mxu1 %v11774_v16  ;;  %v11987_v18 = vsub.f32 %v3564_v61, %v11961_v12  ;;  %v3362_v19 = vpop.permute.xlu0 %3361 }
 0x4b6   :  { %5470 = vmatpush.msrb.mxu2 %v5301_v9  ;;  %5503 = vmatpush.msrb.mxu3 %v11757_v8  ;;  %v3454_v8 = vpop.permute.xlu2 %3453  ;;  %v5607_v7 = vsub.f32 %v11943_v47, %v5606_v40  ;;  %v3368_v37 = vsel %vm66_vm14, %v11833_v36, %v3362_v19 }
 0x4b7   :  { %5369 = vmatpush.msrb.mxu0 %v11881_v21  ;;  %5399 = vmatpush.msrb.mxu1 %v11798_v62  ;;  %v3460_v23 = vsel %vm160_vm12, %v11780_v49, %v3454_v8  ;;  %v3414_v49 = vsel %vm113_vm13, %v11792_v22, %v3408_v5  ;;  %v5613_v22 = vsub.f32 %v11957_v28, %v5612_v27  ;;  %v5624_v36 = vand.u32 4294901760, %v11987_v18 }
 0x4b8   :  { %5474 = vmatpush.msrb.mxu2 %v5307_v54  ;;  %5505 = vmatpush.msrb.mxu3 %v11774_v16  ;;  %v11976_v16 = vand.u32 4294901760, %v10988_v30  ;;  %v11997_v41 = vand.u32 4294901760, %v3460_v23  ;;  %v12026_v21 = vand.u32 4294901760, %v3368_v37 }
 0x4b9   :  { %5217 = vmatmul.f32.vlgmr.msra.gmra.mxu2 %v11198_v46  ;;  %5536 = vmatpush.msra.mxu0 %v11925_v39  ;;  %v5625_v4 = vsub.f32 %v11987_v18, %v5624_v36 }
 0x4ba   :  { %5401 = vmatpush.msrb.mxu1 %v11811_v58  ;;  %5478 = vmatpush.msrb.mxu2 %v5313_v6  ;;  %v12003_v51 = vsub.f32 %v10988_v30, %v11976_v16  ;;  %v5608_v30 = vand.u32 4294901760, %v5607_v7  ;;  %v5653_v56 = vsub.f32 %v3368_v37, %v12026_v21 }
 0x4bb   :  { %5507 = vmatpush.msrb.mxu3 %v11798_v62  ;;  %5538 = vmatpush.msra.mxu0 %v11937_v20  ;;  %v11989_v62 = vand.u32 4294901760, %v3506_v43  ;;  %v5626_v42 = vand.u32 4294901760, %v5625_v4 }
 0x4bc   :  { %5318 = vmatmul.f32.vlgmr.msra.gmra.mxu3 %v11091_v59  ;;  %5686 = vmatpush.msra.mxu2 %v11943_v47  ;;  %v5630_v24 = vand.u32 4294901760, %v12003_v51  ;;  %v5654_v17 = vand.u32 4294901760, %v5653_v56 }
 0x4bd   :  { %5403 = vmatpush.msrb.mxu1 %v11821_v55  ;;  %5509 = vmatpush.msrb.mxu3 %v11811_v58  ;;  %v12013_v58 = vand.u32 4294901760, %v3414_v49  ;;  %v12016_v9 = vsub.f32 %v3506_v43, %v11989_v62 }
 0x4be   :  { %5540 = vmatpush.msra.mxu0 %v11952_v0  ;;  %5689 = vmatpush.msra.mxu2 %v11957_v28  ;;  %v5631_v6 = vsub.f32 %v12003_v51, %v5630_v24  ;;  %v5655_v32 = vsub.f32 %v5653_v56, %v5654_v17 }
 0x4bf   :  { %5405 = vmatpush.msrb.mxu1 %v11844_v10  ;;  %5511 = vmatpush.msrb.mxu3 %v11821_v55  ;;  %v12024_v55 = vsub.f32 %v3460_v23, %v11997_v41  ;;  %v5647_v54 = vsub.f32 %v3414_v49, %v12013_v58  ;;  %v5636_v1 = vand.u32 4294901760, %v12016_v9 }
 0x4c0   :  { %5542 = vmatpush.msra.mxu0 %v11961_v12  ;;  %5692 = vmatpush.msra.mxu2 %v11970_v48  ;;  %v5632_v33 = vand.u32 4294901760, %v5631_v6  ;;  %v5656_v3 = vand.u32 4294901760, %v5655_v32 }
 0x4c1   :  { %5407 = vmatpush.msrb.mxu1 %v11860_v35  ;;  %5513 = vmatpush.msrb.mxu3 %v11844_v10  ;;  %v5614_v10 = vand.u32 4294901760, %v5613_v22  ;;  %v5642_v50 = vand.u32 4294901760, %v12024_v55  ;;  %v5637_v26 = vsub.f32 %v12016_v9, %v5636_v1  ;;  %v5648_v34 = vand.u32 4294901760, %v5647_v54 }
 0x4c2   :  { %5480 = vmatmul.f32.vlgmr.msrb.gmra.mxu2 %v11091_v59  ;;  %5544 = vmatpush.msra.mxu0 %v11976_v16 }
 0x4c3   :  { %5609 = vmatpush.msra.mxu1 %v5608_v30  ;;  %5695 = vmatpush.msra.mxu2 %v11987_v18  ;;  %v5643_v45 = vsub.f32 %v12024_v55, %v5642_v50  ;;  %v5638_v11 = vand.u32 4294901760, %v5637_v26  ;;  %v5649_v57 = vsub.f32 %v5647_v54, %v5648_v34 }
 0x4c4   :  { %5515 = vmatpush.msrb.mxu3 %v11860_v35  ;;  %5372 = vmatmul.f32.vlgmr.msrb.gmra.mxu0 %v11117_v53  ;;  %v5620_v35 = vand.u32 4294901760, %v5619_v44 }
 0x4c5   :  { %5517 = vmatmul.f32.vlgmr.msrb.gmra.mxu3 %v11091_v59  ;;  %5546 = vmatpush.msra.mxu0 %v11989_v62  ;;  %v5644_v15 = vand.u32 4294901760, %v5643_v45  ;;  %v5650_v2 = vand.u32 4294901760, %v5649_v57 }
 0x4c6   :  { %5615 = vmatpush.msra.mxu1 %v5614_v10  ;;  %5698 = vmatpush.msra.mxu2 %v12003_v51 }
 0x4c7   :  { %5732 = vmatpush.msra.mxu3 %v11925_v39  ;;  %5411 = vmatmul.f32.vlgmr.msrb.gmra.mxu1 %v11139_v14 }
 0x4c8   :  { %5548 = vmatpush.msra.mxu0 %v11997_v41  ;;  %5621 = vmatpush.msra.mxu1 %v5620_v35 }
 0x4c9   :  { %5701 = vmatpush.msra.mxu2 %v12016_v9  ;;  %5734 = vmatpush.msra.mxu3 %v11937_v20 }
 0x4ca   :  { %5550 = vmatpush.msra.mxu0 %v12013_v58  ;;  %5627 = vmatpush.msra.mxu1 %v5626_v42 }
 0x4cb   :  { %5704 = vmatpush.msra.mxu2 %v12024_v55  ;;  %5736 = vmatpush.msra.mxu3 %v11952_v0 }
 0x4cc   :  { %5552 = vmatpush.msra.mxu0 %v12026_v21  ;;  %5633 = vmatpush.msra.mxu1 %v5632_v33 }
 0x4cd   :  { %5707 = vmatpush.msra.mxu2 %v5647_v54  ;;  %5738 = vmatpush.msra.mxu3 %v11961_v12 }
 0x4ce   :  { %5787 = vmatpush.msrb.mxu0 %v5606_v40  ;;  %5639 = vmatpush.msra.mxu1 %v5638_v11 }
 0x4cf   :  { %5710 = vmatpush.msra.mxu2 %v5653_v56  ;;  %5740 = vmatpush.msra.mxu3 %v11976_v16 }
 0x4d0   :  { %5791 = vmatpush.msrb.mxu0 %v5612_v27  ;;  %5645 = vmatpush.msra.mxu1 %v5644_v15 }
 0x4d1   :  { %5713 = vmatmul.f32.vlgmr.msra.gmra.mxu2 %v11117_v53  ;;  %5742 = vmatpush.msra.mxu3 %v11989_v62  ;;  %v3854_v53 = vpop.f32.mrf.mxu2 }
 0x4d2   :  { %5795 = vmatpush.msrb.mxu0 %v5618_v29  ;;  %5651 = vmatpush.msra.mxu1 %v5650_v2 }
 0x4d3   :  { %5558 = vmatmul.f32.vlgmr.msra.gmra.mxu0 %v11198_v46  ;;  %5744 = vmatpush.msra.mxu3 %v11997_v41  ;;  %v4009_v46 = vpop.f32.mrf.mxu0 }
 0x4d4   :  { %5799 = vmatpush.msrb.mxu0 %v5624_v36  ;;  %5657 = vmatpush.msra.mxu1 %v5656_v3 }
 0x4d5   :  { %5746 = vmatpush.msra.mxu3 %v12013_v58  ;;  %5659 = vmatmul.f32.vlgmr.msra.gmra.mxu1 %v11091_v59 }
 0x4d6   :  { %5803 = vmatpush.msrb.mxu0 %v5630_v24  ;;  %5840 = vmatpush.msrb.mxu1 %v11925_v39  ;;  %v4048_v39 = vpop.f32.mrf.mxu1 }
 0x4d7   :  { %5748 = vmatpush.msra.mxu3 %v12026_v21 }
 0x4d8   :  { %5752 = vmatmul.f32.vlgmr.msra.gmra.mxu3 %v11139_v14  ;;  %5807 = vmatpush.msrb.mxu0 %v5636_v1  ;;  %v3955_v14 = vpop.f32.mrf.mxu3 }
 0x4d9   :  { %5842 = vmatpush.msrb.mxu1 %v11937_v20  ;;  %v4117_v20 = vpop.f32.mrf.mxu2 }
 0x4da   :  { %5811 = vmatpush.msrb.mxu0 %v5642_v50 }
 0x4db   :  { %5844 = vmatpush.msrb.mxu1 %v11952_v0  ;;  %v4195_v61 = vpop.f32.mrf.mxu0 }
 0x4dc   :  { %5815 = vmatpush.msrb.mxu0 %v5648_v34 }
 0x4dd   :  { %5846 = vmatpush.msrb.mxu1 %v11961_v12 }
 0x4de   :  { %5819 = vmatpush.msrb.mxu0 %v5654_v17 }
 0x4df   :  { %5848 = vmatpush.msrb.mxu1 %v11976_v16  ;;  %5821 = vmatmul.f32.vlgmr.msrb.gmra.mxu0 %v11091_v59 }
 0x4e0   :  { %v4154_v47 = vpop.f32.mrf.mxu3 }
 0x4e1   :  { %5850 = vmatpush.msrb.mxu1 %v11989_v62  ;;  %v4350_v28 = vpop.f32.mrf.mxu2  ;;  %v3814_v62 = vpop.permute.xlu2 %3813 }
 0x4e2   :  { %v3855_v51 = vadd.f32 %v3854_v53, %v3814_v62 }
 0x4e3   :  { %5852 = vmatpush.msrb.mxu1 %v11997_v41  ;;  %v4196_v41 = vadd.f32 %v4195_v61, %v3814_v62 }
 0x4e4   :  { %v3956_v30 = vadd.f32 %v3955_v14, %v3855_v51 }
 0x4e5   :  { %5854 = vmatpush.msrb.mxu1 %v12013_v58  ;;  %v4296_v0 = vpop.f32.mrf.mxu1 }
 0x4e6   :  { %v4297_v58 = vadd.f32 %v4296_v0, %v4196_v41  ;;  %v4010_v54 = vadd.f32 %v4009_v46, %v3956_v30 }
 0x4e7   :  { %5856 = vmatpush.msrb.mxu1 %v12026_v21 }
 0x4e8   :  { %5858 = vmatmul.f32.vlgmr.msrb.gmra.mxu1 %v11091_v59  ;;  %v4351_v24 = vadd.f32 %v4350_v28, %v4297_v58  ;;  %v4049_v50 = vadd.f32 %v4048_v39, %v4010_v54 }
 0x4ea   :  { %v4389_v40 = vpop.f32.mrf.mxu3  ;;  %v4118_v57 = vadd.f32 %v4117_v20, %v4049_v50 }
 0x4eb   :  { %v4390_v35 = vadd.f32 %v4389_v40, %v4351_v24 }
 0x4ec   :  { %v4458_v12 = vpop.f32.mrf.mxu0  ;;  %v4155_v46 = vadd.f32 %v4154_v47, %v4118_v57 }
 0x4ed   :  { %v4459_v45 = vadd.f32 %v4458_v12, %v4390_v35 }
 0x4ee   :  { %v4495_v43 = vpop.f32.mrf.mxu1 }
 0x4ef   :  { %v4496_v53 = vadd.f32 %v4495_v43, %v4459_v45 }
 0x4f1   :  { %v5863_v39 = vmax.f32 %v4496_v53, 0.0 }
 0x4f3   :  { %v5869_v20 = vmul.f32 %v5863_v39, %v10857_v52 }
 0x4ff   :  { %v4536_v8 = vpop.f32.mrf.mxu2 }
 0x500   :  { %v4537_v29 = vadd.f32 %v4536_v8, %v3814_v62 }
 0x502   :  { %v4637_v48 = vpop.f32.mrf.mxu3 }
 0x503   :  { %v4638_v36 = vadd.f32 %v4637_v48, %v4537_v29 }
 0x505   :  { %v4691_v5 = vpop.f32.mrf.mxu0 }
 0x506   :  { %v4692_v4 = vadd.f32 %v4691_v5, %v4638_v36  ;;  %v5862_v5 = vmax.f32 %v4155_v46, 0.0 }
 0x508   :  { %v4730_v16 = vpop.f32.mrf.mxu1  ;;  %v5868_v43 = vmul.f32 %v5862_v5, %v10860_v31 }
 0x509   :  { %v4799_v23 = vpop.f32.mrf.mxu2  ;;  %v4731_v42 = vadd.f32 %v4730_v16, %v4692_v4 }
 0x50b   :  { %v4800_v15 = vadd.f32 %v4799_v23, %v4731_v42 }
 0x50c   :  { %v4836_v7 = vpop.f32.mrf.mxu3 }
 0x50d   :  { %v4837_v61 = vadd.f32 %v4836_v7, %v4800_v15 }
 0x50f   :  { %v5864_v16 = vmax.f32 %v4837_v61, 0.0  ;;  %v12106_v61 = vpop.permute.xlu0 %6111 }
 0x511   :  { %v5870_v47 = vmul.f32 %v5864_v16, %v10863_v38 }
 0x51f   :  { %v4877_v27 = vpop.f32.mrf.mxu0 }
 0x520   :  { %v4878_v9 = vadd.f32 %v4877_v27, %v3814_v62 }
 0x522   :  { %v4978_v59 = vpop.f32.mrf.mxu1 }
 0x523   :  { %v5032_v18 = vpop.f32.mrf.mxu2  ;;  %v4979_v10 = vadd.f32 %v4978_v59, %v4878_v9 }
 0x525   :  { %v5033_v6 = vadd.f32 %v5032_v18, %v4979_v10 }
 0x526   :  { %v5071_v19 = vpop.f32.mrf.mxu3 }
 0x527   :  { %v5072_v17 = vadd.f32 %v5071_v19, %v5033_v6 }
 0x529   :  { %v5140_v49 = vpop.f32.mrf.mxu0 }
 0x52a   :  { %v5141_v14 = vadd.f32 %v5140_v49, %v5072_v17 }
 0x52b   :  { %v5177_v37 = vpop.f32.mrf.mxu1 }
 0x52c   :  { %v5178_v8 = vadd.f32 %v5177_v37, %v5141_v14 }
 0x52e   :  { %v5865_v23 = vmax.f32 %v5178_v8, 0.0 }
 0x530   :  { %v5871_v19 = vmul.f32 %v5865_v23, %v10867_v63 }
 0x53c   :  { %v5218_v22 = vpop.f32.mrf.mxu2 }
 0x53d   :  { %v5219_v55 = vadd.f32 %v5218_v22, %v3814_v62 }
 0x53f   :  { %v5319_v21 = vpop.f32.mrf.mxu3 }
 0x540   :  { %v5320_v1 = vadd.f32 %v5319_v21, %v5219_v55  ;;  %v13650_v55 = vmov 0.0   ;;  %v8557_v21 = vmov 5  }
 0x541   :  { %v5373_v44 = vpop.f32.mrf.mxu0  ;;  %8526 = vset.pattern.permute.xlu2 %v8557_v21 }
 0x542   :  { %v5374_v26 = vadd.f32 %v5373_v44, %v5320_v1  ;;  %5926 = vperm.xlu2 %8526, %v11653_v60   ;;  %v8558_v44 = vmov 6  }
 0x544   :  { %v5412_v56 = vpop.f32.mrf.mxu1 }
 0x545   :  { %v5481_v34 = vpop.f32.mrf.mxu2  ;;  %v5413_v32 = vadd.f32 %v5412_v56, %v5374_v26 }
 0x547   :  { %v5482_v0 = vadd.f32 %v5481_v34, %v5413_v32 }
 0x548   :  { %v5518_v11 = vpop.f32.mrf.mxu3 }
 0x549   :  { %v5519_v12 = vadd.f32 %v5518_v11, %v5482_v0 }
 0x54a   :  { %8527 = vset.pattern.permute.xlu2 %v8558_v44 }
 0x54b   :  { %v5866_v7 = vmax.f32 %v5519_v12, 0.0  ;;  %5936 = vperm.xlu2 %8527, %v11653_v60  }
 0x54d   :  { %v5872_v29 = vmul.f32 %v5866_v7, %v10873_v13 }
 0x550   :  { %v5559_v33 = vpop.f32.mrf.mxu0 }
 0x551   :  { %v5560_v2 = vadd.f32 %v5559_v33, %v3814_v62  ;;  %v5874_v62 = vadd.f32 %v5869_v20, %v5868_v43 }
 0x552   :  { %v5660_v3 = vpop.f32.mrf.mxu1 }
 0x553   :  { %v5661_v28 = vadd.f32 %v5660_v3, %v5560_v2  ;;  %v5875_v51 = vadd.f32 %v5874_v62, %v5870_v47  ;;  %6065 = vrot.lane.b32.xlu2 %v13650_v55, %s8548_s17 }
 0x554   :  { %v5714_v40 = vpop.f32.mrf.mxu2 }
 0x555   :  { %v5715_v27 = vadd.f32 %v5714_v40, %v5661_v28  ;;  %v5876_v22 = vadd.f32 %v5875_v51, %v5871_v19 }
 0x557   :  { %v5877_v9 = vadd.f32 %v5876_v22, %v5872_v29 }
 0x55b   :  { %v5753_v48 = vpop.f32.mrf.mxu3 }
 0x55c   :  { %v5754_v59 = vadd.f32 %v5753_v48, %v5715_v27  ;;  %v5822_v18 = vpop.f32.mrf.mxu0 }
 0x55e   :  { %v5823_v49 = vadd.f32 %v5822_v18, %v5754_v59 }
 0x565   :  { %v5859_v41 = vpop.f32.mrf.mxu1 }
 0x566   :  { %v5860_v37 = vadd.f32 %v5859_v41, %v5823_v49 }
 0x568   :  { %v5867_v58 = vmax.f32 %v5860_v37, 0.0 }
 0x56a   :  { %v5873_v30 = vmul.f32 %v5867_v58, %v10877_v25 }
 0x56c   :  { %v5878_v36 = vadd.f32 %v5877_v9, %v5873_v30 }
 0x56e   :  { %5879 = vadd.xlane.f32.xlu1 %v5878_v36 }
 0x587   :  { %6019 = vrot.lane.b32.xlu1 %v13650_v55, %s8549_s18 }
 0x5e1   :  { %v5880_v24 = vpop.xlane.xlu1 %5879 }
 0x5e2   :  { %v5881_v10 = vmul.f32 0.0022222223, %v5880_v24 }
 0x5e4   :  { %v5882_v54 = vsub.f32 %v5862_v5, %v5881_v10  ;;  %v5883_v4 = vsub.f32 %v5863_v39, %v5881_v10  ;;  %v5884_v1 = vsub.f32 %v5864_v16, %v5881_v10  ;;  %v5885_v56 = vsub.f32 %v5865_v23, %v5881_v10  ;;  %v5927_v5 = vpop.permute.xlu2 %5926 }
 0x5e5   :  { %v12093_v35 = vsub.f32 %v5866_v7, %v5881_v10  ;;  %v5887_v26 = vsub.f32 %v5867_v58, %v5881_v10 }
 0x5e6   :  { %v5888_v6 = vmul.f32 %v5882_v54, %v10860_v31  ;;  %v5889_v50 = vmul.f32 %v5883_v4, %v10857_v52  ;;  %v5890_v42 = vmul.f32 %v5884_v1, %v10863_v38  ;;  %v5891_v60 = vmul.f32 %v5885_v56, %v10867_v63 }
 0x5e7   :  { %v5892_v45 = vmul.f32 %v12093_v35, %v10873_v13  ;;  %v5893_v57 = vmul.f32 %v5887_v26, %v10877_v25 }
 0x5e8   :  { %v5894_v34 = vmul.f32 %v5888_v6, %v5888_v6  ;;  %v5895_v33 = vmul.f32 %v5889_v50, %v5889_v50  ;;  %v5896_v17 = vmul.f32 %v5890_v42, %v5890_v42  ;;  %v5897_v15 = vmul.f32 %v5891_v60, %v5891_v60 }
 0x5e9   :  { %v5898_v2 = vmul.f32 %v5892_v45, %v5892_v45  ;;  %v5899_v53 = vmul.f32 %v5893_v57, %v5893_v57 }
 0x5ea   :  { %v5900_v11 = vadd.f32 %v5895_v33, %v5894_v34 }
 0x5ec   :  { %v5901_v32 = vadd.f32 %v5900_v11, %v5896_v17  ;;  %v5937_v43 = vpop.permute.xlu2 %5936 }
 0x5ee   :  { %v5902_v3 = vadd.f32 %v5901_v32, %v5897_v15 }
 0x5f0   :  { %v5903_v14 = vadd.f32 %v5902_v3, %v5898_v2 }
 0x5f2   :  { %v5904_v46 = vadd.f32 %v5903_v14, %v5899_v53 }
 0x5f4   :  { %5905 = vadd.xlane.f32.xlu0 %v5904_v46 }
 0x608   :  { %5973 = vrot.lane.b32.xlu0 %v13650_v55, %s8550_s19 }
 0x667   :  { %v5906_v0 = vpop.xlane.xlu0 %5905 }
 0x668   :  { %v5907_v28 = vmul.f32 0.0022222223, %v5906_v0 }
 0x66a   :  { %v5908_v40 = vadd.f32 1e-05, %v5907_v28 }
 0x66c   :  { %8531 = vrsqrt.f32 %v5908_v40  ;;  %vm5915_vm4 = vweird.f32 %v5908_v40 }
 0x672   :  { %v8532_v39 = vpop.eup %8531 }
 0x673   :  { %v5910_v8 = vmul.f32 %v8532_v39, %v5908_v40  ;;  %vm5916_vm3 = vweird.f32 %v8532_v39 }
 0x674   :  { %vm5917_vm8 = vmor %vm5915_vm4, %vm5916_vm3 }
 0x675   :  { %v5911_v48 = vmul.f32 %v8532_v39, %v5910_v8 }
 0x677   :  { %v5912_v16 = vmul.f32 0.5, %v5911_v48  ;;  %v6339_v48 = vld [vmem:[%s13334_s1 + $0x10] sm:$0xff] }
 0x679   :  { %v5913_v12 = vsub.f32 1.5, %v5912_v16 }
 0x67b   :  { %v5914_v27 = vmul.f32 %v8532_v39, %v5913_v12 }
 0x67d   :  { %v5918_v20 = vsel %vm5917_vm8, %v8532_v39, %v5914_v27 }
 0x67e   :  { %v5919_v23 = vmul.f32 %v5918_v20, %v5882_v54  ;;  %v5920_v59 = vmul.f32 %v5918_v20, %v5883_v4  ;;  %v5924_v18 = vmul.f32 %v5918_v20, %v5887_v26  ;;  %v5921_v37 = vmul.f32 %v5918_v20, %v5884_v1 }
 0x680   :  { %v5929_v47 = vmul.f32 %v5927_v5, %v5919_v23  ;;  %v5930_v7 = vmul.f32 %v5927_v5, %v5920_v59  ;;  %v5934_v62 = vmul.f32 %v5927_v5, %v5924_v18  ;;  %v5931_v22 = vmul.f32 %v5927_v5, %v5921_v37 }
 0x682   :  { %v5939_v19 = vadd.f32 %v5937_v43, %v5929_v47  ;;  %v5940_v49 = vadd.f32 %v5937_v43, %v5930_v7  ;;  %v5944_v41 = vadd.f32 %v5937_v43, %v5934_v62 }
 0x684   :  { %v12109_v51 = vmul.f32 %v5939_v19, %v10860_v31  ;;  %v12112_v29 = vmul.f32 %v5940_v49, %v10857_v52  ;;  %v5922_v52 = vmul.f32 %v5918_v20, %v5885_v56  ;;  %v5941_v31 = vadd.f32 %v5937_v43, %v5931_v22  ;;  %v5974_v56 = vpop.permute.xlu0 %5973 }
 0x686   :  { %6217 = vrot.lane.b32.xlu0 %v12112_v29, %s8543_s8  ;;  %6263 = vrot.lane.b32.xlu1 %v12112_v29, %s8542_s7  ;;  %v5932_v58 = vmul.f32 %v5927_v5, %v5922_v52  ;;  %v12127_v9 = vmul.f32 %v5941_v31, %v10863_v38  ;;  %v5923_v38 = vmul.f32 %v5918_v20, %v12093_v35  ;;  %v12220_v35 = vpop.permute.xlu1 %6019 }
 0x687   :  { %6307 = vrot.lane.b32.xlu2 %v12109_v51, %s8541_s30 }
 0x688   :  { %v5942_v30 = vadd.f32 %v5937_v43, %v5932_v58 }
 0x68a   :  { %v12136_v36 = vmul.f32 %v5942_v30, %v10867_v63  ;;  %v5933_v63 = vmul.f32 %v5927_v5, %v5923_v38  ;;  %v12282_v5 = vand.u32 4294901760, %v12109_v51 }
 0x68c   :  { %v5943_v21 = vadd.f32 %v5937_v43, %v5933_v63  ;;  %v12304_v43 = vsub.f32 %v12109_v51, %v12282_v5 }
 0x68e   :  { %6067 = vrot.lane.b32.xlu0 %v12109_v51, %s8548_s17  ;;  %6113 = vrot.lane.b32.xlu1 %v12109_v51, %s8546_s13  ;;  %v12164_v44 = vmul.f32 %v5943_v21, %v10873_v13  ;;  %v12179_v13 = vmul.f32 %v5944_v41, %v10877_v25  ;;  %v6066_v25 = vpop.permute.xlu2 %6065  ;;  %v6549_v37 = vand.u32 4294901760, %v12304_v43 }
 0x68f   :  { %6309 = vrot.lane.b32.xlu2 %v12112_v29, %s8541_s30 }
 0x696   :  { %6265 = vrot.lane.b32.xlu0 %v12127_v9, %s8542_s7  ;;  %5975 = vrot.lane.b32.xlu1 %v12109_v51, %s8550_s19 }
 0x697   :  { %6261 = vrot.lane.b32.xlu2 %v12109_v51, %s8542_s7 }
 0x69e   :  { %6313 = vrot.lane.b32.xlu0 %v12136_v36, %s8541_s30  ;;  %6219 = vrot.lane.b32.xlu1 %v12127_v9, %s8543_s8 }
 0x69f   :  { %6215 = vrot.lane.b32.xlu2 %v12109_v51, %s8543_s8 }
 0x6a6   :  { %6069 = vrot.lane.b32.xlu0 %v12112_v29, %s8548_s17  ;;  %6115 = vrot.lane.b32.xlu1 %v12112_v29, %s8546_s13 }
 0x6a7   :  { %6169 = vrot.lane.b32.xlu2 %v12109_v51, %s8545_s12 }
 0x6ae   :  { %6175 = vrot.lane.b32.xlu0 %v12136_v36, %s8545_s12  ;;  %6221 = vrot.lane.b32.xlu1 %v12136_v36, %s8543_s8 }
 0x6af   :  { %6171 = vrot.lane.b32.xlu2 %v12112_v29, %s8545_s12 }
 0x6b6   :  { %6071 = vrot.lane.b32.xlu0 %v12127_v9, %s8548_s17  ;;  %5977 = vrot.lane.b32.xlu1 %v12112_v29, %s8550_s19 }
 0x6b7   :  { %6021 = vrot.lane.b32.xlu2 %v12109_v51, %s8549_s18 }
 0x6be   :  { %6315 = vrot.lane.b32.xlu0 %v12164_v44, %s8541_s30  ;;  %6025 = vrot.lane.b32.xlu1 %v12127_v9, %s8549_s18 }
 0x6bf   :  { %6311 = vrot.lane.b32.xlu2 %v12127_v9, %s8541_s30 }
 0x6c6   :  { %6177 = vrot.lane.b32.xlu0 %v12164_v44, %s8545_s12  ;;  %6269 = vrot.lane.b32.xlu1 %v12164_v44, %s8542_s7 }
 0x6c7   :  { %6173 = vrot.lane.b32.xlu2 %v12127_v9, %s8545_s12 }
 0x6ce   :  { %6271 = vrot.lane.b32.xlu0 %v12179_v13, %s8542_s7  ;;  %6317 = vrot.lane.b32.xlu1 %v12179_v13, %s8541_s30 }
 0x6cf   :  { %6267 = vrot.lane.b32.xlu2 %v12136_v36, %s8542_s7 }
 0x6d6   :  { %6027 = vrot.lane.b32.xlu0 %v12136_v36, %s8549_s18  ;;  %6073 = vrot.lane.b32.xlu1 %v12136_v36, %s8548_s17 }
 0x6d7   :  { %6023 = vrot.lane.b32.xlu2 %v12112_v29, %s8549_s18 }
 0x6de   :  { %6121 = vrot.lane.b32.xlu0 %v12164_v44, %s8546_s13  ;;  %6179 = vrot.lane.b32.xlu1 %v12179_v13, %s8545_s12 }
 0x6df   :  { %6117 = vrot.lane.b32.xlu2 %v12127_v9, %s8546_s13 }
 0x6e1   :  { %v6308_v24 = vpop.permute.xlu2 %6307 }
 0x6e6   :  { %5983 = vrot.lane.b32.xlu0 %v12164_v44, %s8550_s19  ;;  %6075 = vrot.lane.b32.xlu1 %v12164_v44, %s8548_s17 }
 0x6e7   :  { %5979 = vrot.lane.b32.xlu2 %v12127_v9, %s8550_s19 }
 0x6e9   :  { %v12205_v10 = vpop.permute.xlu2 %6309 }
 0x6ea   :  { %v6321_v54 = vsel %vm501_vm5, %v6308_v24, %v12205_v10  ;;  %v6550_v24 = vsub.f32 %v12304_v43, %v6549_v37 }
 0x6eb   :  { %v12209_v4 = vand.u32 4294901760, %v6321_v54 }
 0x6ed   :  { %v12212_v1 = vsub.f32 %v6321_v54, %v12209_v4  ;;  %6455 = vmatpush.msrb.mxu2 %v12209_v4  ;;  %6651 = vmatpush.msra.mxu1 %v12209_v4 }
 0x6ee   :  { %6227 = vrot.lane.b32.xlu0 %v13650_v55, %s8543_s8  ;;  %6319 = vrot.lane.b32.xlu1 %v13650_v55, %s8541_s30 }
 0x6ef   :  { %v6525_v6 = vand.u32 4294901760, %v12212_v1  ;;  %6223 = vrot.lane.b32.xlu2 %v12164_v44, %s8543_s8  ;;  %6605 = vmatpush.msra.mxu0 %v12212_v1 }
 0x6f1   :  { %v6526_v50 = vsub.f32 %v12212_v1, %v6525_v6  ;;  %v6262_v42 = vpop.permute.xlu2 %6261 }
 0x6f3   :  { %v6527_v26 = vand.u32 4294901760, %v6526_v50 }
 0x6f5   :  { %6528 = vmatpush.msrb.mxu3 %v6527_v26 }
 0x6f6   :  { %6077 = vrot.lane.b32.xlu0 %v12179_v13, %s8548_s17  ;;  %6181 = vrot.lane.b32.xlu1 %v13650_v55, %s8545_s12 }
 0x6f7   :  { %6119 = vrot.lane.b32.xlu2 %v12136_v36, %s8546_s13 }
 0x6f8   :  { %v12235_v60 = vpop.permute.xlu0 %6217  ;;  %v12237_v34 = vpop.permute.xlu1 %6263 }
 0x6f9   :  { %v6216_v33 = vpop.permute.xlu2 %6215  ;;  %v6275_v45 = vsel %vm454_vm6, %v6262_v42, %v12237_v34 }
 0x6fa   :  { %v6229_v17 = vsel %vm407_vm7, %v6216_v33, %v12235_v60  ;;  %v12243_v11 = vand.u32 4294901760, %v6275_v45 }
 0x6fb   :  { %v12245_v57 = vand.u32 4294901760, %v6229_v17 }
 0x6fc   :  { %v12248_v15 = vsub.f32 %v6275_v45, %v12243_v11  ;;  %6457 = vmatpush.msrb.mxu2 %v12243_v11  ;;  %6653 = vmatpush.msra.mxu1 %v12243_v11  ;;  %v6551_v45 = vand.u32 4294901760, %v6550_v24 }
 0x6fd   :  { %v12253_v32 = vsub.f32 %v6229_v17, %v12245_v57 }
 0x6fe   :  { %6031 = vrot.lane.b32.xlu1 %v12179_v13, %s8549_s18  ;;  %6459 = vmatpush.msrb.mxu2 %v12245_v57  ;;  %v6531_v2 = vand.u32 4294901760, %v12248_v15 }
 0x6ff   :  { %6225 = vrot.lane.b32.xlu2 %v12179_v13, %s8543_s8  ;;  %6608 = vmatpush.msra.mxu0 %v12248_v15  ;;  %v6537_v3 = vand.u32 4294901760, %v12253_v32 }
 0x700   :  { %6655 = vmatpush.msra.mxu1 %v12245_v57  ;;  %v12264_v53 = vpop.permute.xlu0 %6067  ;;  %v12266_v14 = vpop.permute.xlu1 %6113  ;;  %v6532_v46 = vsub.f32 %v12248_v15, %v6531_v2  ;;  %v12437_v15 = vand.u32 4294901760, %v12112_v29 }
 0x701   :  { %v6170_v0 = vpop.permute.xlu2 %6169  ;;  %6611 = vmatpush.msra.mxu0 %v12253_v32  ;;  %v6538_v28 = vsub.f32 %v12253_v32, %v6537_v3  ;;  %v6125_v8 = vsel %vm254_vm10, %v12106_v61, %v12266_v14  ;;  %v6079_v16 = vsel %vm160_vm12, %v6066_v25, %v12264_v53  ;;  %v12294_v61 = vand.u32 4294901760, %v6339_v48 }
 0x702   :  { %v6533_v40 = vand.u32 4294901760, %v6532_v46  ;;  %v12288_v12 = vand.u32 4294901760, %v6125_v8  ;;  %v12298_v59 = vand.u32 4294901760, %v6079_v16 }
 0x703   :  { %v6539_v39 = vand.u32 4294901760, %v6538_v28  ;;  %v12314_v19 = vsub.f32 %v6339_v48, %v12294_v61 }
 0x704   :  { %6534 = vmatpush.msrb.mxu3 %v6533_v40  ;;  %v12311_v62 = vsub.f32 %v6125_v8, %v12288_v12  ;;  %v12322_v41 = vsub.f32 %v6079_v16, %v12298_v59 }
 0x705   :  { %v12337_v58 = vand.u32 4294901760, %v12314_v19 }
 0x706   :  { %6540 = vmatpush.msrb.mxu3 %v6539_v39  ;;  %v6555_v31 = vand.u32 4294901760, %v12311_v62  ;;  %v6561_v54 = vand.u32 4294901760, %v12322_v41 }
 0x707   :  { %5981 = vrot.lane.b32.xlu2 %v12136_v36, %s8550_s19  ;;  %v6475_v26 = vsub.f32 %v12314_v19, %v12337_v58 }
 0x708   :  { %v12290_v27 = vpop.permute.xlu0 %6265  ;;  %v12292_v20 = vpop.permute.xlu1 %5975  ;;  %v6556_v42 = vsub.f32 %v12311_v62, %v6555_v31  ;;  %v6562_v17 = vsub.f32 %v12322_v41, %v6561_v54 }
 0x709   :  { %v12296_v23 = vpop.permute.xlu2 %6171  ;;  %v5987_v7 = vsel %vm66_vm14, %v5974_v56, %v12292_v20  ;;  %v12394_v39 = vand.u32 4294901760, %v6475_v26 }
 0x70a   :  { %v6183_v18 = vsel %vm313_vm9, %v6170_v0, %v12296_v23  ;;  %v12324_v51 = vand.u32 4294901760, %v5987_v7  ;;  %v6557_v28 = vand.u32 4294901760, %v6556_v42 }
 0x70b   :  { %v12306_v47 = vand.u32 4294901760, %v6183_v18 }
 0x70c   :  { %v12346_v63 = vsub.f32 %v5987_v7, %v12324_v51 }
 0x70d   :  { %v12317_v49 = vsub.f32 %v6183_v18, %v12306_v47  ;;  %6461 = vmatpush.msrb.mxu2 %v12306_v47  ;;  %6657 = vmatpush.msra.mxu1 %v12306_v47  ;;  %v6563_v18 = vand.u32 4294901760, %v6562_v17 }
 0x70e   :  { %v6573_v46 = vand.u32 4294901760, %v12346_v63 }
 0x70f   :  { %6029 = vrot.lane.b32.xlu2 %v12164_v44, %s8549_s18  ;;  %6463 = vmatpush.msrb.mxu2 %v12282_v5  ;;  %v6543_v22 = vand.u32 4294901760, %v12317_v49 }
 0x710   :  { %6614 = vmatpush.msra.mxu0 %v12317_v49  ;;  %6659 = vmatpush.msra.mxu1 %v12282_v5  ;;  %v12333_v52 = vpop.permute.xlu1 %6219  ;;  %v12351_v25 = vpop.permute.xlu0 %6313  ;;  %v6574_v7 = vsub.f32 %v12346_v63, %v6573_v46 }
 0x711   :  { %v12339_v30 = vpop.permute.xlu2 %6021  ;;  %6465 = vmatpush.msrb.mxu2 %v12288_v12  ;;  %v6544_v38 = vsub.f32 %v12317_v49, %v6543_v22 }
 0x712   :  { %v6033_v21 = vsel %vm113_vm13, %v12220_v35, %v12339_v30  ;;  %6617 = vmatpush.msra.mxu0 %v12304_v43  ;;  %6661 = vmatpush.msra.mxu1 %v12288_v12  ;;  %v6276_v35 = vsel %vm454_vm6, %v12237_v34, %v12290_v27  ;;  %v6230_v34 = vsel %vm407_vm7, %v12235_v60, %v12333_v52 }
 0x713   :  { %v12359_v56 = vand.u32 4294901760, %v6033_v21  ;;  %6467 = vmatpush.msrb.mxu2 %v12298_v59  ;;  %v6545_v50 = vand.u32 4294901760, %v6544_v38  ;;  %v12385_v0 = vand.u32 4294901760, %v6276_v35  ;;  %v12396_v8 = vand.u32 4294901760, %v6230_v34 }
 0x714   :  { %6620 = vmatpush.msra.mxu0 %v12311_v62  ;;  %6663 = vmatpush.msra.mxu1 %v12298_v59 }
 0x715   :  { %v12373_v33 = vsub.f32 %v6033_v21, %v12359_v56  ;;  %6469 = vmatpush.msrb.mxu2 %v12359_v56  ;;  %6546 = vmatpush.msrb.mxu3 %v6545_v50  ;;  %v12414_v1 = vsub.f32 %v6276_v35, %v12385_v0  ;;  %v12428_v24 = vsub.f32 %v6230_v34, %v12396_v8 }
 0x716   :  { %6623 = vmatpush.msra.mxu0 %v12322_v41  ;;  %6665 = vmatpush.msra.mxu1 %v12359_v56 }
 0x717   :  { %6273 = vrot.lane.b32.xlu2 %v13650_v55, %s8542_s7  ;;  %6471 = vmatpush.msrb.mxu2 %v12324_v51  ;;  %v6567_v60 = vand.u32 4294901760, %v12373_v33  ;;  %v6872_v32 = vand.u32 4294901760, %v12414_v1  ;;  %v6878_v49 = vand.u32 4294901760, %v12428_v24 }
 0x718   :  { %6552 = vmatpush.msrb.mxu3 %v6551_v45  ;;  %6626 = vmatpush.msra.mxu0 %v12373_v33  ;;  %v12392_v40 = vpop.permute.xlu1 %6115 }
 0x719   :  { %6667 = vmatpush.msra.mxu1 %v12324_v51  ;;  %6706 = vmatpush.msra.mxu2 %v6525_v6  ;;  %v12401_v55 = vpop.permute.xlu2 %6311  ;;  %v6568_v48 = vsub.f32 %v12373_v33, %v6567_v60  ;;  %v6126_v21 = vsel %vm254_vm10, %v12266_v14, %v12392_v40  ;;  %v6879_v62 = vsub.f32 %v12428_v24, %v6878_v49 }
 0x71a   :  { %v6322_v16 = vsel %vm501_vm5, %v12205_v10, %v12401_v55  ;;  %6558 = vmatpush.msrb.mxu3 %v6557_v28  ;;  %6629 = vmatpush.msra.mxu0 %v12346_v63  ;;  %v12421_v10 = vpop.permute.xlu0 %6069  ;;  %v12444_v42 = vand.u32 4294901760, %v6126_v21 }
 0x71b   :  { %v12416_v6 = vand.u32 4294901760, %v6322_v16  ;;  %6710 = vmatpush.msra.mxu2 %v6531_v2  ;;  %v6569_v38 = vand.u32 4294901760, %v6568_v48  ;;  %6632 = vmatmul.f32.vlgmr.msra.gmra.mxu0 %v12314_v19  ;;  %v6575_v2 = vand.u32 4294901760, %v6574_v7  ;;  %v6080_v35 = vsel %vm160_vm12, %v12264_v53, %v12421_v10 }
 0x71c   :  { %6564 = vmatpush.msrb.mxu3 %v6563_v18  ;;  %6477 = vmatmul.f32.vlgmr.msrb.gmra.mxu2 %v12394_v39  ;;  %v12467_v34 = vand.u32 4294901760, %v6080_v35 }
 0x71d   :  { %v12431_v50 = vsub.f32 %v6322_v16, %v12416_v6  ;;  %6714 = vmatpush.msra.mxu2 %v6537_v3  ;;  %6796 = vmatpush.msrb.mxu0 %v12416_v6 }
 0x71e   :  { %6570 = vmatpush.msrb.mxu3 %v6569_v38  ;;  %6671 = vmatmul.f32.vlgmr.msra.gmra.mxu1 %v12337_v58  ;;  %v6323_v38 = vsel %vm501_vm5, %v12401_v55, %v12351_v25 }
 0x71f   :  { %v6866_v14 = vand.u32 4294901760, %v12431_v50  ;;  %6718 = vmatpush.msra.mxu2 %v6543_v22  ;;  %6123 = vrot.lane.b32.xlu2 %v12179_v13, %s8546_s13  ;;  %v12465_v22 = vsub.f32 %v12112_v29, %v12437_v15 }
 0x720   :  { %6576 = vmatpush.msrb.mxu3 %v6575_v2  ;;  %6798 = vmatpush.msrb.mxu0 %v12385_v0  ;;  %v12452_v3 = vpop.permute.xlu1 %6221 }
 0x721   :  { %v6867_v26 = vsub.f32 %v12431_v50, %v6866_v14  ;;  %6722 = vmatpush.msra.mxu2 %v6549_v37  ;;  %v12460_v53 = vpop.permute.xlu2 %6173  ;;  %6578 = vmatmul.f32.vlgmr.msrb.gmra.mxu3 %v12294_v61  ;;  %v6873_v37 = vsub.f32 %v12414_v1, %v6872_v32 }
 0x722   :  { %6759 = vmatpush.msra.mxu3 %v12209_v4  ;;  %v6184_v45 = vsel %vm313_vm9, %v12296_v23, %v12460_v53  ;;  %6800 = vmatpush.msrb.mxu0 %v12396_v8  ;;  %v12475_v4 = vsub.f32 %v6126_v21, %v12444_v42  ;;  %v12539_v7 = vpop.permute.xlu0 %6175  ;;  %v8559_v21 = vmov 7  }
 0x723   :  { %v12477_v43 = vand.u32 4294901760, %v6184_v45  ;;  %6726 = vmatpush.msra.mxu2 %v6555_v31  ;;  %v6868_v29 = vand.u32 4294901760, %v6867_v26  ;;  %v6890_v31 = vand.u32 4294901760, %v12465_v22  ;;  %v6874_v41 = vand.u32 4294901760, %v6873_v37  ;;  %8528 = vset.pattern.permute.xlu0 %v8559_v21 }
 0x724   :  { %6761 = vmatpush.msra.mxu3 %v12243_v11  ;;  %v12496_v11 = vsub.f32 %v6080_v35, %v12467_v34 }
 0x725   :  { %v12486_v23 = vsub.f32 %v6184_v45, %v12477_v43  ;;  %6730 = vmatpush.msra.mxu2 %v6561_v54  ;;  %6802 = vmatpush.msrb.mxu0 %v12477_v43  ;;  %v6896_v54 = vand.u32 4294901760, %v12475_v4  ;;  %v6891_v28 = vsub.f32 %v12465_v22, %v6890_v31  ;;  %v12559_v45 = vand.u32 4294901760, %v6323_v38 }
 0x726   :  { %6763 = vmatpush.msra.mxu3 %v12245_v57  ;;  %6869 = vmatpush.msrb.mxu1 %v6868_v29 }
 0x727   :  { %6734 = vmatpush.msra.mxu2 %v6567_v60  ;;  %v6884_v57 = vand.u32 4294901760, %v12486_v23  ;;  %5985 = vrot.lane.b32.xlu2 %v12179_v13, %s8550_s19  ;;  %v6880_v60 = vand.u32 4294901760, %v6879_v62  ;;  %v6897_v16 = vsub.f32 %v12475_v4, %v6896_v54  ;;  %v6185_v62 = vsel %vm313_vm9, %v12460_v53, %v12539_v7 }
 0x728   :  { %6765 = vmatpush.msra.mxu3 %v12306_v47  ;;  %6804 = vmatpush.msrb.mxu0 %v12437_v15  ;;  %v12507_v17 = vpop.permute.xlu1 %5977 }
 0x729   :  { %6875 = vmatpush.msrb.mxu1 %v6874_v41  ;;  %6738 = vmatpush.msra.mxu2 %v6573_v46  ;;  %v12511_v33 = vpop.permute.xlu2 %6267  ;;  %v6885_v47 = vsub.f32 %v12486_v23, %v6884_v57  ;;  %v5988_v63 = vsel %vm66_vm14, %v12292_v20, %v12507_v17  ;;  %v6902_v46 = vand.u32 4294901760, %v12496_v11  ;;  %v6892_v20 = vand.u32 4294901760, %v6891_v28 }
 0x72a   :  { %6767 = vmatpush.msra.mxu3 %v12282_v5  ;;  %6806 = vmatpush.msrb.mxu0 %v12444_v42  ;;  %v12531_v5 = vand.u32 4294901760, %v5988_v63  ;;  %v6277_v35 = vsel %vm454_vm6, %v12290_v27, %v12511_v33  ;;  %v6231_v27 = vsel %vm407_vm7, %v12333_v52, %v12452_v3  ;;  %v12582_v52 = vsub.f32 %v6323_v38, %v12559_v45  ;;  %v12595_v53 = vpop.permute.xlu0 %6071 }
 0x72b   :  { %6881 = vmatpush.msrb.mxu1 %v6880_v60  ;;  %6946 = vmatpush.msrb.mxu2 %v12431_v50  ;;  %v6886_v48 = vand.u32 4294901760, %v6885_v47  ;;  %v6903_v18 = vsub.f32 %v12496_v11, %v6902_v46  ;;  %v12584_v41 = vand.u32 4294901760, %v6231_v27  ;;  %v12590_v47 = vand.u32 4294901760, %v6185_v62 }
 0x72c   :  { %6769 = vmatpush.msra.mxu3 %v12288_v12  ;;  %6808 = vmatpush.msrb.mxu0 %v12467_v34  ;;  %v6898_v12 = vand.u32 4294901760, %v6897_v16 }
 0x72d   :  { %6949 = vmatpush.msrb.mxu2 %v12414_v1  ;;  %6887 = vmatpush.msrb.mxu1 %v6886_v48  ;;  %v6904_v26 = vand.u32 4294901760, %v6903_v18  ;;  %v7207_v18 = vand.u32 4294901760, %v12582_v52  ;;  %v12627_v50 = vsub.f32 %v6185_v62, %v12590_v47 }
 0x72e   :  { %6771 = vmatpush.msra.mxu3 %v12298_v59  ;;  %6740 = vmatmul.f32.vlgmr.msra.gmra.mxu2 %v12294_v61  ;;  %v12547_v59 = vsub.f32 %v5988_v63, %v12531_v5 }
 0x72f   :  { %6952 = vmatpush.msrb.mxu2 %v12428_v24  ;;  %6893 = vmatpush.msrb.mxu1 %v6892_v20  ;;  %v12610_v20 = vand.u32 4294901760, %v12127_v9  ;;  %v7208_v1 = vsub.f32 %v12582_v52, %v7207_v18 }
 0x730   :  { %6773 = vmatpush.msra.mxu3 %v12359_v56  ;;  %v8535_v56 = vld [vmem:[%s13335_s2] sm:$0xff]  ;;  %v6914_v37 = vand.u32 4294901760, %v12547_v59 }
 0x731   :  { %6955 = vmatpush.msrb.mxu2 %v12486_v23  ;;  %v6024_v2 = vpop.permute.xlu2 %6023  ;;  %6899 = vmatpush.msrb.mxu1 %v6898_v12  ;;  %v12614_v12 = vsub.f32 %v6231_v27, %v12584_v41 }
 0x732   :  { %6775 = vmatpush.msra.mxu3 %v12324_v51  ;;  %v6034_v55 = vsel %vm113_vm13, %v12339_v30, %v6024_v2  ;;  %6437 = vperm.xlu0 %8528, %v8535_v56   ;;  %v12569_v51 = vand.u32 4294901760, %v6277_v35  ;;  %v6915_v16 = vsub.f32 %v12547_v59, %v6914_v37  ;;  %v12648_v56 = vsub.f32 %v12127_v9, %v12610_v20  ;;  %v12674_v23 = vpop.permute.xlu0 %6315 }
 0x733   :  { %v12561_v29 = vand.u32 4294901760, %v6034_v55  ;;  %6958 = vmatpush.msrb.mxu2 %v12465_v22  ;;  %6905 = vmatpush.msrb.mxu1 %v6904_v26  ;;  %v7225_v9 = vand.u32 4294901760, %v12627_v50 }
 0x734   :  { %6992 = vmatpush.msrb.mxu3 %v12416_v6  ;;  %v12593_v28 = vsub.f32 %v6277_v35, %v12569_v51  ;;  %v12621_v35 = vpop.permute.xlu1 %6025  ;;  %v7231_v22 = vand.u32 4294901760, %v12648_v56 }
 0x735   :  { %6777 = vmatmul.f32.vlgmr.msra.gmra.mxu3 %v12294_v61  ;;  %v12572_v30 = vsub.f32 %v6034_v55, %v12561_v29  ;;  %6961 = vmatpush.msrb.mxu2 %v12475_v4 }
 0x736   :  { %6994 = vmatpush.msrb.mxu3 %v12385_v0  ;;  %6810 = vmatpush.msrb.mxu0 %v12561_v29  ;;  %v7213_v55 = vand.u32 4294901760, %v12593_v28 }
 0x737   :  { %6964 = vmatpush.msrb.mxu2 %v12496_v11  ;;  %v6908_v60 = vand.u32 4294901760, %v12572_v30 }
 0x738   :  { %6996 = vmatpush.msrb.mxu3 %v12396_v8  ;;  %6812 = vmatpush.msrb.mxu0 %v12531_v5 }
 0x739   :  { %6967 = vmatpush.msrb.mxu2 %v12572_v30  ;;  %v12599_v63 = vpop.permute.xlu2 %6117  ;;  %v6909_v48 = vsub.f32 %v12572_v30, %v6908_v60  ;;  %6818 = vmatmul.f32.vlgmr.msrb.gmra.mxu0 %v12394_v39 }
 0x73a   :  { %6998 = vmatpush.msrb.mxu3 %v12477_v43  ;;  %7047 = vmatpush.msra.mxu0 %v6866_v14  ;;  %v6127_v38 = vsel %vm254_vm10, %v12392_v40, %v12599_v63  ;;  %v6081_v14 = vsel %vm160_vm12, %v12421_v10, %v12595_v53  ;;  %v6916_v40 = vand.u32 4294901760, %v6915_v16  ;;  %v6035_v10 = vsel %vm113_vm13, %v6024_v2, %v12621_v35 }
 0x73b   :  { %6970 = vmatpush.msrb.mxu2 %v12547_v59  ;;  %v6910_v21 = vand.u32 4294901760, %v6909_v48  ;;  %v12634_v26 = vand.u32 4294901760, %v6127_v38  ;;  %v12650_v24 = vand.u32 4294901760, %v6081_v14  ;;  %v7214_v2 = vsub.f32 %v12593_v28, %v7213_v55 }
 0x73c   :  { %7000 = vmatpush.msrb.mxu3 %v12437_v15  ;;  %7051 = vmatpush.msra.mxu0 %v6872_v32  ;;  %v7219_v32 = vand.u32 4294901760, %v12614_v12  ;;  %v12663_v27 = vand.u32 4294901760, %v6035_v10  ;;  %v7226_v16 = vsub.f32 %v12627_v50, %v7225_v9 }
 0x73d   :  { %7137 = vmatpush.msra.mxu2 %v12559_v45  ;;  %6911 = vmatpush.msrb.mxu1 %v6910_v21  ;;  %v12666_v62 = vsub.f32 %v6127_v38, %v12634_v26 }
 0x73e   :  { %7002 = vmatpush.msrb.mxu3 %v12444_v42  ;;  %7055 = vmatpush.msra.mxu0 %v6878_v49  ;;  %v7220_v48 = vsub.f32 %v12614_v12, %v7219_v32  ;;  %v12695_v38 = vsub.f32 %v6035_v10, %v12663_v27  ;;  %v7227_v21 = vand.u32 4294901760, %v7226_v16 }
 0x73f   :  { %7139 = vmatpush.msra.mxu2 %v12569_v51  ;;  %6917 = vmatpush.msrb.mxu1 %v6916_v40  ;;  %v7237_v4 = vand.u32 4294901760, %v12666_v62 }
 0x740   :  { %7004 = vmatpush.msrb.mxu3 %v12467_v34  ;;  %7059 = vmatpush.msra.mxu0 %v6884_v57  ;;  %v7209_v57 = vand.u32 4294901760, %v7208_v1 }
 0x741   :  { %7141 = vmatpush.msra.mxu2 %v12584_v41  ;;  %7100 = vmatpush.msra.mxu1 %v12416_v6  ;;  %v12657_v49 = vpop.permute.xlu2 %5979  ;;  %v7238_v30 = vsub.f32 %v12666_v62, %v7237_v4 }
 0x742   :  { %7006 = vmatpush.msrb.mxu3 %v12561_v29  ;;  %7063 = vmatpush.msra.mxu0 %v6890_v31  ;;  %v5989_v6 = vsel %vm66_vm14, %v12507_v17, %v12657_v49  ;;  %v12683_v31 = vsub.f32 %v6081_v14, %v12650_v24  ;;  %v12722_v14 = vpop.permute.xlu1 %6269 }
 0x743   :  { %7143 = vmatpush.msra.mxu2 %v12590_v47  ;;  %7102 = vmatpush.msra.mxu1 %v12385_v0  ;;  %v12688_v17 = vand.u32 4294901760, %v5989_v6  ;;  %v7215_v0 = vand.u32 4294901760, %v7214_v2  ;;  %v7239_v1 = vand.u32 4294901760, %v7238_v30 }
 0x744   :  { %7008 = vmatpush.msrb.mxu3 %v12531_v5  ;;  %7067 = vmatpush.msra.mxu0 %v6896_v54  ;;  %v7221_v54 = vand.u32 4294901760, %v7220_v48  ;;  %v7243_v11 = vand.u32 4294901760, %v12683_v31 }
 0x745   :  { %7145 = vmatpush.msra.mxu2 %v12610_v20  ;;  %7104 = vmatpush.msra.mxu1 %v12396_v8  ;;  %v7232_v8 = vsub.f32 %v12648_v56, %v7231_v22 }
 0x746   :  { %7210 = vmatpush.msra.mxu3 %v7209_v57  ;;  %7071 = vmatpush.msra.mxu0 %v6902_v46  ;;  %v12710_v46 = vsub.f32 %v5989_v6, %v12688_v17  ;;  %v7244_v59 = vsub.f32 %v12683_v31, %v7243_v11 }
 0x747   :  { %7147 = vmatpush.msra.mxu2 %v12634_v26  ;;  %7106 = vmatpush.msra.mxu1 %v12477_v43 }
 0x748   :  { %7216 = vmatpush.msra.mxu3 %v7215_v0  ;;  %7075 = vmatpush.msra.mxu0 %v6908_v60  ;;  %v7249_v60 = vand.u32 4294901760, %v12695_v38  ;;  %v7255_v40 = vand.u32 4294901760, %v12710_v46  ;;  %v7245_v10 = vand.u32 4294901760, %v7244_v59 }
 0x749   :  { %7149 = vmatpush.msra.mxu2 %v12650_v24  ;;  %7108 = vmatpush.msra.mxu1 %v12437_v15  ;;  %v12713_v43 = vpop.permute.xlu2 %6223  ;;  %v7233_v15 = vand.u32 4294901760, %v7232_v8 }
 0x74a   :  { %7222 = vmatpush.msra.mxu3 %v7221_v54  ;;  %7079 = vmatpush.msra.mxu0 %v6914_v37  ;;  %v12730_v37 = vpop.permute.xlu0 %6177  ;;  %v7256_v6 = vsub.f32 %v12710_v46, %v7255_v40 }
 0x74b   :  { %7151 = vmatpush.msra.mxu2 %v12663_v27  ;;  %7110 = vmatpush.msra.mxu1 %v12444_v42  ;;  %v7250_v42 = vsub.f32 %v12695_v38, %v7249_v60 }
 0x74c   :  { %7228 = vmatpush.msra.mxu3 %v7227_v21  ;;  %7287 = vmatpush.msrb.mxu0 %v12582_v52 }
 0x74d   :  { %7153 = vmatpush.msra.mxu2 %v12688_v17  ;;  %7112 = vmatpush.msra.mxu1 %v12467_v34  ;;  %v7251_v52 = vand.u32 4294901760, %v7250_v42  ;;  %v6324_v34 = vsel %vm501_vm5, %v12351_v25, %v12674_v23  ;;  %v6278_v25 = vsel %vm454_vm6, %v12511_v33, %v12722_v14 }
 0x74e   :  { %7234 = vmatpush.msra.mxu3 %v7233_v15  ;;  %6973 = vmatmul.f32.vlgmr.msrb.gmra.mxu2 %v12314_v19 }
 0x74f   :  { %7290 = vmatpush.msrb.mxu0 %v12593_v28  ;;  %7388 = vmatpush.msrb.mxu2 %v7207_v18  ;;  %v7257_v28 = vand.u32 4294901760, %v7256_v6  ;;  %v12766_v18 = vand.u32 4294901760, %v6324_v34 }
 0x750   :  { %7240 = vmatpush.msra.mxu3 %v7239_v1  ;;  %7114 = vmatpush.msra.mxu1 %v12561_v29  ;;  %v12759_v29 = vpop.permute.xlu1 %6317 }
 0x751   :  { %7293 = vmatpush.msrb.mxu0 %v12614_v12  ;;  %7392 = vmatpush.msrb.mxu2 %v7213_v55  ;;  %v12746_v2 = vpop.permute.xlu2 %6119  ;;  %v6232_v12 = vsel %vm407_vm7, %v12452_v3, %v12713_v43  ;;  %v12790_v55 = vsub.f32 %v6324_v34, %v12766_v18  ;;  %v6186_v3 = vsel %vm313_vm9, %v12539_v7, %v12730_v37 }
 0x752   :  { %7246 = vmatpush.msra.mxu3 %v7245_v10  ;;  %7116 = vmatpush.msra.mxu1 %v12531_v5  ;;  %v12771_v5 = vpop.permute.xlu0 %6271  ;;  %v6325_v15 = vsel %vm501_vm5, %v12674_v23, %v12759_v29 }
 0x753   :  { %7296 = vmatpush.msrb.mxu0 %v12627_v50  ;;  %7012 = vmatmul.f32.vlgmr.msrb.gmra.mxu3 %v12337_v58  ;;  %v12782_v50 = vand.u32 4294901760, %v6278_v25  ;;  %v7548_v7 = vand.u32 4294901760, %v12790_v55  ;;  %v6279_v23 = vsel %vm454_vm6, %v12722_v14, %v12771_v5 }
 0x754   :  { %7396 = vmatpush.msrb.mxu2 %v7219_v32  ;;  %7252 = vmatpush.msra.mxu3 %v7251_v52  ;;  %v12804_v32 = vand.u32 4294901760, %v6186_v3  ;;  %v12926_v52 = vand.u32 4294901760, %v6325_v15 }
 0x755   :  { %6919 = vmatmul.f32.vlgmr.msrb.gmra.mxu1 %v12294_v61  ;;  %7299 = vmatpush.msrb.mxu0 %v12648_v56  ;;  %v12807_v56 = vsub.f32 %v6278_v25, %v12782_v50  ;;  %v12935_v25 = vand.u32 4294901760, %v6279_v23 }
 0x756   :  { %7333 = vmatpush.msrb.mxu1 %v12559_v45  ;;  %7400 = vmatpush.msrb.mxu2 %v7225_v9  ;;  %v6128_v9 = vsel %vm254_vm10, %v12599_v63, %v12746_v2  ;;  %v12834_v63 = vsub.f32 %v6186_v3, %v12804_v32 }
 0x757   :  { %7258 = vmatpush.msra.mxu3 %v7257_v28  ;;  %7302 = vmatpush.msrb.mxu0 %v12666_v62  ;;  %v12826_v62 = vand.u32 4294901760, %v12136_v36 }
 0x758   :  { %7335 = vmatpush.msrb.mxu1 %v12569_v51  ;;  %7404 = vmatpush.msrb.mxu2 %v7231_v22  ;;  %v7554_v22 = vand.u32 4294901760, %v12807_v56 }
 0x759   :  { %7441 = vmatpush.msrb.mxu3 %v12559_v45  ;;  %7305 = vmatpush.msrb.mxu0 %v12683_v31  ;;  %v12787_v33 = vpop.permute.xlu2 %6225  ;;  %v12797_v45 = vand.u32 4294901760, %v6232_v12  ;;  %v7549_v31 = vsub.f32 %v12790_v55, %v7548_v7  ;;  %v12858_v0 = vsub.f32 %v12136_v36, %v12826_v62 }
 0x75a   :  { %7337 = vmatpush.msrb.mxu1 %v12584_v41  ;;  %7408 = vmatpush.msrb.mxu2 %v7237_v4  ;;  %v12828_v57 = vpop.permute.xlu0 %6027  ;;  %v7555_v36 = vsub.f32 %v12807_v56, %v7554_v22  ;;  %v6233_v14 = vsel %vm407_vm7, %v12713_v43, %v12787_v33 }
 0x75b   :  { %7443 = vmatpush.msrb.mxu3 %v12569_v51  ;;  %7081 = vmatmul.f32.vlgmr.msra.gmra.mxu0 %v12294_v61  ;;  %v12812_v51 = vpop.permute.xlu1 %6073  ;;  %v7550_v8 = vand.u32 4294901760, %v7549_v31 }
 0x75c   :  { %7308 = vmatpush.msrb.mxu0 %v12695_v38  ;;  %7339 = vmatpush.msrb.mxu1 %v12590_v47  ;;  %v6082_v48 = vsel %vm160_vm12, %v12595_v53, %v12812_v51  ;;  %v6036_v53 = vsel %vm113_vm13, %v12621_v35, %v12828_v57 }
 0x75d   :  { %7412 = vmatpush.msrb.mxu2 %v7243_v11  ;;  %7445 = vmatpush.msrb.mxu3 %v12584_v41  ;;  %v12821_v41 = vsub.f32 %v6232_v12, %v12797_v45  ;;  %v12861_v38 = vand.u32 4294901760, %v6082_v48  ;;  %v12874_v4 = vand.u32 4294901760, %v6036_v53  ;;  %v7572_v11 = vand.u32 4294901760, %v12858_v0 }
 0x75e   :  { %7118 = vmatmul.f32.vlgmr.msra.gmra.mxu1 %v12294_v61  ;;  %7311 = vmatpush.msrb.mxu0 %v12710_v46 }
 0x75f   :  { %7341 = vmatpush.msrb.mxu1 %v12610_v20  ;;  %7416 = vmatpush.msrb.mxu2 %v7249_v60  ;;  %v7560_v16 = vand.u32 4294901760, %v12821_v41  ;;  %v12888_v46 = vsub.f32 %v6082_v48, %v12861_v38  ;;  %v12900_v60 = vsub.f32 %v6036_v53, %v12874_v4  ;;  %v12948_v48 = vsub.f32 %v6325_v15, %v12926_v52 }
 0x760   :  { %7447 = vmatpush.msrb.mxu3 %v12590_v47  ;;  %7478 = vmatpush.msra.mxu0 %v12766_v18  ;;  %v12839_v47 = vand.u32 4294901760, %v6128_v9  ;;  %v12952_v53 = vand.u32 4294901760, %v6233_v14 }
 0x761   :  { %7343 = vmatpush.msrb.mxu1 %v12634_v26  ;;  %7420 = vmatpush.msrb.mxu2 %v7255_v40  ;;  %v7573_v40 = vsub.f32 %v12858_v0, %v7572_v11  ;;  %v7584_v1 = vand.u32 4294901760, %v12888_v46  ;;  %v7590_v34 = vand.u32 4294901760, %v12900_v60 }
 0x762   :  { %7449 = vmatpush.msrb.mxu3 %v12610_v20  ;;  %7159 = vmatmul.f32.vlgmr.msra.gmra.mxu2 %v12394_v39  ;;  %v12854_v20 = vpop.permute.xlu2 %5981  ;;  %v12866_v35 = vsub.f32 %v6128_v9, %v12839_v47  ;;  %v12950_v31 = vpop.permute.xlu0 %6121  ;;  %v12984_v15 = vsub.f32 %v6233_v14, %v12952_v53 }
 0x763   :  { %7480 = vmatpush.msra.mxu0 %v12782_v50  ;;  %7628 = vmatpush.msra.mxu2 %v12790_v55  ;;  %v5990_v54 = vsel %vm66_vm14, %v12657_v49, %v12854_v20  ;;  %v7556_v49 = vand.u32 4294901760, %v7555_v36  ;;  %v12907_v59 = vpop.permute.xlu1 %6179  ;;  %v7574_v28 = vand.u32 4294901760, %v7573_v40  ;;  %v7585_v12 = vsub.f32 %v12888_v46, %v7584_v1 }
 0x764   :  { %7345 = vmatpush.msrb.mxu1 %v12650_v24  ;;  %7451 = vmatpush.msrb.mxu3 %v12634_v26  ;;  %v7566_v26 = vand.u32 4294901760, %v12834_v63  ;;  %v12891_v21 = vand.u32 4294901760, %v5990_v54  ;;  %v7578_v30 = vand.u32 4294901760, %v12866_v35  ;;  %v6187_v3 = vsel %vm313_vm9, %v12730_v37, %v12907_v59 }
 0x765   :  { %7482 = vmatpush.msra.mxu0 %v12797_v45  ;;  %7631 = vmatpush.msra.mxu2 %v12807_v56  ;;  %v7591_v37 = vsub.f32 %v12900_v60, %v7590_v34  ;;  %v12962_v36 = vsub.f32 %v6279_v23, %v12935_v25 }
 0x766   :  { %7347 = vmatpush.msrb.mxu1 %v12663_v27  ;;  %7453 = vmatpush.msrb.mxu3 %v12650_v24  ;;  %v7561_v24 = vsub.f32 %v12821_v41, %v7560_v16  ;;  %v12920_v42 = vsub.f32 %v5990_v54, %v12891_v21  ;;  %v7579_v6 = vsub.f32 %v12866_v35, %v7578_v30  ;;  %v12964_v54 = vand.u32 4294901760, %v6187_v3 }
 0x767   :  { %7484 = vmatpush.msra.mxu0 %v12804_v32  ;;  %7634 = vmatpush.msra.mxu2 %v12821_v41  ;;  %v7592_v56 = vand.u32 4294901760, %v7591_v37  ;;  %v7895_v40 = vand.u32 4294901760, %v12962_v36 }
 0x768   :  { %7349 = vmatpush.msrb.mxu1 %v12688_v17  ;;  %7455 = vmatpush.msrb.mxu3 %v12663_v27  ;;  %v7567_v27 = vsub.f32 %v12834_v63, %v7566_v26  ;;  %v7580_v43 = vand.u32 4294901760, %v7579_v6  ;;  %v7596_v9 = vand.u32 4294901760, %v12920_v42 }
 0x769   :  { %7486 = vmatpush.msra.mxu0 %v12826_v62  ;;  %7637 = vmatpush.msra.mxu2 %v12834_v63 }
 0x76a   :  { %7551 = vmatpush.msra.mxu1 %v7550_v8  ;;  %7457 = vmatpush.msrb.mxu3 %v12688_v17  ;;  %v7562_v17 = vand.u32 4294901760, %v7561_v24  ;;  %v7568_v10 = vand.u32 4294901760, %v7567_v27  ;;  %v7586_v8 = vand.u32 4294901760, %v7585_v12  ;;  %v7597_v55 = vsub.f32 %v12920_v42, %v7596_v9 }
 0x76b   :  { %7260 = vmatmul.f32.vlgmr.msra.gmra.mxu3 %v12294_v61  ;;  %7488 = vmatpush.msra.mxu0 %v12839_v47  ;;  %v12968_v24 = vpop.permute.xlu1 %6075  ;;  %v6129_v27 = vsel %vm254_vm10, %v12746_v2, %v12950_v31 }
 0x76c   :  { %7557 = vmatpush.msra.mxu1 %v7556_v49  ;;  %7640 = vmatpush.msra.mxu2 %v12858_v0  ;;  %v7889_v49 = vand.u32 4294901760, %v12948_v48  ;;  %v6083_v2 = vsel %vm160_vm12, %v12812_v51, %v12968_v24  ;;  %v13000_v23 = vand.u32 4294901760, %v6129_v27  ;;  %v7598_v41 = vand.u32 4294901760, %v7597_v55 }
 0x76d   :  { %7674 = vmatpush.msra.mxu3 %v12766_v18  ;;  %7490 = vmatpush.msra.mxu0 %v12861_v38  ;;  %v13018_v63 = vand.u32 4294901760, %v6083_v2 }
 0x76e   :  { %7563 = vmatpush.msra.mxu1 %v7562_v17  ;;  %7643 = vmatpush.msra.mxu2 %v12866_v35  ;;  %v12993_v17 = vsub.f32 %v6187_v3, %v12964_v54 }
 0x76f   :  { %7676 = vmatpush.msra.mxu3 %v12782_v50  ;;  %7492 = vmatpush.msra.mxu0 %v12874_v4 }
 0x770   :  { %7569 = vmatpush.msra.mxu1 %v7568_v10  ;;  %7646 = vmatpush.msra.mxu2 %v12888_v46  ;;  %v7901_v10 = vand.u32 4294901760, %v12984_v15  ;;  %v7907_v14 = vand.u32 4294901760, %v12993_v17 }
 0x771   :  { %7678 = vmatpush.msra.mxu3 %v12797_v45  ;;  %7494 = vmatpush.msra.mxu0 %v12891_v21 }
 0x772   :  { %7575 = vmatpush.msra.mxu1 %v7574_v28  ;;  %7649 = vmatpush.msra.mxu2 %v12900_v60 }
 0x773   :  { %7680 = vmatpush.msra.mxu3 %v12804_v32  ;;  %7314 = vmatmul.f32.vlgmr.msrb.gmra.mxu0 %v12314_v19  ;;  %v6320_v55 = vpop.permute.xlu1 %6319 }
 0x774   :  { %7729 = vmatpush.msrb.mxu0 %v7548_v7  ;;  %7581 = vmatpush.msra.mxu1 %v7580_v43  ;;  %v12977_v7 = vand.u32 4294901760, %v12164_v44 }
 0x775   :  { %7652 = vmatpush.msra.mxu2 %v12920_v42  ;;  %7682 = vmatpush.msra.mxu3 %v12826_v62 }
 0x776   :  { %7422 = vmatmul.f32.vlgmr.msrb.gmra.mxu2 %v12294_v61  ;;  %7733 = vmatpush.msrb.mxu0 %v7554_v22  ;;  %v12987_v22 = vpop.permute.xlu2 %6029  ;;  %v13016_v6 = vsub.f32 %v12164_v44, %v12977_v7  ;;  %v13031_v44 = vsub.f32 %v6129_v27, %v13000_v23 }
 0x777   :  { %7819 = vmatpush.msrb.mxu2 %v12926_v52  ;;  %7587 = vmatpush.msra.mxu1 %v7586_v8  ;;  %v6037_v51 = vsel %vm113_vm13, %v12828_v57, %v12987_v22  ;;  %v7896_v57 = vsub.f32 %v12962_v36, %v7895_v40 }
 0x778   :  { %7684 = vmatpush.msra.mxu3 %v12839_v47  ;;  %7737 = vmatpush.msrb.mxu0 %v7560_v16  ;;  %v7890_v16 = vsub.f32 %v12948_v48, %v7889_v49  ;;  %v13036_v12 = vand.u32 4294901760, %v6037_v51  ;;  %v7913_v3 = vand.u32 4294901760, %v13016_v6 }
 0x779   :  { %7821 = vmatpush.msrb.mxu2 %v12935_v25  ;;  %7593 = vmatpush.msra.mxu1 %v7592_v56  ;;  %v7897_v35 = vand.u32 4294901760, %v7896_v57 }
 0x77a   :  { %7686 = vmatpush.msra.mxu3 %v12861_v38  ;;  %7741 = vmatpush.msrb.mxu0 %v7566_v26  ;;  %v13021_v26 = vpop.permute.xlu0 %5983  ;;  %v7891_v0 = vand.u32 4294901760, %v7890_v16  ;;  %v13060_v43 = vsub.f32 %v6037_v51, %v13036_v12 }
 0x77b   :  { %7459 = vmatmul.f32.vlgmr.msrb.gmra.mxu3 %v12294_v61  ;;  %7823 = vmatpush.msrb.mxu2 %v12952_v53  ;;  %v5991_v28 = vsel %vm66_vm14, %v12854_v20, %v13021_v26  ;;  %v13048_v20 = vsub.f32 %v6083_v2, %v13018_v63 }
 0x77c   :  { %7599 = vmatpush.msra.mxu1 %v7598_v41  ;;  %7688 = vmatpush.msra.mxu3 %v12874_v4 }
 0x77d   :  { %7353 = vmatmul.f32.vlgmr.msrb.gmra.mxu1 %v12337_v58  ;;  %7745 = vmatpush.msrb.mxu0 %v7572_v11  ;;  %v7902_v11 = vsub.f32 %v12984_v15, %v7901_v10  ;;  %v7925_v37 = vand.u32 4294901760, %v13048_v20 }
 0x77e   :  { %7782 = vmatpush.msrb.mxu1 %v12766_v18  ;;  %7825 = vmatpush.msrb.mxu2 %v12964_v54  ;;  %v13052_v18 = vand.u32 4294901760, %v5991_v28  ;;  %v6274_v56 = vpop.permute.xlu2 %6273 }
 0x77f   :  { %7690 = vmatpush.msra.mxu3 %v12891_v21  ;;  %7749 = vmatpush.msrb.mxu0 %v7578_v30  ;;  %v7908_v30 = vsub.f32 %v12993_v17, %v7907_v14  ;;  %v7903_v46 = vand.u32 4294901760, %v7902_v11 }
 0x780   :  { %7784 = vmatpush.msrb.mxu1 %v12782_v50  ;;  %7827 = vmatpush.msrb.mxu2 %v12977_v7  ;;  %v7919_v50 = vand.u32 4294901760, %v13031_v44 }
 0x781   :  { %7892 = vmatpush.msrb.mxu3 %v7891_v0  ;;  %7753 = vmatpush.msrb.mxu0 %v7584_v1  ;;  %v7914_v1 = vsub.f32 %v13016_v6, %v7913_v3  ;;  %v7909_v60 = vand.u32 4294901760, %v7908_v30 }
 0x782   :  { %7786 = vmatpush.msrb.mxu1 %v12797_v45  ;;  %7829 = vmatpush.msrb.mxu2 %v13000_v23  ;;  %v13074_v45 = vsub.f32 %v5991_v28, %v13052_v18 }
 0x783   :  { %7898 = vmatpush.msrb.mxu3 %v7897_v35  ;;  %7757 = vmatpush.msrb.mxu0 %v7590_v34  ;;  %v7931_v34 = vand.u32 4294901760, %v13060_v43  ;;  %v7915_v8 = vand.u32 4294901760, %v7914_v1 }
 0x784   :  { %7788 = vmatpush.msrb.mxu1 %v12804_v32  ;;  %7831 = vmatpush.msrb.mxu2 %v13018_v63  ;;  %v7920_v32 = vsub.f32 %v13031_v44, %v7919_v50  ;;  %v7937_v42 = vand.u32 4294901760, %v13074_v45 }
 0x785   :  { %7904 = vmatpush.msrb.mxu3 %v7903_v46  ;;  %7761 = vmatpush.msrb.mxu0 %v7596_v9  ;;  %v7932_v27 = vsub.f32 %v13060_v43, %v7931_v34 }
 0x786   :  { %7790 = vmatpush.msrb.mxu1 %v12826_v62  ;;  %7833 = vmatpush.msrb.mxu2 %v13036_v12  ;;  %v7926_v62 = vsub.f32 %v13048_v20, %v7925_v37  ;;  %v7921_v9 = vand.u32 4294901760, %v7920_v32  ;;  %v7938_v2 = vsub.f32 %v13074_v45, %v7937_v42 }
 0x787   :  { %7910 = vmatpush.msrb.mxu3 %v7909_v60  ;;  %7500 = vmatmul.f32.vlgmr.msra.gmra.mxu0 %v12394_v39 }
 0x788   :  { %7969 = vmatpush.msra.mxu0 %v12948_v48  ;;  %7792 = vmatpush.msrb.mxu1 %v12839_v47  ;;  %v7927_v47 = vand.u32 4294901760, %v7926_v62  ;;  %v7933_v48 = vand.u32 4294901760, %v7932_v27 }
 0x789   :  { %7835 = vmatpush.msrb.mxu2 %v13052_v18  ;;  %7916 = vmatpush.msrb.mxu3 %v7915_v8 }
 0x78a   :  { %7655 = vmatmul.f32.vlgmr.msra.gmra.mxu2 %v12314_v19  ;;  %7972 = vmatpush.msra.mxu0 %v12962_v36  ;;  %v6326_v36 = vsel %vm501_vm5, %v12759_v29, %v6320_v55 }
 0x78b   :  { %8070 = vmatpush.msra.mxu2 %v7889_v49  ;;  %7794 = vmatpush.msrb.mxu1 %v12861_v38  ;;  %v6228_v38 = vpop.permute.xlu0 %6227  ;;  %v6182_v49 = vpop.permute.xlu1 %6181 }
 0x78c   :  { %7922 = vmatpush.msrb.mxu3 %v7921_v9  ;;  %7975 = vmatpush.msra.mxu0 %v12984_v15  ;;  %v13119_v15 = vand.u32 4294901760, %v6326_v36  ;;  %v6234_v29 = vsel %vm407_vm7, %v12787_v33, %v6228_v38 }
 0x78d   :  { %8074 = vmatpush.msra.mxu2 %v7895_v40  ;;  %7796 = vmatpush.msrb.mxu1 %v12874_v4  ;;  %v7939_v4 = vand.u32 4294901760, %v7938_v2  ;;  %v6280_v40 = vsel %vm454_vm6, %v12771_v5, %v6274_v56  ;;  %v13143_v33 = vand.u32 4294901760, %v6234_v29 }
 0x78e   :  { %7928 = vmatpush.msrb.mxu3 %v7927_v47  ;;  %7978 = vmatpush.msra.mxu0 %v12993_v17  ;;  %v6188_v17 = vsel %vm313_vm9, %v12907_v59, %v6182_v49  ;;  %v13133_v5 = vand.u32 4294901760, %v6280_v40  ;;  %v13139_v41 = vsub.f32 %v6326_v36, %v13119_v15 }
 0x78f   :  { %7694 = vmatmul.f32.vlgmr.msra.gmra.mxu3 %v12337_v58  ;;  %8078 = vmatpush.msra.mxu2 %v7901_v10  ;;  %v13147_v59 = vand.u32 4294901760, %v6188_v17 }
 0x790   :  { %7798 = vmatpush.msrb.mxu1 %v12891_v21  ;;  %7934 = vmatpush.msrb.mxu3 %v7933_v48  ;;  %v6124_v21 = vpop.permute.xlu2 %6123  ;;  %v13153_v16 = vsub.f32 %v6280_v40, %v13133_v5 }
 0x791   :  { %7601 = vmatmul.f32.vlgmr.msra.gmra.mxu1 %v12294_v61  ;;  %7981 = vmatpush.msra.mxu0 %v13016_v6  ;;  %v6130_v51 = vsel %vm254_vm10, %v12950_v31, %v6124_v21  ;;  %v13169_v6 = vand.u32 4294901760, %v12179_v13  ;;  %v13174_v31 = vsub.f32 %v6188_v17, %v13147_v59 }
 0x792   :  { %8015 = vmatpush.msra.mxu1 %v12926_v52  ;;  %8082 = vmatpush.msra.mxu2 %v7907_v14  ;;  %v13179_v14 = vand.u32 4294901760, %v6130_v51 }
 0x793   :  { %7940 = vmatpush.msrb.mxu3 %v7939_v4  ;;  %7984 = vmatpush.msra.mxu0 %v13031_v44  ;;  %v6032_v10 = vpop.permute.xlu1 %6031 }
 0x794   :  { %8017 = vmatpush.msra.mxu1 %v12935_v25  ;;  %8086 = vmatpush.msra.mxu2 %v7913_v3  ;;  %v6038_v44 = vsel %vm113_vm13, %v12987_v22, %v6032_v10  ;;  %v8248_v22 = vand.u32 4294901760, %v13174_v31 }
 0x795   :  { %8123 = vmatpush.msra.mxu3 %v12926_v52  ;;  %7987 = vmatpush.msra.mxu0 %v13048_v20  ;;  %v6078_v52 = vpop.permute.xlu0 %6077  ;;  %v13203_v3 = vand.u32 4294901760, %v6038_v44  ;;  %v13206_v20 = vsub.f32 %v6130_v51, %v13179_v14 }
 0x796   :  { %8019 = vmatpush.msra.mxu1 %v12952_v53  ;;  %8090 = vmatpush.msra.mxu2 %v7919_v50  ;;  %v6084_v57 = vsel %vm160_vm12, %v12968_v24, %v6078_v52 }
 0x797   :  { %8125 = vmatpush.msra.mxu3 %v12935_v25  ;;  %7763 = vmatmul.f32.vlgmr.msrb.gmra.mxu0 %v12294_v61  ;;  %v8230_v25 = vand.u32 4294901760, %v13139_v41  ;;  %v13191_v0 = vand.u32 4294901760, %v6084_v57  ;;  %v13230_v50 = vsub.f32 %v6038_v44, %v13203_v3  ;;  %v8260_v1 = vand.u32 4294901760, %v13206_v20 }
 0x798   :  { %7990 = vmatpush.msra.mxu0 %v13060_v43  ;;  %8021 = vmatpush.msra.mxu1 %v12964_v54  ;;  %v5986_v28 = vpop.permute.xlu2 %5985  ;;  %v6633_v27 = vpop.f32.mrf.mxu0 }
 0x799   :  { %8094 = vmatpush.msra.mxu2 %v7925_v37  ;;  %8127 = vmatpush.msra.mxu3 %v12952_v53  ;;  %v13164_v53 = vsub.f32 %v6234_v29, %v13143_v33  ;;  %v8231_v24 = vsub.f32 %v13139_v41, %v8230_v25  ;;  %v13218_v30 = vsub.f32 %v6084_v57, %v13191_v0  ;;  %v8272_v9 = vand.u32 4294901760, %v13230_v50 }
 0x79a   :  { %7800 = vmatmul.f32.vlgmr.msrb.gmra.mxu1 %v12294_v61  ;;  %7993 = vmatpush.msra.mxu0 %v13074_v45 }
 0x79b   :  { %8023 = vmatpush.msra.mxu1 %v12977_v7  ;;  %8098 = vmatpush.msra.mxu2 %v7931_v34  ;;  %v8242_v11 = vand.u32 4294901760, %v13164_v53  ;;  %v8232_v35 = vand.u32 4294901760, %v8231_v24  ;;  %v6672_v36 = vpop.f32.mrf.mxu1  ;;  %v8273_v49 = vsub.f32 %v13230_v50, %v8272_v9 }
 0x79c   :  { %8129 = vmatpush.msra.mxu3 %v12964_v54  ;;  %8160 = vmatpush.msrb.mxu0 %v13119_v15  ;;  %v8236_v54 = vand.u32 4294901760, %v13153_v16 }
 0x79d   :  { %8025 = vmatpush.msra.mxu1 %v13000_v23  ;;  %8102 = vmatpush.msra.mxu2 %v7937_v42  ;;  %v8261_v42 = vsub.f32 %v13206_v20, %v8260_v1  ;;  %v8274_v52 = vand.u32 4294901760, %v8273_v49 }
 0x79e   :  { %8131 = vmatpush.msra.mxu3 %v12977_v7  ;;  %7841 = vmatmul.f32.vlgmr.msrb.gmra.mxu2 %v12394_v39  ;;  %v13197_v7 = vsub.f32 %v12179_v13, %v13169_v6  ;;  %v8237_v13 = vsub.f32 %v13153_v16, %v8236_v54 }
 0x79f   :  { %8162 = vmatpush.msrb.mxu0 %v13133_v5  ;;  %8310 = vmatpush.msrb.mxu2 %v13139_v41  ;;  %v6478_v32 = vpop.f32.mrf.mxu2  ;;  %v8262_v4 = vand.u32 4294901760, %v8261_v42 }
 0x7a0   :  { %8027 = vmatpush.msra.mxu1 %v13018_v63  ;;  %8133 = vmatpush.msra.mxu3 %v13000_v23  ;;  %v5992_v23 = vsel %vm66_vm14, %v13021_v26, %v5986_v28  ;;  %v8254_v26 = vand.u32 4294901760, %v13197_v7  ;;  %v8238_v46 = vand.u32 4294901760, %v8237_v13 }
 0x7a1   :  { %8164 = vmatpush.msrb.mxu0 %v13143_v33  ;;  %8313 = vmatpush.msrb.mxu2 %v13153_v16  ;;  %v13226_v43 = vand.u32 4294901760, %v5992_v23 }
 0x7a2   :  { %8029 = vmatpush.msra.mxu1 %v13036_v12  ;;  %8135 = vmatpush.msra.mxu3 %v13018_v63  ;;  %v8243_v63 = vsub.f32 %v13164_v53, %v8242_v11  ;;  %v8255_v45 = vsub.f32 %v13197_v7, %v8254_v26 }
 0x7a3   :  { %8166 = vmatpush.msrb.mxu0 %v13147_v59  ;;  %8316 = vmatpush.msrb.mxu2 %v13164_v53  ;;  %v13248_v34 = vsub.f32 %v5992_v23, %v13226_v43 }
 0x7a4   :  { %8031 = vmatpush.msra.mxu1 %v13052_v18  ;;  %8137 = vmatpush.msra.mxu3 %v13036_v12  ;;  %v8249_v12 = vsub.f32 %v13174_v31, %v8248_v22  ;;  %v8244_v37 = vand.u32 4294901760, %v8243_v63  ;;  %v13245_v60 = vpop.permute.xlu0 %6437  ;;  %v6579_v55 = vpop.f32.mrf.mxu3  ;;  %v8256_v47 = vand.u32 4294901760, %v8255_v45 }
 0x7a5   :  { %8168 = vmatpush.msrb.mxu0 %v13169_v6  ;;  %8319 = vmatpush.msrb.mxu2 %v13174_v31  ;;  %v6479_v8 = vadd.f32 %v6478_v32, %v13245_v60  ;;  %v8278_v48 = vand.u32 4294901760, %v13248_v34 }
 0x7a6   :  { %8233 = vmatpush.msrb.mxu1 %v8232_v35  ;;  %8139 = vmatpush.msra.mxu3 %v13052_v18  ;;  %v8266_v18 = vand.u32 4294901760, %v13218_v30  ;;  %v8250_v62 = vand.u32 4294901760, %v8249_v12 }
 0x7a7   :  { %7942 = vmatmul.f32.vlgmr.msrb.gmra.mxu3 %v12294_v61  ;;  %8170 = vmatpush.msrb.mxu0 %v13179_v14  ;;  %v6580_v56 = vadd.f32 %v6579_v55, %v6479_v8  ;;  %v8279_v21 = vsub.f32 %v13248_v34, %v8278_v48 }
 0x7a8   :  { %8239 = vmatpush.msrb.mxu1 %v8238_v46  ;;  %8322 = vmatpush.msrb.mxu2 %v13197_v7  ;;  %v8267_v2 = vsub.f32 %v13218_v30, %v8266_v18 }
 0x7a9   :  { %8356 = vmatpush.msrb.mxu3 %v13119_v15  ;;  %8172 = vmatpush.msrb.mxu0 %v13191_v0  ;;  %v6634_v38 = vadd.f32 %v6633_v27, %v6580_v56 }
 0x7aa   :  { %8245 = vmatpush.msrb.mxu1 %v8244_v37  ;;  %8325 = vmatpush.msrb.mxu2 %v13206_v20  ;;  %v8268_v40 = vand.u32 4294901760, %v8267_v2 }
 0x7ab   :  { %8358 = vmatpush.msrb.mxu3 %v13133_v5  ;;  %8174 = vmatpush.msrb.mxu0 %v13203_v3  ;;  %v6673_v29 = vadd.f32 %v6672_v36, %v6634_v38 }
 0x7ac   :  { %8251 = vmatpush.msrb.mxu1 %v8250_v62  ;;  %8328 = vmatpush.msrb.mxu2 %v13218_v30 }
 0x7ad   :  { %8360 = vmatpush.msrb.mxu3 %v13143_v33  ;;  %8176 = vmatpush.msrb.mxu0 %v13226_v43 }
 0x7ae   :  { %8257 = vmatpush.msrb.mxu1 %v8256_v47  ;;  %8331 = vmatpush.msrb.mxu2 %v13230_v50 }
 0x7af   :  { %8362 = vmatpush.msrb.mxu3 %v13147_v59  ;;  %7996 = vmatmul.f32.vlgmr.msra.gmra.mxu0 %v12314_v19 }
 0x7b0   :  { %8411 = vmatpush.msra.mxu0 %v8230_v25  ;;  %8263 = vmatpush.msrb.mxu1 %v8262_v4  ;;  %v8280_v25 = vand.u32 4294901760, %v8279_v21 }
 0x7b1   :  { %8334 = vmatpush.msrb.mxu2 %v13248_v34  ;;  %8364 = vmatpush.msrb.mxu3 %v13169_v6  ;;  %v6741_v17 = vpop.f32.mrf.mxu2 }
 0x7b2   :  { %8415 = vmatpush.msra.mxu0 %v8236_v54  ;;  %8269 = vmatpush.msrb.mxu1 %v8268_v40  ;;  %v6742_v41 = vadd.f32 %v6741_v17, %v6673_v29 }
 0x7b3   :  { %8366 = vmatpush.msrb.mxu3 %v13179_v14  ;;  %8104 = vmatmul.f32.vlgmr.msra.gmra.mxu2 %v12294_v61 }
 0x7b4   :  { %8419 = vmatpush.msra.mxu0 %v8242_v11  ;;  %8275 = vmatpush.msrb.mxu1 %v8274_v52 }
 0x7b5   :  { %8368 = vmatpush.msrb.mxu3 %v13191_v0  ;;  %8035 = vmatmul.f32.vlgmr.msra.gmra.mxu1 %v12337_v58 }
 0x7b6   :  { %8141 = vmatmul.f32.vlgmr.msra.gmra.mxu3 %v12294_v61  ;;  %8423 = vmatpush.msra.mxu0 %v8248_v22 }
 0x7b7   :  { %8281 = vmatpush.msrb.mxu1 %v8280_v25  ;;  %8370 = vmatpush.msrb.mxu3 %v13203_v3 }
 0x7b8   :  { %v6778_v16 = vpop.f32.mrf.mxu3  ;;  %8427 = vmatpush.msra.mxu0 %v8254_v26 }
 0x7b9   :  { %8464 = vmatpush.msra.mxu1 %v13119_v15  ;;  %v6779_v51 = vadd.f32 %v6778_v16, %v6742_v41  ;;  %8372 = vmatpush.msrb.mxu3 %v13226_v43 }
 0x7ba   :  { %8182 = vmatmul.f32.vlgmr.msrb.gmra.mxu0 %v12394_v39 }
 0x7bb   :  { %8431 = vmatpush.msra.mxu0 %v8260_v1  ;;  %8466 = vmatpush.msra.mxu1 %v13133_v5  ;;  %8486 = vst [vmem:[%s13339_s6] sm:$0xff] %v6779_v51 }
 0x7bc   :  { %8337 = vmatmul.f32.vlgmr.msrb.gmra.mxu2 %v12314_v19  ;;  %v6819_v19 = vpop.f32.mrf.mxu0 }
 0x7bd   :  { %8435 = vmatpush.msra.mxu0 %v8266_v18  ;;  %8468 = vmatpush.msra.mxu1 %v13143_v33  ;;  %v6820_v39 = vadd.f32 %v6819_v19, %v13245_v60 }
 0x7be   :  { %8283 = vmatmul.f32.vlgmr.msrb.gmra.mxu1 %v12294_v61  ;;  %8376 = vmatmul.f32.vlgmr.msrb.gmra.mxu3 %v12337_v58 }
 0x7bf   :  { %8439 = vmatpush.msra.mxu0 %v8272_v9  ;;  %8470 = vmatpush.msra.mxu1 %v13147_v59 }
 0x7c1   :  { %8443 = vmatpush.msra.mxu0 %v8278_v48  ;;  %8472 = vmatpush.msra.mxu1 %v13169_v6 }
 0x7c2   :  { %8445 = vmatmul.f32.vlgmr.msra.gmra.mxu0 %v12294_v61 }
 0x7c3   :  { %8474 = vmatpush.msra.mxu1 %v13179_v14 }
 0x7c5   :  { %8476 = vmatpush.msra.mxu1 %v13191_v0 }
 0x7c7   :  { %8478 = vmatpush.msra.mxu1 %v13203_v3 }
 0x7c9   :  { %8480 = vmatpush.msra.mxu1 %v13226_v43 }
 0x7ca   :  { %8482 = vmatmul.f32.vlgmr.msra.gmra.mxu1 %v12294_v61 }
 0x7d1   :  { %v6974_v58 = vpop.f32.mrf.mxu2 }
 0x7d2   :  { %v6920_v15 = vpop.f32.mrf.mxu1 }
 0x7d3   :  { %v6921_v5 = vadd.f32 %v6920_v15, %v6820_v39 }
 0x7d5   :  { %v6975_v33 = vadd.f32 %v6974_v58, %v6921_v5 }
 0x7d6   :  { %v7013_v59 = vpop.f32.mrf.mxu3 }
 0x7d7   :  { %v7014_v53 = vadd.f32 %v7013_v59, %v6975_v33 }
 0x7d8   :  { %v7082_v10 = vpop.f32.mrf.mxu0 }
 0x7d9   :  { %v7083_v6 = vadd.f32 %v7082_v10, %v7014_v53 }
 0x7db   :  { %v7119_v57 = vpop.f32.mrf.mxu1 }
 0x7dc   :  { %v7120_v31 = vadd.f32 %v7119_v57, %v7083_v6 }
 0x7de   :  { %8487 = vst [vmem:[%s13339_s6 + $0x8] sm:$0xff] %v7120_v31 }
 0x7e5   :  { %v7160_v14 = vpop.f32.mrf.mxu2 }
 0x7e6   :  { %v7161_v61 = vadd.f32 %v7160_v14, %v13245_v60 }
 0x7ee   :  { %v7261_v54 = vpop.f32.mrf.mxu3 }
 0x7ef   :  { %v7262_v24 = vadd.f32 %v7261_v54, %v7161_v61 }
 0x7f0   :  { %v7315_v44 = vpop.f32.mrf.mxu0 }
 0x7f1   :  { %v7316_v28 = vadd.f32 %v7315_v44, %v7262_v24 }
 0x7f9   :  { %v7423_v7 = vpop.f32.mrf.mxu2 }
 0x7fa   :  { %v7354_v0 = vpop.f32.mrf.mxu1 }
 0x7fb   :  { %v7355_v11 = vadd.f32 %v7354_v0, %v7316_v28 }
 0x7fd   :  { %v7424_v22 = vadd.f32 %v7423_v7, %v7355_v11 }
 0x7fe   :  { %v7460_v3 = vpop.f32.mrf.mxu3 }
 0x7ff   :  { %v7461_v20 = vadd.f32 %v7460_v3, %v7424_v22 }
 0x801   :  { %8488 = vst [vmem:[%s13339_s6 + $0x10] sm:$0xff] %v7461_v20 }
 0x804   :  { %v7501_v23 = vpop.f32.mrf.mxu0 }
 0x805   :  { %v7502_v13 = vadd.f32 %v7501_v23, %v13245_v60 }
 0x80d   :  { %v7656_v30 = vpop.f32.mrf.mxu2 }
 0x80e   :  { %v7602_v35 = vpop.f32.mrf.mxu1 }
 0x80f   :  { %v7603_v63 = vadd.f32 %v7602_v35, %v7502_v13 }
 0x811   :  { %v7657_v26 = vadd.f32 %v7656_v30, %v7603_v63 }
 0x812   :  { %v7695_v43 = vpop.f32.mrf.mxu3 }
 0x813   :  { %v7696_v50 = vadd.f32 %v7695_v43, %v7657_v26 }
 0x814   :  { %v7764_v46 = vpop.f32.mrf.mxu0 }
 0x815   :  { %v7765_v12 = vadd.f32 %v7764_v46, %v7696_v50 }
 0x817   :  { %v7801_v1 = vpop.f32.mrf.mxu1 }
 0x818   :  { %v7802_v37 = vadd.f32 %v7801_v1, %v7765_v12 }
 0x81a   :  { %8489 = vst [vmem:[%s13339_s6 + $0x18] sm:$0xff] %v7802_v37 }
 0x821   :  { %v7842_v45 = vpop.f32.mrf.mxu2 }
 0x822   :  { %v7843_v18 = vadd.f32 %v7842_v45, %v13245_v60 }
 0x82a   :  { %v7943_v32 = vpop.f32.mrf.mxu3 }
 0x82b   :  { %v7944_v34 = vadd.f32 %v7943_v32, %v7843_v18 }
 0x82c   :  { %v7997_v8 = vpop.f32.mrf.mxu0 }
 0x82d   :  { %v7998_v55 = vadd.f32 %v7997_v8, %v7944_v34 }
 0x832   :  { %v8036_v62 = vpop.f32.mrf.mxu1 }
 0x833   :  { %v8037_v42 = vadd.f32 %v8036_v62, %v7998_v55 }
 0x836   :  { %v8105_v9 = vpop.f32.mrf.mxu2 }
 0x837   :  { %v8183_v27 = vpop.f32.mrf.mxu0  ;;  %v8106_v56 = vadd.f32 %v8105_v9, %v8037_v42 }
 0x838   :  { %v8184_v47 = vadd.f32 %v8183_v27, %v13245_v60 }
 0x839   :  { %v8142_v2 = vpop.f32.mrf.mxu3 }
 0x83a   :  { %v8143_v48 = vadd.f32 %v8142_v2, %v8106_v56 }
 0x83b   :  { %v8284_v38 = vpop.f32.mrf.mxu1 }
 0x83c   :  { %v8285_v36 = vadd.f32 %v8284_v38, %v8184_v47  ;;  %8490 = vst [vmem:[%s13339_s6 + $0x20] sm:$0xff] %v8143_v48 }
 0x83f   :  { %v8338_v4 = vpop.f32.mrf.mxu2  ;;  %v8446_v29 = vpop.f32.mrf.mxu0 }
 0x840   :  { %v8339_v49 = vadd.f32 %v8338_v4, %v8285_v36 }
 0x841   :  { %v8377_v40 = vpop.f32.mrf.mxu3 }
 0x842   :  { %v8378_v21 = vadd.f32 %v8377_v40, %v8339_v49 }
 0x844   :  { %v8447_v17 = vadd.f32 %v8446_v29, %v8378_v21 }
 0x847   :  { %v8483_v52 = vpop.f32.mrf.mxu1 }
 0x848   :  { %v8484_v41 = vadd.f32 %v8483_v52, %v8447_v17 }
 0x84a   :  { %8491 = vst [vmem:[%s13339_s6 + $0x28] sm:$0xff] %v8484_v41 }

</bundles_post_ra>
